<compile_context>
chip_gen: v7x
topology: tpu7x:2x2x1
jax: 0.10.0
libtpu: 0.0.40
codegen_flags: <defaults>
</compile_context>

<pallas_src>
import jax
import jax.numpy as jnp
from jax.experimental import pallas as pl
from jax.experimental.pallas import tpu as pltpu

EPS = 1e-5


# ----------------------------- Pallas kernel ------------------------------- #

def _make_kernel(TH, Wp, Cp):
    """Fused residual block for one (image, row-tile) grid step.

    Frames (flattened row-major over (rows, Wp) with Cp lanes):
      input window : TH+8 padded rows   (2-row halo per conv layer + 1 slack row/side)
      conv1 output : TH+4 rows          (conv2 input incl. its 1-row halo + slack)
      conv2 output : TH   rows
    Every tap of both convs is the slice  src[(dy+1)*Wp + dx - 1 : ... ]  of the
    previous frame, so all slab stores / matmul loads are full-width and unmasked.
    """
    MW = (TH + 8) * Wp          # input-window rows (flattened)
    MG = (TH + 4) * Wp          # conv1-output / conv2-input rows
    MO = TH * Wp                # conv2-output rows
    KC = 3 * Cp                 # K of one dy-group matmul chunk
    OFFS = tuple((dy + 1) * Wp + (dx - 1) for dy in range(3) for dx in range(3))

    def kernel(x_ref, w1_ref, w2_ref, sb1_ref, sb2_ref, mask_ref, o_ref, slab_ref):
        t = pl.program_id(1)
        row0 = t * TH
        if TH % 8 == 0:
            row0 = pl.multiple_of(row0, 8)

        # ---------------- conv1: im2col slab -> 3 large-K matmuls ---------------
        win = x_ref[0, pl.ds(row0, TH + 8), :, :]            # (TH+8, Wp, Cp) bf16
        wflat = win.reshape(MW, Cp)                          # layout-preserving
        for tap, off in enumerate(OFFS):
            # dy handled by an aligned row offset (multiple of Wp); dx in {0,2} is a
            # +/-1-row shift paid exactly once into a lane-aligned slab column block.
            slab_ref[:, tap * Cp:(tap + 1) * Cp] = wflat[off:off + MG, :]

        acc1 = jnp.zeros((MG, Cp), jnp.float32)
        for g in range(3):                                   # K = 3*Cp per dot
            acc1 += jnp.dot(slab_ref[:, g * KC:(g + 1) * KC],
                            w1_ref[g * KC:(g + 1) * KC, :],
                            preferred_element_type=jnp.float32)
        y1 = jnp.maximum(acc1 * sb1_ref[0:1, :] + sb1_ref[1:2, :], 0.0)
        # Zero conv2's padding ring (image top/bottom rows for boundary tiles and the
        # left/right pad columns).  Mask is host-precomputed -> one broadcast multiply.
        y1 = y1 * mask_ref[0]                                # (MG,Cp) * (MG,1)
        y1b = y1.astype(jnp.bfloat16)

        # ---------------- conv2: same im2col construction from y1 ---------------
        for tap, off in enumerate(OFFS):
            slab_ref[0:MO, tap * Cp:(tap + 1) * Cp] = y1b[off:off + MO, :]
        acc2 = jnp.zeros((MO, Cp), jnp.float32)
        for g in range(3):
            acc2 += jnp.dot(slab_ref[0:MO, g * KC:(g + 1) * KC],
                            w2_ref[g * KC:(g + 1) * KC, :],
                            preferred_element_type=jnp.float32)
        y2 = acc2 * sb2_ref[0:1, :] + sb2_ref[1:2, :]

        # ------------- residual add + final ReLU (f32), dense store -------------
        res = x_ref[0, pl.ds(row0 + 4, TH), :, :].reshape(MO, Cp).astype(jnp.float32)
        out = jnp.maximum(y2 + res, 0.0)
        o_ref[...] = out.reshape(1, TH, Wp, Cp)

    return kernel


# ------------------------------- JAX glue ---------------------------------- #

def _round_up(x, m):
    return (x + m - 1) // m * m


def _fold_bn(conv_bias, gamma, beta, rmean, rvar, cp):
    scale = gamma / jnp.sqrt(rvar + EPS)
    bias = beta + (conv_bias - rmean) * scale
    scale = jnp.pad(scale, (0, cp - scale.shape[0]))
    bias = jnp.pad(bias, (0, cp - bias.shape[0]))
    return jnp.stack([scale, bias], axis=0).astype(jnp.float32)      # (2, Cp)


def _prep_weight(w_oihw, cp):
    # (Co, Ci, 3, 3) -> (9*Cp, Cp) bf16; K-block t = dy*3+dx holds W[dy,dx] as (Ci,Co).
    co, ci = w_oihw.shape[0], w_oihw.shape[1]
    wt = jnp.transpose(w_oihw, (2, 3, 1, 0)).reshape(9, ci, co)
    wt = jnp.pad(wt, ((0, 0), (0, cp - ci), (0, cp - co)))
    return wt.reshape(9 * cp, cp).astype(jnp.bfloat16)


@jax.jit
def residual_forward(x_nchw, w1, b1, g1, be1, rm1, rv1,
                     w2, b2, g2, be2, rm2, rv2):
    N, C, H, W = x_nchw.shape
    Co = w1.shape[0]
    assert Co == C, "residual add requires in_size == out_size"
    Cp = _round_up(C, 128)                 # lane-dense channels
    Wp = _round_up(W + 2, 8)               # sublane-dense padded width
    TH = 8 if H % 8 == 0 else H            # output rows per grid step (row tile)
    T = H // TH
    MG = (TH + 4) * Wp

    # NHWC; 4 zero rows top/bottom (2-deep fused-conv halo + slack), 1 zero col left,
    # zero cols right up to Wp, channel pad to Cp; bf16 GEMM operands.
    x = jnp.transpose(x_nchw, (0, 2, 3, 1))
    x = jnp.pad(x, ((0, 0), (4, 4), (1, Wp - (W + 1)), (0, Cp - C)))
    x = x.astype(jnp.bfloat16)

    w1m = _prep_weight(w1, Cp)
    w2m = _prep_weight(w2, Cp)
    sb1 = _fold_bn(b1, g1, be1, rm1, rv1, Cp)
    sb2 = _fold_bn(b2, g2, be2, rm2, rv2, Cp)

    # Per-tile mask zeroing conv2's padding ring in the conv1-activation frame:
    # frame row gamma of tile t is image row t*TH - 2 + gamma; keep rows in [0, H)
    # and columns in [1, W].
    gam = jnp.arange(TH + 4)
    y1row = jnp.arange(T)[:, None] * TH - 2 + gam[None, :]             # (T, TH+4)
    row_ok = (y1row >= 0) & (y1row < H)
    cols = jnp.arange(Wp)
    col_ok = (cols >= 1) & (cols <= W)                                  # (Wp,)
    mask = (row_ok[:, :, None] & col_ok[None, None, :]).astype(jnp.float32)
    mask = mask.reshape(T, MG, 1)

    kernel = _make_kernel(TH, Wp, Cp)

    out = pl.pallas_call(
        kernel,
        out_shape=jax.ShapeDtypeStruct((N, H, Wp, Cp), jnp.float32),
        grid_spec=pltpu.PrefetchScalarGridSpec(
            num_scalar_prefetch=0,
            grid=(N, T),
            in_specs=[
                # Whole padded image per batch element; block index ignores t so it is
                # DMA'd once per image and reused by all of that image's row tiles.
                pl.BlockSpec((1, H + 8, Wp, Cp), lambda n, t: (n, 0, 0, 0)),
                # Grid-invariant operands: constant index_map -> fetched once.
                # (pl.Buffered(1) would additionally drop their second VMEM buffer.)
                pl.BlockSpec((9 * Cp, Cp), lambda n, t: (0, 0)),
                pl.BlockSpec((9 * Cp, Cp), lambda n, t: (0, 0)),
                pl.BlockSpec((2, Cp), lambda n, t: (0, 0)),
                pl.BlockSpec((2, Cp), lambda n, t: (0, 0)),
                pl.BlockSpec((1, MG, 1), lambda n, t: (t, 0, 0)),
            ],
            out_specs=pl.BlockSpec((1, TH, Wp, Cp), lambda n, t: (n, t, 0, 0)),
            scratch_shapes=[pltpu.VMEM((MG, 9 * Cp), jnp.bfloat16)],
        ),
        compiler_params=pltpu.CompilerParams(
            dimension_semantics=("parallel", "parallel"),
            vmem_limit_bytes=64 * 1024 * 1024,
        ),
    )(x, w1m, w2m, sb1, sb2, mask)

    out = out[:, :, 1:1 + W, :C]                 # drop column/channel padding
    return jnp.transpose(out, (0, 3, 1, 2))      # back to NCHW


# ----------------------------- pure-JAX reference --------------------------- #

def residual_reference(x_nchw, w1, b1, g1, be1, rm1, rv1,
                       w2, b2, g2, be2, rm2, rv2, quantize=False):
    """f32 reference.  quantize=True mimics the kernel's bf16 operand precision
    (inputs/weights/conv1-activation rounded to bf16, math in f32)."""
    q = (lambda t: t.astype(jnp.bfloat16).astype(jnp.float32)) if quantize else (lambda t: t)
    x_, w1_, w2_ = q(x_nchw), q(w1), q(w2)

    def conv(x, w, b):
        y = jax.lax.conv_general_dilated(
            x, w, window_strides=(1, 1), padding=((1, 1), (1, 1)),
            dimension_numbers=('NCHW', 'OIHW', 'NCHW'))
        return y + b[None, :, None, None]

    def bn(y, g, be, rm, rv):
        return ((y - rm[None, :, None, None])
                / jnp.sqrt(rv[None, :, None, None] + EPS)
                * g[None, :, None, None] + be[None, :, None, None])

    y = jnp.maximum(bn(conv(x_, w1_, b1), g1, be1, rm1, rv1), 0.0)
    y = q(y)
    y = bn(conv(y, w2_, b2), g2, be2, rm2, rv2)
    return jnp.maximum(y + x_, 0.0)


# ---------------------------------- main ------------------------------------ #

if __name__ == "__main__":
    N, C, H, W, KS = 2, 4, 16, 16, 3   # in_size == out_size (required by residual add)
    key = jax.random.PRNGKey(0)
    keys = jax.random.split(key, 5)

    x_nchw = jax.random.normal(keys[0], (N, C, H, W), jnp.float32)

    def conv_params(k, cin, cout):
        kw, kb = jax.random.split(k)
        bound = 1.0 / (cin * KS * KS) ** 0.5
        w = jax.random.uniform(kw, (cout, cin, KS, KS), jnp.float32, -bound, bound)
        b = jax.random.uniform(kb, (cout,), jnp.float32, -bound, bound)
        return w, b

    def bn_params(k, c):
        k1, k2, k3, k4 = jax.random.split(k, 4)
        gamma = jax.random.uniform(k1, (c,), jnp.float32, 0.8, 1.2)
        beta = jax.random.uniform(k2, (c,), jnp.float32, -0.1, 0.1)
        rmean = jax.random.normal(k3, (c,), jnp.float32) * 0.1
        rvar = jax.random.uniform(k4, (c,), jnp.float32, 0.5, 1.5)
        return gamma, beta, rmean, rvar

    w1, b1 = conv_params(keys[1], C, C)
    g1, be1, rm1, rv1 = bn_params(keys[2], C)
    w2, b2 = conv_params(keys[3], C, C)
    g2, be2, rm2, rv2 = bn_params(keys[4], C)

    params = (w1, b1, g1, be1, rm1, rv1, w2, b2, g2, be2, rm2, rv2)

    out = residual_forward(x_nchw, *params)
    out = jax.block_until_ready(out)
    assert out.shape == (N, C, H, W) and out.dtype == jnp.float32

    # strict check vs. a reference using the same bf16 operand precision
    ref_q = residual_reference(x_nchw, *params, quantize=True)
    assert jnp.allclose(out, ref_q, atol=1e-2, rtol=1e-2), "mismatch vs bf16-matched reference"

    # loose check vs. the pure-f32 module semantics (bf16 rounding tolerance)
    ref_f32 = residual_reference(x_nchw, *params, quantize=False)
    assert jnp.allclose(out, ref_f32, atol=1e-1, rtol=1e-1), "mismatch vs f32 reference"

    print("KERNEL_OK")
</pallas_src>

<mosaic_0001>
module attributes {stable_mosaic.version = 11 : i64} {
  func.func @kernel(%arg0: i32, %arg1: i32, %arg2: memref<1x24x24x128xbf16, #tpu.memory_space<vmem>>, %arg3: memref<1152x128xbf16, #tpu.memory_space<vmem>>, %arg4: memref<1152x128xbf16, #tpu.memory_space<vmem>>, %arg5: memref<2x128xf32, #tpu.memory_space<vmem>>, %arg6: memref<2x128xf32, #tpu.memory_space<vmem>>, %arg7: memref<1x288x1xf32, #tpu.memory_space<vmem>>, %arg8: memref<1x8x24x128xf32, #tpu.memory_space<vmem>>, %arg9: memref<288x1152xbf16, #tpu.memory_space<vmem>>) attributes {dimension_semantics = [#tpu.dimension_semantics<parallel>, #tpu.dimension_semantics<parallel>], iteration_bounds = array<i64: 2, 2>, scalar_prefetch = 0 : i64, scratch_operands = 1 : i64, tpu.core_type = #tpu.core_type<tc>, window_params = [{transform_indices = @transform_0, window_bounds = array<i64: 1, 24, 24, 128>}, {pipeline_mode = #tpu.pipeline_mode<synchronous>, transform_indices = @transform_1, window_bounds = array<i64: 1152, 128>}, {pipeline_mode = #tpu.pipeline_mode<synchronous>, transform_indices = @transform_2, window_bounds = array<i64: 1152, 128>}, {pipeline_mode = #tpu.pipeline_mode<synchronous>, transform_indices = @transform_3, window_bounds = array<i64: 2, 128>}, {pipeline_mode = #tpu.pipeline_mode<synchronous>, transform_indices = @transform_4, window_bounds = array<i64: 2, 128>}, {transform_indices = @transform_5, window_bounds = array<i64: 1, 288, 1>}, {transform_indices = @transform_6, window_bounds = array<i64: 1, 8, 24, 128>}]} {
    %c8_i32 = arith.constant 8 : i32
    %0 = arith.muli %arg1, %c8_i32 : i32
    %1 = tpu.assume_multiple %0, 8 : i32
    %c0 = arith.constant 0 : index
    %2 = arith.index_cast %1 : i32 to index
    %c0_0 = arith.constant 0 : index
    %c0_1 = arith.constant 0 : index
    %3 = vector.load %arg2[%c0, %2, %c0_0, %c0_1] : memref<1x24x24x128xbf16, #tpu.memory_space<vmem>>, vector<1x16x24x128xbf16>
    %4 = vector.shape_cast %3 : vector<1x16x24x128xbf16> to vector<16x24x128xbf16>
    %5 = vector.shape_cast %4 : vector<16x24x128xbf16> to vector<384x128xbf16>
    %6 = vector.extract_strided_slice %5 {offsets = [23, 0], sizes = [288, 128], strides = [1, 1]} : vector<384x128xbf16> to vector<288x128xbf16>
    %c0_2 = arith.constant 0 : index
    %c0_3 = arith.constant 0 : index
    %7 = vector.load %arg9[%c0_2, %c0_3] : memref<288x1152xbf16, #tpu.memory_space<vmem>>, vector<288x128xbf16>
    tpu.vector_store %arg9[%c0_2, %c0_3], %6 {strides = array<i32>} : memref<288x1152xbf16, #tpu.memory_space<vmem>>, vector<288x128xbf16>,
    %8 = vector.extract_strided_slice %5 {offsets = [24, 0], sizes = [288, 128], strides = [1, 1]} : vector<384x128xbf16> to vector<288x128xbf16>
    %c0_4 = arith.constant 0 : index
    %c128 = arith.constant 128 : index
    %9 = vector.load %arg9[%c0_4, %c128] : memref<288x1152xbf16, #tpu.memory_space<vmem>>, vector<288x128xbf16>
    tpu.vector_store %arg9[%c0_4, %c128], %8 {strides = array<i32>} : memref<288x1152xbf16, #tpu.memory_space<vmem>>, vector<288x128xbf16>,
    %10 = vector.extract_strided_slice %5 {offsets = [25, 0], sizes = [288, 128], strides = [1, 1]} : vector<384x128xbf16> to vector<288x128xbf16>
    %c0_5 = arith.constant 0 : index
    %c256 = arith.constant 256 : index
    %11 = vector.load %arg9[%c0_5, %c256] : memref<288x1152xbf16, #tpu.memory_space<vmem>>, vector<288x128xbf16>
    tpu.vector_store %arg9[%c0_5, %c256], %10 {strides = array<i32>} : memref<288x1152xbf16, #tpu.memory_space<vmem>>, vector<288x128xbf16>,
    %12 = vector.extract_strided_slice %5 {offsets = [47, 0], sizes = [288, 128], strides = [1, 1]} : vector<384x128xbf16> to vector<288x128xbf16>
    %c0_6 = arith.constant 0 : index
    %c384 = arith.constant 384 : index
    %13 = vector.load %arg9[%c0_6, %c384] : memref<288x1152xbf16, #tpu.memory_space<vmem>>, vector<288x128xbf16>
    tpu.vector_store %arg9[%c0_6, %c384], %12 {strides = array<i32>} : memref<288x1152xbf16, #tpu.memory_space<vmem>>, vector<288x128xbf16>,
    %14 = vector.extract_strided_slice %5 {offsets = [48, 0], sizes = [288, 128], strides = [1, 1]} : vector<384x128xbf16> to vector<288x128xbf16>
    %c0_7 = arith.constant 0 : index
    %c512 = arith.constant 512 : index
    %15 = vector.load %arg9[%c0_7, %c512] : memref<288x1152xbf16, #tpu.memory_space<vmem>>, vector<288x128xbf16>
    tpu.vector_store %arg9[%c0_7, %c512], %14 {strides = array<i32>} : memref<288x1152xbf16, #tpu.memory_space<vmem>>, vector<288x128xbf16>,
    %16 = vector.extract_strided_slice %5 {offsets = [49, 0], sizes = [288, 128], strides = [1, 1]} : vector<384x128xbf16> to vector<288x128xbf16>
    %c0_8 = arith.constant 0 : index
    %c640 = arith.constant 640 : index
    %17 = vector.load %arg9[%c0_8, %c640] : memref<288x1152xbf16, #tpu.memory_space<vmem>>, vector<288x128xbf16>
    tpu.vector_store %arg9[%c0_8, %c640], %16 {strides = array<i32>} : memref<288x1152xbf16, #tpu.memory_space<vmem>>, vector<288x128xbf16>,
    %18 = vector.extract_strided_slice %5 {offsets = [71, 0], sizes = [288, 128], strides = [1, 1]} : vector<384x128xbf16> to vector<288x128xbf16>
    %c0_9 = arith.constant 0 : index
    %c768 = arith.constant 768 : index
    %19 = vector.load %arg9[%c0_9, %c768] : memref<288x1152xbf16, #tpu.memory_space<vmem>>, vector<288x128xbf16>
    tpu.vector_store %arg9[%c0_9, %c768], %18 {strides = array<i32>} : memref<288x1152xbf16, #tpu.memory_space<vmem>>, vector<288x128xbf16>,
    %20 = vector.extract_strided_slice %5 {offsets = [72, 0], sizes = [288, 128], strides = [1, 1]} : vector<384x128xbf16> to vector<288x128xbf16>
    %c0_10 = arith.constant 0 : index
    %c896 = arith.constant 896 : index
    %21 = vector.load %arg9[%c0_10, %c896] : memref<288x1152xbf16, #tpu.memory_space<vmem>>, vector<288x128xbf16>
    tpu.vector_store %arg9[%c0_10, %c896], %20 {strides = array<i32>} : memref<288x1152xbf16, #tpu.memory_space<vmem>>, vector<288x128xbf16>,
    %22 = vector.extract_strided_slice %5 {offsets = [73, 0], sizes = [288, 128], strides = [1, 1]} : vector<384x128xbf16> to vector<288x128xbf16>
    %c0_11 = arith.constant 0 : index
    %c1024 = arith.constant 1024 : index
    %23 = vector.load %arg9[%c0_11, %c1024] : memref<288x1152xbf16, #tpu.memory_space<vmem>>, vector<288x128xbf16>
    tpu.vector_store %arg9[%c0_11, %c1024], %22 {strides = array<i32>} : memref<288x1152xbf16, #tpu.memory_space<vmem>>, vector<288x128xbf16>,
    %cst = arith.constant 0.000000e+00 : f32
    %24 = vector.broadcast %cst : f32 to vector<288x128xf32>
    %c0_12 = arith.constant 0 : index
    %c0_13 = arith.constant 0 : index
    %25 = vector.load %arg9[%c0_12, %c0_13] : memref<288x1152xbf16, #tpu.memory_space<vmem>>, vector<288x384xbf16>
    %c0_14 = arith.constant 0 : index
    %c0_15 = arith.constant 0 : index
    %26 = vector.load %arg3[%c0_14, %c0_15] : memref<1152x128xbf16, #tpu.memory_space<vmem>>, vector<384x128xbf16>
    %cst_16 = arith.constant dense<0.000000e+00> : vector<288x128xf32>
    %27 = tpu.matmul %25, %26, %cst_16 {dimension_numbers = #tpu.dot_dimension_numbers<[1], [0], [0], [1], [0, 0, 1, 1], [], []>} : vector<288x384xbf16>, vector<384x128xbf16>, vector<288x128xf32> -> vector<288x128xf32>
    %28 = arith.addf %24, %27 : vector<288x128xf32>
    %c0_17 = arith.constant 0 : index
    %c384_18 = arith.constant 384 : index
    %29 = vector.load %arg9[%c0_17, %c384_18] : memref<288x1152xbf16, #tpu.memory_space<vmem>>, vector<288x384xbf16>
    %c384_19 = arith.constant 384 : index
    %c0_20 = arith.constant 0 : index
    %30 = vector.load %arg3[%c384_19, %c0_20] : memref<1152x128xbf16, #tpu.memory_space<vmem>>, vector<384x128xbf16>
    %cst_21 = arith.constant dense<0.000000e+00> : vector<288x128xf32>
    %31 = tpu.matmul %29, %30, %cst_21 {dimension_numbers = #tpu.dot_dimension_numbers<[1], [0], [0], [1], [0, 0, 1, 1], [], []>} : vector<288x384xbf16>, vector<384x128xbf16>, vector<288x128xf32> -> vector<288x128xf32>
    %32 = arith.addf %28, %31 : vector<288x128xf32>
    %c0_22 = arith.constant 0 : index
    %c768_23 = arith.constant 768 : index
    %33 = vector.load %arg9[%c0_22, %c768_23] : memref<288x1152xbf16, #tpu.memory_space<vmem>>, vector<288x384xbf16>
    %c768_24 = arith.constant 768 : index
    %c0_25 = arith.constant 0 : index
    %34 = vector.load %arg3[%c768_24, %c0_25] : memref<1152x128xbf16, #tpu.memory_space<vmem>>, vector<384x128xbf16>
    %cst_26 = arith.constant dense<0.000000e+00> : vector<288x128xf32>
    %35 = tpu.matmul %33, %34, %cst_26 {dimension_numbers = #tpu.dot_dimension_numbers<[1], [0], [0], [1], [0, 0, 1, 1], [], []>} : vector<288x384xbf16>, vector<384x128xbf16>, vector<288x128xf32> -> vector<288x128xf32>
    %36 = arith.addf %32, %35 : vector<288x128xf32>
    %c0_27 = arith.constant 0 : index
    %c0_28 = arith.constant 0 : index
    %37 = vector.load %arg5[%c0_27, %c0_28] : memref<2x128xf32, #tpu.memory_space<vmem>>, vector<1x128xf32>
    %38 = vector.broadcast %37 : vector<1x128xf32> to vector<288x128xf32>
    %39 = arith.mulf %36, %38 : vector<288x128xf32>
    %c1 = arith.constant 1 : index
    %c0_29 = arith.constant 0 : index
    %40 = vector.load %arg5[%c1, %c0_29] : memref<2x128xf32, #tpu.memory_space<vmem>>, vector<1x128xf32>
    %41 = vector.broadcast %40 : vector<1x128xf32> to vector<288x128xf32>
    %42 = arith.addf %39, %41 : vector<288x128xf32>
    %cst_30 = arith.constant 0.000000e+00 : f32
    %43 = vector.broadcast %cst_30 : f32 to vector<288x128xf32>
    %44 = arith.maximumf %42, %43 : vector<288x128xf32>
    %c0_31 = arith.constant 0 : index
    %c0_32 = arith.constant 0 : index
    %c0_33 = arith.constant 0 : index
    %45 = vector.load %arg7[%c0_31, %c0_32, %c0_33] : memref<1x288x1xf32, #tpu.memory_space<vmem>>, vector<1x288x1xf32>
    %46 = vector.shape_cast %45 : vector<1x288x1xf32> to vector<288x1xf32>
    %47 = vector.broadcast %46 : vector<288x1xf32> to vector<288x128xf32>
    %48 = arith.mulf %44, %47 : vector<288x128xf32>
    %49 = arith.truncf %48 : vector<288x128xf32> to vector<288x128xbf16>
    %50 = vector.extract_strided_slice %49 {offsets = [23, 0], sizes = [192, 128], strides = [1, 1]} : vector<288x128xbf16> to vector<192x128xbf16>
    %c0_34 = arith.constant 0 : index
    %c0_35 = arith.constant 0 : index
    %51 = vector.load %arg9[%c0_34, %c0_35] : memref<288x1152xbf16, #tpu.memory_space<vmem>>, vector<192x128xbf16>
    tpu.vector_store %arg9[%c0_34, %c0_35], %50 {strides = array<i32>} : memref<288x1152xbf16, #tpu.memory_space<vmem>>, vector<192x128xbf16>,
    %52 = vector.extract_strided_slice %49 {offsets = [24, 0], sizes = [192, 128], strides = [1, 1]} : vector<288x128xbf16> to vector<192x128xbf16>
    %c0_36 = arith.constant 0 : index
    %c128_37 = arith.constant 128 : index
    %53 = vector.load %arg9[%c0_36, %c128_37] : memref<288x1152xbf16, #tpu.memory_space<vmem>>, vector<192x128xbf16>
    tpu.vector_store %arg9[%c0_36, %c128_37], %52 {strides = array<i32>} : memref<288x1152xbf16, #tpu.memory_space<vmem>>, vector<192x128xbf16>,
    %54 = vector.extract_strided_slice %49 {offsets = [25, 0], sizes = [192, 128], strides = [1, 1]} : vector<288x128xbf16> to vector<192x128xbf16>
    %c0_38 = arith.constant 0 : index
    %c256_39 = arith.constant 256 : index
    %55 = vector.load %arg9[%c0_38, %c256_39] : memref<288x1152xbf16, #tpu.memory_space<vmem>>, vector<192x128xbf16>
    tpu.vector_store %arg9[%c0_38, %c256_39], %54 {strides = array<i32>} : memref<288x1152xbf16, #tpu.memory_space<vmem>>, vector<192x128xbf16>,
    %56 = vector.extract_strided_slice %49 {offsets = [47, 0], sizes = [192, 128], strides = [1, 1]} : vector<288x128xbf16> to vector<192x128xbf16>
    %c0_40 = arith.constant 0 : index
    %c384_41 = arith.constant 384 : index
    %57 = vector.load %arg9[%c0_40, %c384_41] : memref<288x1152xbf16, #tpu.memory_space<vmem>>, vector<192x128xbf16>
    tpu.vector_store %arg9[%c0_40, %c384_41], %56 {strides = array<i32>} : memref<288x1152xbf16, #tpu.memory_space<vmem>>, vector<192x128xbf16>,
    %58 = vector.extract_strided_slice %49 {offsets = [48, 0], sizes = [192, 128], strides = [1, 1]} : vector<288x128xbf16> to vector<192x128xbf16>
    %c0_42 = arith.constant 0 : index
    %c512_43 = arith.constant 512 : index
    %59 = vector.load %arg9[%c0_42, %c512_43] : memref<288x1152xbf16, #tpu.memory_space<vmem>>, vector<192x128xbf16>
    tpu.vector_store %arg9[%c0_42, %c512_43], %58 {strides = array<i32>} : memref<288x1152xbf16, #tpu.memory_space<vmem>>, vector<192x128xbf16>,
    %60 = vector.extract_strided_slice %49 {offsets = [49, 0], sizes = [192, 128], strides = [1, 1]} : vector<288x128xbf16> to vector<192x128xbf16>
    %c0_44 = arith.constant 0 : index
    %c640_45 = arith.constant 640 : index
    %61 = vector.load %arg9[%c0_44, %c640_45] : memref<288x1152xbf16, #tpu.memory_space<vmem>>, vector<192x128xbf16>
    tpu.vector_store %arg9[%c0_44, %c640_45], %60 {strides = array<i32>} : memref<288x1152xbf16, #tpu.memory_space<vmem>>, vector<192x128xbf16>,
    %62 = vector.extract_strided_slice %49 {offsets = [71, 0], sizes = [192, 128], strides = [1, 1]} : vector<288x128xbf16> to vector<192x128xbf16>
    %c0_46 = arith.constant 0 : index
    %c768_47 = arith.constant 768 : index
    %63 = vector.load %arg9[%c0_46, %c768_47] : memref<288x1152xbf16, #tpu.memory_space<vmem>>, vector<192x128xbf16>
    tpu.vector_store %arg9[%c0_46, %c768_47], %62 {strides = array<i32>} : memref<288x1152xbf16, #tpu.memory_space<vmem>>, vector<192x128xbf16>,
    %64 = vector.extract_strided_slice %49 {offsets = [72, 0], sizes = [192, 128], strides = [1, 1]} : vector<288x128xbf16> to vector<192x128xbf16>
    %c0_48 = arith.constant 0 : index
    %c896_49 = arith.constant 896 : index
    %65 = vector.load %arg9[%c0_48, %c896_49] : memref<288x1152xbf16, #tpu.memory_space<vmem>>, vector<192x128xbf16>
    tpu.vector_store %arg9[%c0_48, %c896_49], %64 {strides = array<i32>} : memref<288x1152xbf16, #tpu.memory_space<vmem>>, vector<192x128xbf16>,
    %66 = vector.extract_strided_slice %49 {offsets = [73, 0], sizes = [192, 128], strides = [1, 1]} : vector<288x128xbf16> to vector<192x128xbf16>
    %c0_50 = arith.constant 0 : index
    %c1024_51 = arith.constant 1024 : index
    %67 = vector.load %arg9[%c0_50, %c1024_51] : memref<288x1152xbf16, #tpu.memory_space<vmem>>, vector<192x128xbf16>
    tpu.vector_store %arg9[%c0_50, %c1024_51], %66 {strides = array<i32>} : memref<288x1152xbf16, #tpu.memory_space<vmem>>, vector<192x128xbf16>,
    %cst_52 = arith.constant 0.000000e+00 : f32
    %68 = vector.broadcast %cst_52 : f32 to vector<192x128xf32>
    %c0_53 = arith.constant 0 : index
    %c0_54 = arith.constant 0 : index
    %69 = vector.load %arg9[%c0_53, %c0_54] : memref<288x1152xbf16, #tpu.memory_space<vmem>>, vector<192x384xbf16>
    %c0_55 = arith.constant 0 : index
    %c0_56 = arith.constant 0 : index
    %70 = vector.load %arg4[%c0_55, %c0_56] : memref<1152x128xbf16, #tpu.memory_space<vmem>>, vector<384x128xbf16>
    %cst_57 = arith.constant dense<0.000000e+00> : vector<192x128xf32>
    %71 = tpu.matmul %69, %70, %cst_57 {dimension_numbers = #tpu.dot_dimension_numbers<[1], [0], [0], [1], [0, 0, 1, 1], [], []>} : vector<192x384xbf16>, vector<384x128xbf16>, vector<192x128xf32> -> vector<192x128xf32>
    %72 = arith.addf %68, %71 : vector<192x128xf32>
    %c0_58 = arith.constant 0 : index
    %c384_59 = arith.constant 384 : index
    %73 = vector.load %arg9[%c0_58, %c384_59] : memref<288x1152xbf16, #tpu.memory_space<vmem>>, vector<192x384xbf16>
    %c384_60 = arith.constant 384 : index
    %c0_61 = arith.constant 0 : index
    %74 = vector.load %arg4[%c384_60, %c0_61] : memref<1152x128xbf16, #tpu.memory_space<vmem>>, vector<384x128xbf16>
    %cst_62 = arith.constant dense<0.000000e+00> : vector<192x128xf32>
    %75 = tpu.matmul %73, %74, %cst_62 {dimension_numbers = #tpu.dot_dimension_numbers<[1], [0], [0], [1], [0, 0, 1, 1], [], []>} : vector<192x384xbf16>, vector<384x128xbf16>, vector<192x128xf32> -> vector<192x128xf32>
    %76 = arith.addf %72, %75 : vector<192x128xf32>
    %c0_63 = arith.constant 0 : index
    %c768_64 = arith.constant 768 : index
    %77 = vector.load %arg9[%c0_63, %c768_64] : memref<288x1152xbf16, #tpu.memory_space<vmem>>, vector<192x384xbf16>
    %c768_65 = arith.constant 768 : index
    %c0_66 = arith.constant 0 : index
    %78 = vector.load %arg4[%c768_65, %c0_66] : memref<1152x128xbf16, #tpu.memory_space<vmem>>, vector<384x128xbf16>
    %cst_67 = arith.constant dense<0.000000e+00> : vector<192x128xf32>
    %79 = tpu.matmul %77, %78, %cst_67 {dimension_numbers = #tpu.dot_dimension_numbers<[1], [0], [0], [1], [0, 0, 1, 1], [], []>} : vector<192x384xbf16>, vector<384x128xbf16>, vector<192x128xf32> -> vector<192x128xf32>
    %80 = arith.addf %76, %79 : vector<192x128xf32>
    %c0_68 = arith.constant 0 : index
    %c0_69 = arith.constant 0 : index
    %81 = vector.load %arg6[%c0_68, %c0_69] : memref<2x128xf32, #tpu.memory_space<vmem>>, vector<1x128xf32>
    %82 = vector.broadcast %81 : vector<1x128xf32> to vector<192x128xf32>
    %83 = arith.mulf %80, %82 : vector<192x128xf32>
    %c1_70 = arith.constant 1 : index
    %c0_71 = arith.constant 0 : index
    %84 = vector.load %arg6[%c1_70, %c0_71] : memref<2x128xf32, #tpu.memory_space<vmem>>, vector<1x128xf32>
    %85 = vector.broadcast %84 : vector<1x128xf32> to vector<192x128xf32>
    %86 = arith.addf %83, %85 : vector<192x128xf32>
    %c4_i32 = arith.constant 4 : i32
    %87 = arith.addi %1, %c4_i32 : i32
    %c0_72 = arith.constant 0 : index
    %88 = arith.index_cast %87 : i32 to index
    %c0_73 = arith.constant 0 : index
    %c0_74 = arith.constant 0 : index
    %89 = vector.load %arg2[%c0_72, %88, %c0_73, %c0_74] : memref<1x24x24x128xbf16, #tpu.memory_space<vmem>>, vector<1x8x24x128xbf16>
    %90 = vector.shape_cast %89 : vector<1x8x24x128xbf16> to vector<8x24x128xbf16>
    %91 = vector.shape_cast %90 : vector<8x24x128xbf16> to vector<192x128xbf16>
    %92 = arith.extf %91 : vector<192x128xbf16> to vector<192x128xf32>
    %93 = arith.addf %86, %92 : vector<192x128xf32>
    %cst_75 = arith.constant 0.000000e+00 : f32
    %94 = vector.broadcast %cst_75 : f32 to vector<192x128xf32>
    %95 = arith.maximumf %93, %94 : vector<192x128xf32>
    %96 = vector.shape_cast %95 : vector<192x128xf32> to vector<1x8x24x128xf32>
    %c0_76 = arith.constant 0 : index
    %c0_77 = arith.constant 0 : index
    %c0_78 = arith.constant 0 : index
    %c0_79 = arith.constant 0 : index
    %97 = vector.load %arg8[%c0_76, %c0_77, %c0_78, %c0_79] : memref<1x8x24x128xf32, #tpu.memory_space<vmem>>, vector<1x8x24x128xf32>
    tpu.vector_store %arg8[%c0_76, %c0_77, %c0_78, %c0_79], %96 {strides = array<i32>} : memref<1x8x24x128xf32, #tpu.memory_space<vmem>>, vector<1x8x24x128xf32>,
    return
  }
  func.func @transform_0(%arg0: i32, %arg1: i32) -> (i32, i32, i32, i32) {
    %c0_i32 = arith.constant 0 : i32
    %c0_i32_0 = arith.constant 0 : i32
    %c0_i32_1 = arith.constant 0 : i32
    %c0_i32_2 = arith.constant 0 : i32
    return %arg0, %c0_i32, %c0_i32_0, %c0_i32_1 : i32, i32, i32, i32
  }
  func.func @transform_1(%arg0: i32, %arg1: i32) -> (i32, i32) {
    %c0_i32 = arith.constant 0 : i32
    %c0_i32_0 = arith.constant 0 : i32
    %c0_i32_1 = arith.constant 0 : i32
    return %c0_i32, %c0_i32_0 : i32, i32
  }
  func.func @transform_2(%arg0: i32, %arg1: i32) -> (i32, i32) {
    %c0_i32 = arith.constant 0 : i32
    %c0_i32_0 = arith.constant 0 : i32
    %c0_i32_1 = arith.constant 0 : i32
    return %c0_i32, %c0_i32_0 : i32, i32
  }
  func.func @transform_3(%arg0: i32, %arg1: i32) -> (i32, i32) {
    %c0_i32 = arith.constant 0 : i32
    %c0_i32_0 = arith.constant 0 : i32
    %c0_i32_1 = arith.constant 0 : i32
    return %c0_i32, %c0_i32_0 : i32, i32
  }
  func.func @transform_4(%arg0: i32, %arg1: i32) -> (i32, i32) {
    %c0_i32 = arith.constant 0 : i32
    %c0_i32_0 = arith.constant 0 : i32
    %c0_i32_1 = arith.constant 0 : i32
    return %c0_i32, %c0_i32_0 : i32, i32
  }
  func.func @transform_5(%arg0: i32, %arg1: i32) -> (i32, i32, i32) {
    %c0_i32 = arith.constant 0 : i32
    %c0_i32_0 = arith.constant 0 : i32
    %c0_i32_1 = arith.constant 0 : i32
    return %arg1, %c0_i32, %c0_i32_0 : i32, i32, i32
  }
  func.func @transform_6(%arg0: i32, %arg1: i32) -> (i32, i32, i32, i32) {
    %c0_i32 = arith.constant 0 : i32
    %c0_i32_0 = arith.constant 0 : i32
    %c0_i32_1 = arith.constant 0 : i32
    return %arg0, %arg1, %c0_i32, %c0_i32_0 : i32, i32, i32, i32
  }
}

</mosaic_0001>

<bundles_post_ra>
// kernel: residual_forward.1
= control target key start
LH: loop header
LB: loop body
LE: loop exit
PB: predicated region body
PF: predicated region fallthrough
CT: control target
= control target key end

     0   :  { %s10849_s0 = inlined_call_operand.hbm [shape: bf16[2,24,24,128], index: 0, kind: input, shape index: {}]   ;;  %s10850_s1 = inlined_call_operand.hbm [shape: bf16[1152,128], index: 1, kind: input, shape index: {}]   ;;  %s10851_s2 = inlined_call_operand.hbm [shape: bf16[1152,128], index: 2, kind: input, shape index: {}]   ;;  %s10852_s3 = inlined_call_operand.hbm [shape: f32[2,128], index: 3, kind: input, shape index: {}]   ;;  %s10853_s4 = inlined_call_operand.hbm [shape: f32[2,128], index: 4, kind: input, shape index: {}]   ;;  %s10854_s5 = inlined_call_operand.hbm [shape: f32[2,288,1], index: 5, kind: input, shape index: {}]   ;;  %s10855_s6 = inlined_call_operand.hbm [shape: f32[2,16,24,128], index: 6, kind: output, shape index: {}]  }
   0x1   :  { %10992 = sst [smem:[#allocation74_spill]] %s10849_s0 }
   0x2   :  { %10993 = sst [smem:[#allocation75_spill]] %s10850_s1 }
   0x3   :  { %10994 = sst [smem:[#allocation76_spill]] %s10851_s2 }
   0x4   :  { %10995 = sst [smem:[#allocation77_spill]] %s10852_s3 }
   0x5   :  { %10996 = sst [smem:[#allocation78_spill]] %s10853_s4 }
   0x6   :  { %10997 = sst [smem:[#allocation79_spill]] %s10854_s5 }
   0x7   :  { %10998 = sst [smem:[#allocation80_spill]] %s10855_s6 }
   0x8   :  { %11 = vsyncpa [#allocation4], 0 }
   0x9   :  { %13 = vsyncpa [#allocation4 + $0x1], 0 }
   0xa   :  { %14 = vsyncpa [#allocation7], 0 }
   0xb   :  { %15 = vsyncpa [#allocation10], 0 }
   0xc   :  { %16 = vsyncpa [#allocation13], 0 }
   0xd   :  { %18 = vsyncpa [#allocation13 + $0x1], 0 }
   0xe   :  { %19 = vsyncpa [#allocation5], 0 }
   0xf   :  { %21 = vsyncpa [#allocation5 + $0x1], 0  ;;  %s7787_s21 = smov 0   ;;  %s7789_s22 = smov 0  }
  0x10   :  { %s7791_s23 = smov 0   ;;  %s7793_s24 = smov 0  }
  0x11   :  { %s7795_s25 = smov 0   ;;  %s7797_s26 = smov 0  }
  0x12   :  { %s7799_s27 = smov 0   ;;  %s7801_s28 = smov 0  }
  0x13   :  { %s7803_s29 = smov 0   ;;  %s7805_s30 = smov 0  }
  0x14   :  { %s7807_s7 = smov 0   ;;  %s7809_s8 = smov 0  }
  0x15   :  { %s7811_s9 = smov 0   ;;  %s7813_s10 = smov 0  }
  0x16 LB: > { %10999 = sst [smem:[#allocation20_spill]] %s7684_s21  ;;  %s5864_s11 = sadd.s32 4294967295, %s7736_s10   ;;  %s7736_s10 = sphi %s7813_s10, %s27_s10   ;;  %s7732_s9 = sphi %s7811_s9, %s11415_s9   ;;  %s7728_s8 = sphi %s7809_s8, %s11414_s8   ;;  %s7724_s7 = sphi %s7807_s7, %s11413_s7   ;;  %s7720_s30 = sphi %s7805_s30, %s11412_s30   ;;  %s7716_s29 = sphi %s7803_s29, %s11411_s29   ;;  %s7712_s28 = sphi %s7801_s28, %s11410_s28   ;;  %s7708_s27 = sphi %s7799_s27, %s11409_s27   ;;  %s7704_s26 = sphi %s7797_s26, %s11408_s26   ;;  %s7700_s25 = sphi %s7795_s25, %s11407_s25   ;;  %s7696_s24 = sphi %s7793_s24, %s11406_s24   ;;  %s7692_s23 = sphi %s7791_s23, %s11405_s23   ;;  %s7688_s22 = sphi %s7789_s22, %s11403_s22   ;;  %s7684_s21 = sphi %s7787_s21, %s11402_s21  }
  0x17   : > { %11000 = sst [smem:[#allocation21_spill]] %s7688_s22  ;;  %p5866_p0 = scmp.ge.s32.totalorder %s7736_s10, 1 }
  0x18   : > { %11001 = sst [smem:[#allocation22_spill]] %s7692_s23  ;;  %p7859_p1 = scmp.eq.s32.totalorder %s5864_s11, 0 }
  0x19   : > { %11002 = sst [smem:[#allocation23_spill]] %s7720_s30  ;;  %p7863_p2 = scmp.eq.s32.totalorder %s5864_s11, 3 }
  0x1a   : > { %11003 = sst [smem:[#allocation24_spill]] %s7724_s7  ;;  %p208_p3 = scmp.lt.s32.totalorder %s7736_s10, 5 }
  0x1b   : > { %s11004_s12 = scalar_select %p7859_p1, 1, 0 }
  0x1c   : > { %s11005_s13 = scalar_select %p7863_p2, 1, 0 }
  0x1d   : > { %p7868_p4 = pnand %p5866_p0, %p208_p3  ;;  %s7738_s15 = smov [#allocation6]  }
  0x1e   : > { %11006 = sst [smem:[#allocation25_spill]] %s11005_s13  ;;  %s220_s16 = sshll.u32 %s7738_s15, 4  ;;  %s7872_s16 = int_to_ptr.vmem [resolvable:$true] %s220_s16 }
  0x1f   : > { %s11007_s14 = scalar_select %p7868_p4, 1, 0 }
  0x20   : > { %p7051_p5 = pneg %p7868_p4  ;;  %s7739_s18 = smov [#allocation9]  }
  0x21   : > { %11008 = sst [smem:[#allocation26_spill]] %s11007_s14  ;;  %s247_s19 = sshll.u32 %s7739_s18, 4  ;;  %s7882_s19 = int_to_ptr.vmem [resolvable:$true] %s247_s19 }
  0x22   : > { %p7878_p6 = pnand %p7051_p5, %p7859_p1  ;;  %s7740_s20 = smov [#allocation8]  }
  0x23   : > { %s233_s11 = sshll.u32 %s7740_s20, 4  ;;  %s11010_s1 = sld [smem:[#allocation75_spill]]  ;;  %s7884_s11 = int_to_ptr.vmem [resolvable:$true] %s233_s11 }
  0x24   : > { %p7894_p8 = pneg %p7878_p6 }
  0x29   : > { %s7406_s7 = scalar_lea.hbm %s11010_s1, 9216 }
  0x2a   : > { %p7407_p7 = scmp.ne.s32.totalorder %s11010_s1, %s7406_s7  ;;  %p7413_p11 = scmp.lt.u32.totalorder %s7406_s7, %s11010_s1 }
  0x2c   : > { %p7409_p9 = pnand %p7894_p8, %p7407_p7 }
  0x2e   : > { %p7410_p10 = pneg %p7409_p9 }
  0x30   : > { %p7415_p12 = pnand %p7413_p11, %p7410_p10 }
  0x32   : > { %7418 = shalt.err (!%p7415_p12)
}
  0x33   : > { %s7419_s6 = scalar_lea.vmem %s7872_s16, 9216  ;;  %p7427_p5 = scmp.lt.s32.totalorder %s7872_s16, %s7872_s16 }
  0x34   : > { %p7420_p13 = scmp.ne.s32.totalorder %s7872_s16, %s7419_s6  ;;  %p7428_p4 = scmp.lt.s32.totalorder %s7419_s6, %s7419_s6 }
  0x36   : > { %p7422_p0 = pnand %p7420_p13, %p7894_p8  ;;  %p7429_p7 = por %p7428_p4, %p7427_p5 }
  0x38   : > { %p7423_p3 = pneg %p7422_p0 }
  0x3a   : > { %p7430_p9 = pnand %p7429_p7, %p7423_p3 }
  0x3c   : > { %7433 = shalt.err (!%p7430_p9)
}
  0x3d   : > { %s7741_s30 = smov 64   ;;  %s7742_s7 = smov 4  }
  0x3e   : > { %7054 = dma.hbm_to_vmem [thread:$0]  (!%p7878_p6), %s11010_s1, 9216, %s7872_s16, [#allocation7], %s7741_s30, %s7741_s30, %s7742_s7  }
  0x3f   : > { %s11012_s3 = sld [smem:[#allocation77_spill]] }
  0x45   : > { %s7434_s6 = scalar_lea.hbm %s11012_s3, 32 }
  0x46   : > { %p7435_p4 = scmp.ne.s32.totalorder %s11012_s3, %s7434_s6  ;;  %p7441_p12 = scmp.lt.u32.totalorder %s7434_s6, %s11012_s3 }
  0x48   : > { %p7437_p10 = pnand %p7435_p4, %p7894_p8 }
  0x4a   : > { %p7438_p11 = pneg %p7437_p10 }
  0x4c   : > { %p7443_p13 = pnand %p7441_p12, %p7438_p11 }
  0x4e   : > { %7446 = shalt.err (!%p7443_p13)
}
  0x4f   : > { %s7447_s16 = scalar_lea.vmem %s7882_s19, 32  ;;  %p7455_p7 = scmp.lt.s32.totalorder %s7882_s19, %s7882_s19 }
  0x50   : > { %p7448_p0 = scmp.ne.s32.totalorder %s7882_s19, %s7447_s16  ;;  %p7456_p9 = scmp.lt.s32.totalorder %s7447_s16, %s7447_s16 }
  0x52   : > { %p7450_p3 = pnand %p7448_p0, %p7894_p8  ;;  %p7457_p4 = por %p7456_p9, %p7455_p7 }
  0x54   : > { %p7451_p5 = pneg %p7450_p3 }
  0x56   : > { %p7458_p10 = pnand %p7457_p4, %p7451_p5 }
  0x58   : > { %7461 = shalt.err (!%p7458_p10)
}
  0x59   : > { %7060 = dma.hbm_to_vmem [thread:$0]  (!%p7878_p6), %s11012_s3, 32, %s7882_s19, [#allocation10]  }
  0x5a   : > { %s11013_s2 = sld [smem:[#allocation76_spill]] }
  0x60   : > { %s7462_s14 = scalar_lea.hbm %s11013_s2, 9216 }
  0x61   : > { %p7463_p11 = scmp.ne.s32.totalorder %s11013_s2, %s7462_s14  ;;  %p7469_p0 = scmp.lt.u32.totalorder %s7462_s14, %s11013_s2 }
  0x63   : > { %p7465_p12 = pnand %p7463_p11, %p7894_p8 }
  0x65   : > { %p7466_p13 = pneg %p7465_p12 }
  0x67   : > { %p7471_p3 = pnand %p7469_p0, %p7466_p13 }
  0x69   : > { %7474 = shalt.err (!%p7471_p3)
}
  0x6a   : > { %s7475_s19 = scalar_lea.vmem %s7884_s11, 9216  ;;  %p7483_p4 = scmp.lt.s32.totalorder %s7884_s11, %s7884_s11 }
  0x6b   : > { %p7476_p5 = scmp.ne.s32.totalorder %s7884_s11, %s7475_s19  ;;  %p7484_p10 = scmp.lt.s32.totalorder %s7475_s19, %s7475_s19 }
  0x6d   : > { %p7478_p7 = pnand %p7476_p5, %p7894_p8  ;;  %p7485_p11 = por %p7484_p10, %p7483_p4 }
  0x6f   : > { %p7479_p9 = pneg %p7478_p7 }
  0x71   : > { %p7486_p12 = pnand %p7485_p11, %p7479_p9 }
  0x73   : > { %7489 = shalt.err (!%p7486_p12)
}
  0x74   : > { %7057 = dma.hbm_to_vmem [thread:$0]  (!%p7878_p6), %s11013_s2, 9216, %s7884_s11, [#allocation7], %s7741_s30, %s7741_s30, %s7742_s7  }
  0x75   : > { %s7743_s22 = smov [#allocation11]   ;;  %s11014_s4 = sld [smem:[#allocation78_spill]] }
  0x76   : > { %s258_s23 = sshll.u32 %s7743_s22, 4  ;;  %s259_s23 = int_to_ptr.vmem [resolvable:$true] %s258_s23 }
  0x7b   : > { %s7490_s15 = scalar_lea.hbm %s11014_s4, 32 }
  0x7c   : > { %p7491_p13 = scmp.ne.s32.totalorder %s11014_s4, %s7490_s15  ;;  %p7497_p5 = scmp.lt.u32.totalorder %s7490_s15, %s11014_s4 }
  0x7e   : > { %p7493_p0 = pnand %p7491_p13, %p7894_p8 }
  0x80   : > { %p7494_p3 = pneg %p7493_p0 }
  0x82   : > { %p7499_p7 = pnand %p7497_p5, %p7494_p3 }
  0x84   : > { %7502 = shalt.err (!%p7499_p7)
}
  0x85   : > { %s7503_s11 = scalar_lea.vmem %s259_s23, 32  ;;  %p7511_p11 = scmp.lt.s32.totalorder %s259_s23, %s259_s23 }
  0x86   : > { %p7504_p9 = scmp.ne.s32.totalorder %s259_s23, %s7503_s11  ;;  %p7512_p12 = scmp.lt.s32.totalorder %s7503_s11, %s7503_s11 }
  0x88   : > { %p7506_p4 = pnand %p7504_p9, %p7894_p8  ;;  %p7513_p2 = por %p7512_p12, %p7511_p11 }
  0x8a   : > { %p7507_p10 = pneg %p7506_p4 }
  0x8c   : > { %p7514_p1 = pnand %p7513_p2, %p7507_p10 }
  0x8e   : > { %7517 = shalt.err (!%p7514_p1)
}
  0x8f   : > { %7063 = dma.hbm_to_vmem [thread:$0]  (!%p7878_p6), %s11014_s4, 32, %s259_s23, [#allocation10]  }
  0x90   : > { %s39_s5 = sadd.s32 1, %s7732_s9  ;;  %p53_p1 = scmp.ne.s32.totalorder %s7716_s29, %s7712_s28 }
  0x91   : > { %p10869_p2 = scmp.eq.s32.totalorder %s7736_s10, 0  ;;  %p59_p8 = scmp.ne.s32.totalorder %s7712_s28, %s7708_s27 }
  0x92   : > { %p10868_p13 = scmp.lt.s32.totalorder %s7736_s10, 4  ;;  %s269_s17 = sand.u32 1, %s7716_s29  }
  0x93   : > { %p55_p0 = por %p10869_p2, %p53_p1  ;;  %p11015_p3 = scmp.ne.s32.totalorder %s11004_s12, 0 }
  0x94   : > { %s7020_s14 = smul.u32 288, %s269_s17  ;;  %s11018_s0 = sld [smem:[#allocation74_spill]] }
  0x95   : > { %p7998_p5 = por %p11015_p3, %p59_p8  ;;  %s7021_s15 = smul.u32 4608, %s7732_s9 }
  0x96   : > { %p8005_p7 = pnand %p10868_p13, %p55_p0  ;;  %s273_s6 = scalar_lea.vmem [#allocation3], %s7020_s14 }
  0x97   : > { %s11016_s13 = scalar_select %p7998_p5, 1, 0 }
  0x98   : > { %s280_s19 = sshll.u32 %s273_s6, 4  ;;  %s8016_s11 = scalar_lea.sflag [#allocation4], %s269_s17  ;;  %s8014_s19 = int_to_ptr.vmem [resolvable:$true] %s280_s19 }
  0x99   : > { %p7520_p9 = pneg %p8005_p7 }
  0x9a   : > { %s8012_s27 = scalar_lea.hbm %s11018_s0, %s7021_s15  ;;  %s7523_s23 = scalar_lea.hbm %s11018_s0, 9216 }
  0x9b   : > { %s7518_s16 = scalar_lea.hbm %s8012_s27, 4608  ;;  %p7524_p11 = scmp.lt.u32.totalorder %s8012_s27, %s11018_s0 }
  0x9c   : > { %p7519_p6 = scmp.ne.s32.totalorder %s8012_s27, %s7518_s16  ;;  %p7525_p12 = scmp.lt.u32.totalorder %s7523_s23, %s7518_s16 }
  0x9d   : > { %p7527_p8 = scmp.lt.u32.totalorder %s7518_s16, %s8012_s27 }
  0x9e   : > { %p7521_p4 = pnand %p7520_p9, %p7519_p6  ;;  %p7526_p1 = por %p7525_p12, %p7524_p11 }
  0xa0   : > { %p7522_p10 = pneg %p7521_p4  ;;  %p7528_p0 = por %p7527_p8, %p7526_p1 }
  0xa2   : > { %p7529_p13 = pnand %p7528_p0, %p7522_p10 }
  0xa4   : > { %7532 = shalt.err (!%p7529_p13)
}
  0xa5   : > { %s7533_s17 = scalar_lea.vmem %s8014_s19, 4608  ;;  %s7744_s14 = smov [#allocation3]  }
  0xa6   : > { %p7534_p6 = scmp.ne.s32.totalorder %s8014_s19, %s7533_s17  ;;  %s7538_s6 = sshll.u32 %s7744_s14, 4  ;;  %s7539_s6 = int_to_ptr.vmem [resolvable:$false] %s7538_s6 }
  0xa7   : > { %s7540_s22 = scalar_lea.vmem %s7539_s6, 9216  ;;  %p7541_p5 = scmp.lt.s32.totalorder %s8014_s19, %s7539_s6 }
  0xa8   : > { %p7536_p4 = pnand %p7534_p6, %p7520_p9  ;;  %p7542_p11 = scmp.lt.s32.totalorder %s7540_s22, %s7533_s17 }
  0xaa   : > { %p7537_p2 = pneg %p7536_p4  ;;  %p7543_p12 = por %p7542_p11, %p7541_p5 }
  0xac   : > { %p7544_p1 = pnand %p7543_p12, %p7537_p2 }
  0xae   : > { %7547 = shalt.err (!%p7544_p1)
}
  0xaf   : > { %s11019_s16 = sld [smem:[#allocation22_spill]]  ;;  %s11020_s18 = sld [smem:[#allocation21_spill]] }
  0xb0   : > { %7067 = dma.hbm_to_vmem [thread:$0]  (!%p8005_p7), %s8012_s27, 4608, %s8014_s19, %s8016_s11, %s7741_s30, %s7741_s30, %s7742_s7  }
  0xb1   : > { %s5865_s21 = sadd.s32 4294967294, %s7736_s10   ;;  %s36_s15 = sadd.s32 1, %s7728_s8 }
  0xb2   : > { %s156_s23 = sadd.s32 1, %s7704_s26  ;;  %s11021_s20 = sld [smem:[#allocation25_spill]] }
  0xb3   : > { %p37_p2 = scmp.ge.s32.totalorder %s36_s15, 2  ;;  %p163_p13 = scmp.ne.s32.totalorder %s7704_s26, %s7700_s25 }
  0xb4   : > { %p169_p5 = scmp.ne.s32.totalorder %s7700_s25, %s7696_s24  ;;  %s11022_s14 = sld [smem:[#allocation20_spill]] }
  0xb5   : > { %s184_s17 = sadd.s32 1, %s11019_s16  ;;  %s11417_s15 = smov (%p37_p2, %s36_s15), 0 }
  0xb6   : > { %s11419_s5 = smov (!%p37_p2, %s39_s5), %s7732_s9  ;;  %s153_s30 = ssub.s32 %s7728_s8, %s11417_s15 }
  0xb7   : > { %p11023_p7 = scmp.eq.s32.totalorder %s7736_s10, 0  ;;  %p41_p10 = scmp.ge.s32.totalorder %s11419_s5, 2 }
  0xb8   : > { %p154_p8 = scmp.eq.s32.totalorder %s153_s30, 0  ;;  %p8070_p0 = por %p169_p5, %p11015_p3 }
  0xb9   : > { %p8064_p9 = por %p163_p13, %p11023_p7  ;;  %p194_p6 = scmp.ne.s32.totalorder %s11019_s16, %s11020_s18 }
  0xba   : > { %s11421_s5 = smov (%p41_p10, %s11419_s5), 0  ;;  %p11026_p4 = scmp.ne.s32.totalorder %s11021_s20, 0 }
  0xbb   : > { %s8079_s27 = scalar_select %p154_p8, %s7704_s26, %s156_s23  }
  0xbc   : > { %s43_s19 = ssub.s32 %s7732_s9, %s11421_s5  ;;  %p8085_p11 = por %p11026_p4, %p194_p6 }
  0xbd   : > { %p44_p12 = scmp.eq.s32.totalorder %s43_s19, 0  ;;  %s181_s6 = sor.u32 %s153_s30, %s43_s19 }
  0xbe   : > { %s11027_s11 = scalar_select %p8085_p11, 1, 0 }
  0xbf   : > { %p182_p3 = scmp.eq.s32.totalorder %s181_s6, 0  ;;  %p200_p1 = scmp.ne.s32.totalorder %s11020_s18, %s11022_s14 }
  0xc0   : > { %s11028_s22 = sadd.s32 1, %s7716_s29  ;;  %p201_p2 = scmp.eq.s32.totalorder %s5865_s21, 3 }
  0xc1   : > { %s8094_s0 = scalar_select %p44_p12, %s7716_s29, %s11028_s22  }
  0xc2   : > { %s11423_s16 = smov (!%p182_p3, %s11019_s16), %s184_s17  ;;  %s290_s1 = sand.u32 1, %s7704_s26  }
  0xc3   : > { %s7022_s2 = smul.u32 288, %s290_s1  ;;  %p8100_p13 = por %p201_p2, %p200_p1 }
  0xc4   : > { %s7023_s20 = smul.u32 4608, %s7728_s8  ;;  %p11030_p5 = scmp.lt.s32.totalorder %s7736_s10, 4 }
  0xc5   : > { %s11029_s23 = scalar_select %p8100_p13, 1, 0 }
  0xc6   : > { %p8109_p7 = pnand %p11030_p5, %p8064_p9  ;;  %s11032_s30 = sld [smem:[#allocation79_spill]] }
  0xc7   : > { %s294_s21 = scalar_lea.vmem [#allocation12], %s7022_s2  ;;  %s8120_s7 = scalar_lea.sflag [#allocation13], %s290_s1 }
  0xc8   : > { %s301_s6 = sshll.u32 %s294_s21, 4  ;;  %p7550_p10 = pneg %p8109_p7  ;;  %s8118_s6 = int_to_ptr.vmem [resolvable:$true] %s301_s6 }
  0xcc   : > { %s11033_s19 = smov %s11032_s30  ;;  %s8116_s17 = scalar_lea.hbm %s11032_s30, %s7023_s20 }
  0xcd   : > { %s7548_s22 = scalar_lea.hbm %s8116_s17, 4608  ;;  %s7553_s14 = scalar_lea.hbm %s11033_s19, 9216 }
  0xce   : > { %p7549_p9 = scmp.ne.s32.totalorder %s8116_s17, %s7548_s22  ;;  %p7554_p4 = scmp.lt.u32.totalorder %s8116_s17, %s11033_s19 }
  0xcf   : > { %p7555_p12 = scmp.lt.u32.totalorder %s7553_s14, %s7548_s22  ;;  %p7557_p1 = scmp.lt.u32.totalorder %s7548_s22, %s8116_s17 }
  0xd0   : > { %p7551_p8 = pnand %p7550_p10, %p7549_p9 }
  0xd1   : > { %p7556_p3 = por %p7555_p12, %p7554_p4 }
  0xd2   : > { %p7552_p6 = pneg %p7551_p8 }
  0xd3   : > { %p7558_p2 = por %p7557_p1, %p7556_p3 }
  0xd5   : > { %p7559_p5 = pnand %p7558_p2, %p7552_p6 }
  0xd7   : > { %7562 = shalt.err (!%p7559_p5)
}
  0xd8   : > { %s7563_s1 = scalar_lea.vmem %s8118_s6, 4608  ;;  %s7745_s2 = smov [#allocation12]  }
  0xd9   : > { %p7564_p9 = scmp.ne.s32.totalorder %s8118_s6, %s7563_s1  ;;  %s7568_s21 = sshll.u32 %s7745_s2, 4  ;;  %s7569_s21 = int_to_ptr.vmem [resolvable:$false] %s7568_s21 }
  0xda   : > { %s7570_s4 = scalar_lea.vmem %s7569_s21, 9216  ;;  %p7571_p11 = scmp.lt.s32.totalorder %s8118_s6, %s7569_s21 }
  0xdb   : > { %p7566_p8 = pnand %p7564_p9, %p7550_p10  ;;  %p7572_p4 = scmp.lt.s32.totalorder %s7570_s4, %s7563_s1 }
  0xdd   : > { %p7567_p13 = pneg %p7566_p8  ;;  %p7573_p12 = por %p7572_p4, %p7571_p11 }
  0xdf   : > { %p7574_p3 = pnand %p7573_p12, %p7567_p13 }
  0xe1   : > { %7577 = shalt.err (!%p7574_p3)
}
  0xe2   : > { %s7746_s22 = smov 128   ;;  %s7747_s20 = smov 8  }
  0xe3   : > { %7070 = dma.hbm_to_vmem [thread:$0]  (!%p8109_p7), %s8116_s17, 4608, %s8118_s6, %s8120_s7, %s7746_s22, %s7746_s22, %s7747_s20  }
  0xe4   : > { %s11034_s18 = sld [smem:[#allocation26_spill]] }
  0xea   : > { %p11035_p10 = scmp.ne.s32.totalorder %s11034_s18, 0 }
  0xec   : > { %313 = sbr.rel (%p11035_p10) target bundleno = 1698 (0x6a2), region = 44 }
  0xf3   : > { %s315_s14 = sand.u32 1, %s7712_s28   ;;  %p11036_p11 = scmp.ne.s32.totalorder %s11016_s13, 0 }
  0xf4   : > { %s8151_s30 = smul.u32 288, %s315_s14  ;;  %s316_s1 = scalar_lea.sflag [#allocation4], %s315_s14 }
  0xf6   : > { %s319_s2 = scalar_lea.vmem [#allocation3], %s8151_s30 }
  0xf7   : > { %7663 = dma.done.wait (%p11036_p11), %s316_s1, 4608  }
  0xf8   : > { %7665 = vsyncadd (%p11036_p11), %s316_s1, 4294962688  ;;  %p11037_p13 = scmp.ne.s32.totalorder %s11004_s12, 0 }
  0xfa   : > { %7667 = dma.done.wait (%p11037_p13), [#allocation7], 18432  }
  0xfb   : > { %7669 = vsyncadd (%p11037_p13), [#allocation7], 4294948864 }
  0xfc   : > { %7671 = dma.done.wait (%p11037_p13), [#allocation10], 64  }
  0xfd   : > { %7673 = vsyncadd (%p11037_p13), [#allocation10], 4294967232  ;;  %s340_s3 = sand.u32 1, %s7700_s25  }
  0xfe   : > { %s7025_s17 = smul.u32 288, %s340_s3  ;;  %s341_s6 = scalar_lea.sflag [#allocation13], %s340_s3 }
 0x100   : > { %s8167_s7 = scalar_lea.vmem [#allocation12], %s7025_s17 }
 0x101   : > { %7675 = dma.done.wait (%p8070_p0), %s341_s6, 4608  }
 0x102   : > { %7677 = vsyncadd (%p8070_p0), %s341_s6, 4294962688  ;;  %v10895_v0 = vmov 0   ;;  %s11038_s13 = sld [smem:[#allocation23_spill]]  ;;  %v7210_v1 = vld [vmem:[#allocation6 + $0xc0] sm:$0xff]   ;;  %v7211_v2 = vld [vmem:[#allocation6 + $0xc8] sm:$0xff]   ;;  %vm3675_vm3 = vcmask 1043456  }
 0x103   : > { %1716 = vmatprep.subr.bf16.mxu0 %v10895_v0  ;;  %6848 = vmatprep.subr.bf16.mxu1 %v10895_v0  ;;  %v7212_v3 = vld [vmem:[#allocation6 + $0xd0] sm:$0xff]   ;;  %v7213_v4 = vld [vmem:[#allocation6 + $0xd8] sm:$0xff]   ;;  %v7214_v5 = vld [vmem:[#allocation6 + $0xe0] sm:$0xff]   ;;  %vm521_vm0 = vsmask.f32 4352  ;;  %s11394_s21 = sld [smem:[#allocation21_spill]] }
 0x104   : > { %7208 = vset.pattern.permute.xlu0 %v10895_v0  ;;  %7209 = vset.pattern.permute.xlu1 %v10895_v0  ;;  %v7215_v8 = vld [vmem:[#allocation6 + $0xe8] sm:$0xff]   ;;  %v7216_v13 = vld [vmem:[#allocation6 + $0xf0] sm:$0xff]   ;;  %v7217_v16 = vld [vmem:[#allocation6 + $0xf8] sm:$0xff]   ;;  %vm785_vm1 = vsmask.f32 7424  ;;  %s11395_s18 = sld [smem:[#allocation24_spill]] }
 0x105   : > { %1717 = vmatpush1.bf16.msra.mxu0 %v7210_v1  ;;  %6864 = vmatpush1.bf16.msra.mxu1 %v7210_v1  ;;  %v7218_v20 = vld [vmem:[#allocation6 + $0x100] sm:$0xff]   ;;  %v7219_v25 = vld [vmem:[#allocation6 + $0x108] sm:$0xff]   ;;  %v7220_v42 = vld [vmem:[#allocation6 + $0x110] sm:$0xff]   ;;  %vm3801_vm2 = vsmask.f32 256  ;;  %p11398_p7 = scmp.ne.s32.totalorder %s11027_s11, 0 }
 0x106   : > { %1718 = vmatprep.subr.bf16.mxu0 %v10895_v0  ;;  %6849 = vmatprep.subr.bf16.mxu1 %v10895_v0  ;;  %v7221_v54 = vld [vmem:[#allocation6 + $0x118] sm:$0xff]   ;;  %vm3725_vm4 = vsmask.f32 3328 }
 0x108   : > { %s6109_s12 = smul.u32 96, %s11038_s13 }
 0x109   : > { %1719 = vmatpush1.bf16.msra.mxu0 %v7211_v2  ;;  %6865 = vmatpush1.bf16.msra.mxu1 %v7211_v2  ;;  %v7222_v2 = vld [vmem:[#allocation6 + $0x120] sm:$0xff]   ;;  %s375_s4 = sand.u32 1, %s11394_s21   ;;  %s7027_s14 = smul.u32 24, %s11038_s13 }
 0x10a   : > { %1720 = vmatprep.subr.bf16.mxu0 %v10895_v0  ;;  %6850 = vmatprep.subr.bf16.mxu1 %v10895_v0  ;;  %s8186_s24 = scalar_lea.vmem %s319_s2, %s6109_s12 [#allocation3]  ;;  %s7026_s22 = smul.u32 192, %s375_s4 }
 0x10b   : > { %v388_v6 = vld [vmem:[%s8186_s24 + $0x18] sm:$0xf]  ;;  %v389_v7 = vld [vmem:[%s8186_s24 + $0x1c] sm:$0xf]  ;;  %v8205_v14 = vld [vmem:[%s8186_s24 + $0x14] sm:$0xf] }
 0x10c   : > { %v8192_v9 = vcombine.low %v388_v6, %v389_v7  ;;  %v396_v10 = vld [vmem:[%s8186_s24 + $0x38] sm:$0xf]  ;;  %v397_v11 = vld [vmem:[%s8186_s24 + $0x3c] sm:$0xf]  ;;  %v390_v15 = vld [vmem:[%s8186_s24 + $0x20] sm:$0xf]  ;;  %v8211_v17 = vcombine.low %v8205_v14, %v388_v6 }
 0x10d   : > { %1721 = vmatpush1.bf16.msra.mxu0 %v7212_v3  ;;  %6866 = vmatpush1.bf16.msra.mxu1 %v7212_v3  ;;  %v8198_v12 = vcombine.low %v396_v10, %v397_v11  ;;  %v8213_v18 = vcombine.low %v389_v7, %v390_v15  ;;  %v8216_v19 = vld [vmem:[%s8186_s24 + $0x34] sm:$0xf]  ;;  %v8219_v21 = vld [vmem:[%s8186_s24 + $0x40] sm:$0xf]  ;;  %v391_v29 = vld [vmem:[%s8186_s24 + $0x24] sm:$0xf] }
 0x10e   : > { %1722 = vmatprep.subr.bf16.mxu0 %v10895_v0  ;;  %6851 = vmatprep.subr.bf16.mxu1 %v10895_v0  ;;  %11039 = vst [vmem:[#allocation27_spill] sm:$0xff] %v8211_v17  ;;  %v8224_v22 = vcombine.low %v8216_v19, %v396_v10  ;;  %v10889_v23 = vshll.u32 %v8211_v17, 16  ;;  %v10887_v24 = vshrl.u32 %v8211_v17, 16  ;;  %v8231_v28 = vcombine.low %v397_v11, %v8219_v21  ;;  %v392_v30 = vld [vmem:[%s8186_s24 + $0x28] sm:$0xf]  ;;  %s10669_s20 = scalar_lea.vmem [#allocation14], %s7026_s22 }
 0x10f   : > { %1748 = vmatprep.mubr.bf16.mxu0 %v8192_v9  ;;  %1778 = vmatprep.mubr.bf16.mxu1 %v8198_v12  ;;  %11040 = vst [vmem:[#allocation28_spill] sm:$0xff] %v8213_v18  ;;  %v10888_v26 = vshll.u32 %v8213_v18, 16  ;;  %v10886_v27 = vshrl.u32 %v8213_v18, 16  ;;  %v8236_v31 = vld [vmem:[%s8186_s24 + $0x44] sm:$0xf]  ;;  %v10892_v33 = vshll.u32 %v8192_v9, 16  ;;  %v8246_v36 = vcombine.low %v391_v29, %v392_v30 }
 0x110   : > { %11041 = vst [vmem:[#allocation29_spill] sm:$0xff] %v8224_v22  ;;  %11042 = vst [vmem:[#allocation30_spill] sm:$0xff] %v8231_v28  ;;  %v8239_v32 = vld [vmem:[%s8186_s24 + $0x48] sm:$0xf]  ;;  %v10877_v34 = vshll.u32 %v8224_v22, 16  ;;  %v10875_v35 = vshrl.u32 %v8224_v22, 16  ;;  %v8293_v59 = vcombine.low %v390_v15, %v391_v29 }
 0x111   : > { %1723 = vmatpush1.bf16.msra.mxu0 %v7213_v4  ;;  %6867 = vmatpush1.bf16.msra.mxu1 %v7213_v4  ;;  %11043 = vst [vmem:[#allocation31_spill] sm:$0xff] %v8246_v36  ;;  %v393_v37 = vld [vmem:[%s8186_s24 + $0x2c] sm:$0xf]  ;;  %v8250_v38 = vld [vmem:[%s8186_s24 + $0x30] sm:$0xf]  ;;  %v10876_v39 = vshll.u32 %v8231_v28, 16  ;;  %v8256_v41 = vcombine.low %v8236_v31, %v8239_v32 }
 0x112   : > { %1724 = vmatprep.subr.bf16.mxu0 %v10895_v0  ;;  %6852 = vmatprep.subr.bf16.mxu1 %v10895_v0  ;;  %v10874_v40 = vshrl.u32 %v8231_v28, 16  ;;  %v8260_v43 = vrot.slane %v10887_v24, 3  ;;  %v8264_v44 = vrot.slane %v10889_v23, 4  ;;  %v979_v45 = vrot.slane %v10886_v27, 3  ;;  %v8276_v48 = vld [vmem:[%s8186_s24 + $0x4c] sm:$0xf] }
 0x113   : > { %11044 = vst [vmem:[#allocation32_spill] sm:$0xff] %v8256_v41  ;;  %v980_v46 = vrot.slane %v10888_v26, 4  ;;  %v8273_v47 = vcombine.low %v393_v37, %v8250_v38  ;;  %v8279_v49 = vld [vmem:[%s8186_s24 + $0x50] sm:$0xf]  ;;  %v991_v50 = vrot.slane %v10875_v35, 3  ;;  %v992_v51 = vrot.slane %v10877_v34, 4 }
 0x114   : > { %v10881_v52 = vshll.u32 %v8246_v36, 16  ;;  %v10879_v53 = vshrl.u32 %v8246_v36, 16  ;;  %v995_v55 = vrot.slane %v10874_v40, 3  ;;  %v996_v56 = vrot.slane %v10876_v39, 4  ;;  %v8300_v61 = vld [vmem:[%s8186_s24 + $0x54] sm:$0xf] }
 0x115   : > { %1725 = vmatpush1.bf16.msra.mxu0 %v7214_v5  ;;  %6868 = vmatpush1.bf16.msra.mxu1 %v7214_v5  ;;  %11045 = vst [vmem:[#allocation33_spill] sm:$0xff] %v8273_v47  ;;  %v10873_v57 = vshll.u32 %v8256_v41, 16  ;;  %v10872_v58 = vshrl.u32 %v8256_v41, 16  ;;  %v8297_v60 = vcombine.low %v8276_v48, %v8279_v49  ;;  %v8303_v62 = vld [vmem:[%s8186_s24 + $0x58] sm:$0xf]  ;;  %v10880_v63 = vshll.u32 %v8273_v47, 16 }
 0x116   : > { %1726 = vmatprep.subr.bf16.mxu0 %v10895_v0  ;;  %6853 = vmatprep.subr.bf16.mxu1 %v10895_v0  ;;  %v10878_v1 = vshrl.u32 %v8273_v47, 16  ;;  %v983_v4 = vrot.slane %v10879_v53, 3  ;;  %v984_v5 = vrot.slane %v10881_v52, 4  ;;  %v8314_v6 = vcombine.low %v392_v30, %v393_v37  ;;  %v8324_v10 = vld [vmem:[%s8186_s24 + $0x60] sm:$0xf]  ;;  %v7223_v37 = vld [vmem:[#allocation6 + $0x128] sm:$0xff]  }
 0x117   : > { %11046 = vst [vmem:[#allocation34_spill] sm:$0xff] %v8297_v60  ;;  %v8318_v7 = vcombine.low %v8300_v61, %v8303_v62  ;;  %v999_v11 = vrot.slane %v10872_v58, 3  ;;  %v10882_v29 = vshrl.u32 %v8297_v60, 16  ;;  %v10891_v30 = vshll.u32 %v8293_v59, 16  ;;  %v8352_v58 = vld [vmem:[%s8186_s24 + $0x68] sm:$0xf] }
 0x118   : > { %v10890_v15 = vshll.u32 %v8314_v6, 16  ;;  %v8356_v40 = vor.u32 %v980_v46, %v979_v45  ;;  %v8361_v34 = vld [vmem:[%s8186_s24 + $0x6c] sm:$0xf]  ;;  %v8365_v53 = vor.u32 %v996_v56, %v995_v55  ;;  %v8372_v52 = vld [vmem:[%s8186_s24 + $0x70] sm:$0xf]  ;;  %v8391_v46 = vrot.slane %v10892_v33, 1 }
 0x119   : > { %1727 = vmatpush1.bf16.msra.mxu0 %v7215_v8  ;;  %6869 = vmatpush1.bf16.msra.mxu1 %v7215_v8  ;;  %11047 = vst [vmem:[#allocation35_spill] sm:$0xff] %v8318_v7  ;;  %v8321_v8 = vld [vmem:[%s8186_s24 + $0x5c] sm:$0xf]  ;;  %v10885_v35 = vshll.u32 %v8318_v7, 16  ;;  %v10884_v39 = vshrl.u32 %v8318_v7, 16  ;;  %v8401_v56 = vcombine.low %v8219_v21, %v8236_v31  ;;  %v8427_v27 = vor.u32 %v984_v5, %v983_v4  ;;  %v7233_v45 = vld [vmem:[#allocation6 + $0x148] sm:$0xff]  }
 0x11a   : > { %1728 = vmatprep.subr.bf16.mxu0 %v10895_v0  ;;  %6854 = vmatprep.subr.bf16.mxu1 %v10895_v0  ;;  %v411_v26 = vld [vmem:[%s8186_s24 + $0x74] sm:$0xf]  ;;  %v8437_v23 = vld [vmem:[%s8186_s24 + $0x78] sm:$0xf]  ;;  %v8453_v3 = vcombine.low %v8279_v49, %v8300_v61  ;;  %v414_v49 = vld [vmem:[%s8186_s24 + $0x80] sm:$0xf] }
 0x11b   : > { %v7232_v61 = vld [vmem:[#allocation6 + $0x140] sm:$0xff]   ;;  %v11052_v33 = vshll.u32 %v8401_v56, 16  ;;  %v417_v41 = vld [vmem:[%s8186_s24 + $0x8c] sm:$0xf]  ;;  %v7239_v28 = vld [vmem:[#allocation6 + $0x158] sm:$0xff]   ;;  %s7028_s30 = smul.u32 48, %s11395_s18 }
 0x11c   : > { %v415_v7 = vld [vmem:[%s8186_s24 + $0x84] sm:$0xf]  ;;  %v420_v17 = vld [vmem:[%s8186_s24 + $0x98] sm:$0xf]  ;;  %s5710_s2 = sshll.u32 %s10669_s20, 4  ;;  %s7749_s18 = smov [#allocation14]   ;;  %s10761_s2 = int_to_ptr.vmem [resolvable:$true] %s5710_s2 }
 0x11d   : > { %1729 = vmatpush1.bf16.msra.mxu0 %v7216_v13  ;;  %6870 = vmatpush1.bf16.msra.mxu1 %v7216_v13  ;;  %v1000_v13 = vrot.slane %v10873_v57, 4  ;;  %v978_v57 = vor.u32 %v8264_v44, %v8260_v43  ;;  %v8378_v43 = vrot.slane %v10882_v29, 3  ;;  %v8409_v29 = vrot.slane %v10885_v35, 4  ;;  %s5707_s1 = sadd.s32 %s7028_s30, %s7027_s14  ;;  %s7578_s22 = scalar_lea.vmem %s10761_s2, 3072 }
 0x11e   : > { %1730 = vmatprep.subr.bf16.mxu0 %v10895_v0  ;;  %6855 = vmatprep.subr.bf16.mxu1 %v10895_v0  ;;  %s6106_s3 = sshll.u32 %s5707_s1, 7  ;;  %p7579_p0 = scmp.ne.s32.totalorder %s10761_s2, %s7578_s22 }
 0x11f   : > { %v982_v21 = vsel %vm521_vm0, %v978_v57, %v8356_v40  ;;  %v8449_v5 = vor.u32 %v1000_v13, %v999_v11  ;;  %v8464_v11 = vcombine.low %v411_v26, %v8437_v23  ;;  %v413_v13 = vld [vmem:[%s8186_s24 + $0x7c] sm:$0xf]  ;;  %s7582_s14 = sshll.u32 %s7749_s18, 4  ;;  %s7583_s14 = int_to_ptr.vmem [resolvable:$false] %s7582_s14 }
 0x120   : > { %p7580_p6 = pnand %p7579_p0, %p11398_p7  ;;  %s7584_s30 = scalar_lea.vmem %s7583_s14, 6144 }
 0x121   : > { %1731 = vmatpush1.bf16.msra.mxu0 %v7217_v16  ;;  %6871 = vmatpush1.bf16.msra.mxu1 %v7217_v16  ;;  %v10883_v16 = vshll.u32 %v8297_v60, 16  ;;  %11051 = vst [vmem:[#allocation39_spill] sm:$0xff] %v8464_v11  ;;  %v416_v60 = vld [vmem:[%s8186_s24 + $0x88] sm:$0xf]  ;;  %p7585_p2 = scmp.lt.s32.totalorder %s10761_s2, %s7583_s14  ;;  %p7586_p5 = scmp.lt.s32.totalorder %s7584_s30, %s7578_s22 }
 0x122   : > { %1732 = vmatprep.subr.bf16.mxu0 %v10895_v0  ;;  %6856 = vmatprep.subr.bf16.mxu1 %v10895_v0  ;;  %p7581_p1 = pneg %p7580_p6 }
 0x123   : > { %v8382_v44 = vrot.slane %v10883_v16, 4  ;;  %v8413_v16 = vcombine.low %v8361_v34, %v8372_v52  ;;  %p7587_p9 = por %p7586_p5, %p7585_p2 }
 0x125   : > { %1733 = vmatpush1.bf16.msra.mxu0 %v7218_v20  ;;  %6872 = vmatpush1.bf16.msra.mxu1 %v7218_v20  ;;  %v8336_v20 = vrot.slane %v10878_v1, 3  ;;  %v8363_v1 = vor.u32 %v992_v51, %v991_v50  ;;  %v8395_v50 = vrot.slane %v10891_v30, 1  ;;  %11050 = vst [vmem:[#allocation38_spill] sm:$0xff] %v8413_v16  ;;  %p7588_p8 = pnand %p7587_p9, %p7581_p1 }
 0x126   : > { %1734 = vmatprep.subr.bf16.mxu0 %v10895_v0  ;;  %6857 = vmatprep.subr.bf16.mxu1 %v10895_v0 }
 0x127   : > { %v998_v31 = vsel %vm521_vm0, %v8363_v1, %v8365_v53 }
 0x129   : > { %1735 = vmatpush1.bf16.msra.mxu0 %v7219_v25  ;;  %6873 = vmatpush1.bf16.msra.mxu1 %v7219_v25  ;;  %v8340_v25 = vrot.slane %v10880_v63, 4  ;;  %v8369_v63 = vcombine.low %v8250_v38, %v8216_v19  ;;  %v7224_v38 = vld [vmem:[#allocation6 + $0x130] sm:$0xff]  }
 0x12a   : > { %1736 = vmatprep.subr.bf16.mxu0 %v10895_v0  ;;  %6858 = vmatprep.subr.bf16.mxu1 %v10895_v0 }
 0x12b   : > { %v10897_v35 = vshll.u32 %v8369_v63, 16 }
 0x12d   : > { %1737 = vmatpush1.bf16.msra.mxu0 %v7220_v42  ;;  %6874 = vmatpush1.bf16.msra.mxu1 %v7220_v42  ;;  %v8346_v42 = vcombine.low %v8321_v8, %v8324_v10 }
 0x12e   : > { %1738 = vmatprep.subr.bf16.mxu0 %v10895_v0  ;;  %6859 = vmatprep.subr.bf16.mxu1 %v10895_v0 }
 0x12f   : > { %11048 = vst [vmem:[#allocation36_spill] sm:$0xff] %v8346_v42  ;;  %v10894_v51 = vshll.u32 %v8346_v42, 16  ;;  %v10893_v55 = vshrl.u32 %v8346_v42, 16 }
 0x131   : > { %1739 = vmatpush1.bf16.msra.mxu0 %v7221_v54  ;;  %6875 = vmatpush1.bf16.msra.mxu1 %v7221_v54  ;;  %v8349_v54 = vld [vmem:[%s8186_s24 + $0x64] sm:$0xf]  ;;  %v8441_v30 = vrot.slane %v10893_v55, 3  ;;  %v8445_v4 = vrot.slane %v10894_v51, 4  ;;  %v8459_v55 = vcombine.low %v8303_v62, %v8321_v8  ;;  %v11053_v51 = vshrl.u32 %v8413_v16, 16 }
 0x132   : > { %1740 = vmatprep.subr.bf16.mxu0 %v10895_v0  ;;  %6860 = vmatprep.subr.bf16.mxu1 %v10895_v0  ;;  %v8387_v19 = vcombine.low %v8349_v54, %v8352_v58 }
 0x134   : > { %11049 = vst [vmem:[#allocation37_spill] sm:$0xff] %v8387_v19  ;;  %v10899_v57 = vshll.u32 %v8387_v19, 16  ;;  %v10898_v24 = vshrl.u32 %v8387_v19, 16  ;;  %v8499_v19 = vrot.slane %v11053_v51, 3  ;;  %v986_v51 = vsel %vm521_vm0, %v8356_v40, %v8427_v27 }
 0x135   : > { %1741 = vmatpush1.bf16.msra.mxu0 %v7222_v2  ;;  %6876 = vmatpush1.bf16.msra.mxu1 %v7222_v2  ;;  %v8405_v2 = vrot.slane %v10884_v39, 3  ;;  %v8422_v39 = vrot.slane %v10890_v15, 1  ;;  %v7225_v15 = vld [vmem:[#allocation6 + $0x138] sm:$0xff]   ;;  %v8559_v40 = vcombine.low %v8437_v23, %v413_v13 }
 0x136   : > { %1742 = vmatprep.subr.bf16.mxu0 %v10895_v0  ;;  %6861 = vmatprep.subr.bf16.mxu1 %v10895_v0  ;;  %v8476_v62 = vrot.slane %v10898_v24, 3  ;;  %v8480_v8 = vrot.slane %v10899_v57, 4  ;;  %v8495_v57 = vcombine.low %v8324_v10, %v8349_v54  ;;  %v10913_v54 = vshll.u32 %v8453_v3, 16 }
 0x137   : > { %v8578_v10 = vcombine.low %v414_v49, %v415_v7  ;;  %v10931_v18 = vshll.u32 %v8559_v40, 16 }
 0x139   : > { %1743 = vmatpush1.bf16.msra.mxu0 %v7223_v37  ;;  %6877 = vmatpush1.bf16.msra.mxu1 %v7223_v37  ;;  %v8431_v37 = vcombine.low %v8239_v32, %v8276_v48  ;;  %v10902_v32 = vshll.u32 %v8198_v12, 16 }
 0x13a   : > { %1744 = vmatprep.subr.bf16.mxu0 %v10895_v0  ;;  %6862 = vmatprep.subr.bf16.mxu1 %v10895_v0 }
 0x13b   : > { %v8485_v48 = vrot.slane %v10902_v32, 1  ;;  %v11054_v32 = vshll.u32 %v8413_v16, 16  ;;  %v11056_v24 = vshll.u32 %v8431_v37, 16  ;;  %v1002_v16 = vsel %vm521_vm0, %v8365_v53, %v8449_v5  ;;  %v7238_v53 = vld [vmem:[#allocation6 + $0x150] sm:$0xff]  }
 0x13d   : > { %1745 = vmatpush1.bf16.msra.mxu0 %v7224_v38  ;;  %6878 = vmatpush1.bf16.msra.mxu1 %v7224_v38  ;;  %v8472_v38 = vrot.slane %v10897_v35, 1  ;;  %v8490_v35 = vrot.slane %v11052_v33, 1  ;;  %v8505_v33 = vcombine.low %v413_v13, %v414_v49  ;;  %v8509_v42 = vrot.slane %v11056_v24, 1 }
 0x13e   : > { %1746 = vmatprep.subr.bf16.mxu0 %v10895_v0  ;;  %6863 = vmatprep.subr.bf16.mxu1 %v10895_v0  ;;  %v8503_v0 = vrot.slane %v11054_v32, 4  ;;  %v8536_v24 = vcombine.low %v8372_v52, %v411_v26  ;;  %v11058_v32 = vshrl.u32 %v8464_v11, 16  ;;  %v11060_v52 = vshll.u32 %v8459_v55, 16 }
 0x13f   : > { %11055 = vst [vmem:[#allocation40_spill] sm:$0xff] %v8505_v33  ;;  %v11064_v23 = vshll.u32 %v8505_v33, 16 }
 0x141   : > { %1747 = vmatpush1.bf16.msra.mxu0 %v7225_v15  ;;  %6879 = vmatpush1.bf16.msra.mxu1 %v7225_v15  ;;  %v8520_v15 = vcombine.low %v8352_v58, %v8361_v34  ;;  %v418_v58 = vld [vmem:[%s8186_s24 + $0x90] sm:$0xf]  ;;  %v11059_v34 = vshll.u32 %v8464_v11, 16  ;;  %v11063_v11 = vshrl.u32 %v8505_v33, 16  ;;  %v8576_v13 = vrot.slane %v11064_v23, 4 }
 0x142   : > { %6572 = vmatprep.subr.bf16.mxu0 %v7232_v61  ;;  %v8564_v47 = vcombine.low %v417_v41, %v418_v58  ;;  %v989_v23 = vor.u32 %v8340_v25, %v8336_v20  ;;  %v11067_v33 = vshll.u32 %v8536_v24, 16  ;;  %v7244_v20 = vld [vmem:[#allocation6 + $0x160] sm:$0xff]   ;;  %v8604_v25 = vld [vmem:[%s8186_s24 + $0x10] sm:$0xf] }
 0x143   : > { %v8552_v26 = vrot.slane %v11059_v34, 4  ;;  %v11065_v22 = vshll.u32 %v8520_v15, 16  ;;  %11068 = vst [vmem:[#allocation44_spill] sm:$0xff] %v8604_v25 }
 0x144   : > { %1749 = vmatmul.mubr.bf16.vlgmr.msra.gmra.mrb[0].mxu0 %v982_v21  ;;  %1779 = vmatmul.mubr.bf16.vlgmr.msra.gmra.mrb[0].mxu1 %v998_v31  ;;  %v8540_v21 = vrot.slane %v10913_v54, 1  ;;  %v8543_v31 = vcombine.low %v415_v7, %v416_v60  ;;  %v8556_v54 = vrot.slane %v11060_v52, 1  ;;  %11061 = vst [vmem:[#allocation42_spill] sm:$0xff] %v8564_v47  ;;  %v8572_v52 = vrot.slane %v11063_v11, 3 }
 0x145   : > { %6573 = vmatpush3.bf16.msra.mxu0 %v7232_v61  ;;  %1754 = vmatprep.mubr.bf16.mxu0 %v8293_v59  ;;  %v8548_v61 = vrot.slane %v11058_v32, 3  ;;  %v11062_v32 = vshll.u32 %v8495_v57, 16  ;;  %v8582_v36 = vrot.slane %v11065_v22, 1  ;;  %v8586_v11 = vcombine.low %v416_v60, %v417_v41  ;;  %v419_v22 = vld [vmem:[%s8186_s24 + $0x94] sm:$0xf] }
 0x146   : > { %11057 = vst [vmem:[#allocation41_spill] sm:$0xff] %v8543_v31  ;;  %6574 = vmatprep.subr.bf16.mxu0 %v7233_v45  ;;  %1786 = vmatprep.mubr.bf16.mxu1 %v8401_v56  ;;  %v1005_v7 = vor.u32 %v8382_v44, %v8378_v43  ;;  %v10936_v41 = vshll.u32 %v8578_v10, 16  ;;  %v8624_v44 = vrot.slane %v10931_v18, 1  ;;  %v8627_v43 = vcombine.low %v418_v58, %v419_v22 }
 0x147   : > { %v8568_v34 = vrot.slane %v11062_v32, 1  ;;  %11066 = vst [vmem:[#allocation43_spill] sm:$0xff] %v8586_v11  ;;  %v8597_v32 = vrot.slane %v11067_v33, 1  ;;  %v990_v33 = vsel %vm521_vm0, %v8427_v27, %v989_v23  ;;  %v5883_v27 = vcombine.low %v8604_v25, %v8205_v14 }
 0x148   : > { %11071 = vst [vmem:[#allocation46_spill] sm:$0xff] %v8624_v44  ;;  %v8643_v60 = vcombine.low %v419_v22, %v420_v17  ;;  %v11074_v58 = vshrl.u32 %v8564_v47, 16  ;;  %v11076_v25 = vshll.u32 %v8564_v47, 16  ;;  %v994_v18 = vsel %vm521_vm0, %v989_v23, %v8363_v1 }
 0x149   : > { %6575 = vmatpush3.bf16.msra.mxu0 %v7233_v45  ;;  %v10930_v45 = vshrl.u32 %v8543_v31, 16  ;;  %v11080_v22 = vshrl.u32 %v8192_v9, 16  ;;  %v11089_v1 = vshll.u32 %v8369_v63, 16 }
 0x14a   : > { %6576 = vmatprep.subr.bf16.mxu0 %v7238_v53  ;;  %v8647_v14 = vrot.slane %v11074_v58, 3 }
 0x14b   : > { %v572_v47 = vrot.slane %v11089_v1, 4 }
 0x14c   : > { %1755 = vmatmul.mubr.bf16.gmra.mrb[4].mxu0 %v986_v51  ;;  %1787 = vmatmul.mubr.bf16.gmra.mrb[4].mxu1 %v1002_v16  ;;  %v1006_v16 = vsel %vm521_vm0, %v8449_v5, %v1005_v7  ;;  %v8616_v51 = vrot.slane %v10930_v45, 3  ;;  %v7245_v5 = vld [vmem:[#allocation6 + $0x168] sm:$0xff]   ;;  %v8633_v45 = vor.u32 %v8409_v29, %v8405_v2  ;;  %11075 = vst [vmem:[#allocation49_spill] sm:$0xff] %v8647_v14  ;;  %v8651_v29 = vrot.slane %v11076_v25, 4 }
 0x14d   : > { %6577 = vmatpush3.bf16.msra.mxu0 %v7238_v53  ;;  %1762 = vmatprep.mubr.bf16.mxu0 %v8314_v6  ;;  %v11069_v53 = vshll.u32 %v8543_v31, 16  ;;  %v8641_v31 = vld [vmem:[%s8186_s24 + $0x9c] sm:$0xf]  ;;  %v11078_v2 = vshll.u32 %v8586_v11, 16  ;;  %v534_v14 = vshll.u32 %v5883_v27, 16 }
 0x14e   : > { %6578 = vmatprep.subr.bf16.mxu0 %v7239_v28  ;;  %1794 = vmatprep.mubr.bf16.mxu1 %v8431_v37  ;;  %11073 = vst [vmem:[#allocation48_spill] sm:$0xff] %v8641_v31  ;;  %11077 = vst [vmem:[#allocation50_spill] sm:$0xff] %v8651_v29 }
 0x14f   : > { %v8620_v49 = vrot.slane %v11069_v53, 4  ;;  %v8637_v53 = vrot.slane %v10936_v41, 1  ;;  %v8655_v44 = vrot.slane %v11078_v2, 1  ;;  %v531_v41 = vshrl.u32 %v5883_v27, 16 }
 0x150   : > { %v11081_v2 = vmov %v11080_v22  ;;  %v536_v23 = vrot.slane %v534_v14, 4  ;;  %v11086_v14 = vshrl.u32 %v8314_v6, 16 }
 0x151   : > { %11070 = vst [vmem:[#allocation45_spill] sm:$0xff] %v8620_v49  ;;  %11072 = vst [vmem:[#allocation47_spill] sm:$0xff] %v8637_v53  ;;  %6579 = vmatpush3.bf16.msra.mxu0 %v7239_v28  ;;  %v1139_v28 = vor.u32 %v8391_v46, %v11080_v22  ;;  %v533_v29 = vrot.slane %v531_v41, 3  ;;  %v7249_v53 = vld [vmem:[#allocation6 + $0x170] sm:$0xff]   ;;  %v11082_v49 = vshll.u32 %v8192_v9, 16  ;;  %v11083_v22 = vshrl.u32 %v8293_v59, 16 }
 0x152   : > { %11079 = vst [vmem:[#allocation51_spill] sm:$0xff] %v8655_v44  ;;  %6580 = vmatprep.subr.bf16.mxu0 %v7244_v20  ;;  %v542_v44 = vrot.slane %v11081_v2, 3  ;;  %v1010_v41 = vsel %vm521_vm0, %v1005_v7, %v8633_v45  ;;  %v8676_v2 = vcombine.low %v420_v17, %v8641_v31  ;;  %v560_v25 = vrot.slane %v11086_v14, 3 }
 0x153   : > { %v545_v46 = vrot.slane %v11082_v49, 4  ;;  %v551_v27 = vrot.slane %v11083_v22, 3  ;;  %v8683_v9 = vor.u32 %v536_v23, %v533_v29  ;;  %v11088_v7 = vshrl.u32 %v8369_v63, 16 }
 0x154   : > { %1763 = vmatmul.mubr.bf16.gmra.mrb[8].mxu0 %v990_v33  ;;  %1795 = vmatmul.mubr.bf16.gmra.mrb[8].mxu1 %v1006_v16  ;;  %11084 = vst [vmem:[#allocation52_spill] sm:$0xff] %v8676_v2  ;;  %v11085_v33 = vshll.u32 %v8293_v59, 16  ;;  %v11091_v14 = vshll.u32 %v8198_v12, 16 }
 0x155   : > { %6581 = vmatpush3.bf16.msra.mxu0 %v7244_v20  ;;  %1770 = vmatprep.mubr.bf16.mxu0 %v8369_v63  ;;  %v546_v49 = vor.u32 %v545_v46, %v542_v44  ;;  %v11087_v20 = vshll.u32 %v8314_v6, 16  ;;  %v569_v58 = vrot.slane %v11088_v7, 3  ;;  %v11092_v46 = vshrl.u32 %v8401_v56, 16 }
 0x156   : > { %v554_v16 = vrot.slane %v11085_v33, 4  ;;  %6582 = vmatprep.subr.bf16.mxu0 %v7245_v5  ;;  %1802 = vmatprep.mubr.bf16.mxu1 %v8453_v3  ;;  %v11090_v33 = vshrl.u32 %v8198_v12, 16  ;;  %v581_v31 = vrot.slane %v11091_v14, 4 }
 0x157   : > { %v563_v22 = vrot.slane %v11087_v20, 4  ;;  %v8698_v44 = vsel %vm521_vm0, %v8683_v9, %v546_v49  ;;  %v587_v20 = vrot.slane %v11092_v46, 3  ;;  %v7253_v46 = vld [vmem:[#allocation6] sm:$0xff]  }
 0x158   : > { %v555_v17 = vor.u32 %v554_v16, %v551_v27  ;;  %v578_v11 = vrot.slane %v11090_v33, 3  ;;  %v7250_v27 = vld [vmem:[#allocation6 + $0x178] sm:$0xff]   ;;  %v573_v16 = vor.u32 %v572_v47, %v569_v58  ;;  %v11093_v33 = vshll.u32 %v8401_v56, 16 }
 0x159   : > { %v564_v23 = vor.u32 %v563_v22, %v560_v25  ;;  %6583 = vmatpush3.bf16.msra.mxu0 %v7245_v5  ;;  %v1141_v25 = vsel %vm785_vm1, %v1139_v28, %v8395_v50  ;;  %v11094_v47 = vshrl.u32 %v8293_v59, 16  ;;  %v1013_v28 = vor.u32 %v8445_v4, %v8441_v30 }
 0x15a   : > { %v8703_v1 = vsel %vm521_vm0, %v546_v49, %v555_v17  ;;  %v582_v7 = vor.u32 %v581_v31, %v578_v11  ;;  %v590_v14 = vrot.slane %v11093_v33, 4  ;;  %6584 = vmatprep.subr.bf16.mxu0 %v7249_v53  ;;  %v11095_v11 = vshll.u32 %v8627_v43, 16 }
 0x15b   : > { %v8708_v29 = vsel %vm521_vm0, %v555_v17, %v564_v23  ;;  %v8713_v22 = vsel %vm521_vm0, %v564_v23, %v573_v16  ;;  %v1142_v31 = vor.u32 %v8395_v50, %v11094_v47  ;;  %v10948_v17 = vshll.u32 %v8676_v2, 16 }
 0x15c   : > { %v8716_v5 = vsel %vm521_vm0, %v573_v16, %v582_v7  ;;  %v591_v49 = vor.u32 %v590_v14, %v587_v20  ;;  %1771 = vmatmul.mubr.bf16.gmra.mrb[12].mxu0 %v994_v18  ;;  %1803 = vmatmul.mubr.bf16.gmra.mrb[12].mxu1 %v1010_v41  ;;  %v8723_v58 = vrot.slane %v11095_v11, 1  ;;  %v11096_v18 = vshrl.u32 %v8431_v37, 16  ;;  %v7254_v14 = vld [vmem:[#allocation6 + $0x8] sm:$0xff]   ;;  %v7257_v11 = vld [vmem:[#allocation6 + $0x10] sm:$0xff]  }
 0x15d   : > { %6585 = vmatpush3.bf16.msra.mxu0 %v7249_v53  ;;  %1810 = vmatprep.mubr.bf16.mxu1 %v8459_v55  ;;  %v11097_v50 = vshll.u32 %v8431_v37, 16  ;;  %v11098_v20 = vshrl.u32 %v8314_v6, 16  ;;  %v1014_v30 = vsel %vm521_vm0, %v8633_v45, %v1013_v28  ;;  %v1144_v4 = vsel %vm785_vm1, %v1142_v31, %v8422_v39 }
 0x15e   : > { %v8730_v23 = vsel %vm521_vm0, %v582_v7, %v591_v49  ;;  %v596_v59 = vrot.slane %v11096_v18, 3  ;;  %6586 = vmatprep.subr.bf16.mxu0 %v7250_v27  ;;  %6588 = vmatprep.mubr.bf16.mxu0 %v1141_v25  ;;  %v11099_v33 = vmov 0   ;;  %v1017_v6 = vor.u32 %v8480_v8, %v8476_v62 }
 0x15f   : > { %v599_v41 = vrot.slane %v11097_v50, 4  ;;  %v1145_v53 = vor.u32 %v8422_v39, %v11098_v20  ;;  %v11100_v45 = vshrl.u32 %v8369_v63, 16  ;;  %v11102_v47 = vshll.u32 %v8453_v3, 16 }
 0x160   : > { %v11103_v18 = vshrl.u32 %v8198_v12, 16  ;;  %v1018_v63 = vsel %vm521_vm0, %v1013_v28, %v1017_v6  ;;  %v423_v12 = vld [vmem:[%s8186_s24 + $0xa4] sm:$0xf]  ;;  %v11104_v28 = vshrl.u32 %v8401_v56, 16 }
 0x161   : > { %v600_v16 = vor.u32 %v599_v41, %v596_v59  ;;  %6587 = vmatpush3.bf16.msra.mxu0 %v7250_v27  ;;  %v1147_v25 = vsel %vm785_vm1, %v1145_v53, %v8472_v38  ;;  %v1148_v39 = vor.u32 %v8472_v38, %v11100_v45  ;;  %v11101_v27 = vshrl.u32 %v8453_v3, 16  ;;  %v7260_v41 = vld [vmem:[#allocation6 + $0x18] sm:$0xff]  }
 0x162   : > { %2206 = vmatprep.subr.bf16.mxu0 %v11099_v33  ;;  %v608_v31 = vrot.slane %v11102_v47, 4  ;;  %v1151_v62 = vor.u32 %v8485_v48, %v11103_v18  ;;  %v1154_v20 = vor.u32 %v8490_v35, %v11104_v28  ;;  %v11105_v53 = vshrl.u32 %v8459_v55, 16  ;;  %v7268_v28 = vld [vmem:[#allocation6 + $0x38] sm:$0xff]  }
 0x163   : > { %v8744_v7 = vsel %vm521_vm0, %v591_v49, %v600_v16  ;;  %v605_v49 = vrot.slane %v11101_v27, 3  ;;  %v1150_v38 = vsel %vm785_vm1, %v1148_v39, %v8485_v48  ;;  %v1021_v48 = vor.u32 %v8503_v0, %v8499_v19  ;;  %v7264_v27 = vld [vmem:[#allocation6 + $0x28] sm:$0xff]  }
 0x164   : > { %1811 = vmatmul.mubr.bf16.gmra.mrb[16].mxu1 %v1014_v30  ;;  %6589 = vmatmul.mubr.bf16.vlgmr.msra.gmra.mrb[4].mxu0 %v1144_v4  ;;  %v1153_v50 = vsel %vm785_vm1, %v1151_v62, %v8490_v35  ;;  %v11106_v30 = vshll.u32 %v8459_v55, 16  ;;  %v1156_v19 = vsel %vm785_vm1, %v1154_v20, %v8509_v42  ;;  %v11111_v18 = vshrl.u32 %v8495_v57, 16 }
 0x165   : > { %2207 = vmatpush1.bf16.msra.mxu0 %v7253_v46  ;;  %1818 = vmatprep.mubr.bf16.mxu1 %v8495_v57  ;;  %v609_v8 = vor.u32 %v608_v31, %v605_v49  ;;  %v8773_v46 = vld [vmem:[%s8186_s24 + $0xa0] sm:$0xf]  ;;  %v1022_v35 = vsel %vm521_vm0, %v1017_v6, %v1021_v48  ;;  %v11109_v49 = vshrl.u32 %v8643_v60, 16  ;;  %v11110_v31 = vshrl.u32 %v8453_v3, 16 }
 0x166   : > { %2208 = vmatprep.subr.bf16.mxu0 %v11099_v33  ;;  %6592 = vmatprep.mubr.bf16.mxu0 %v1147_v25  ;;  %v617_v4 = vrot.slane %v11106_v30, 4  ;;  %v11107_v25 = vshrl.u32 %v8431_v37, 16  ;;  %v8791_v0 = vcombine.low %v8773_v46, %v423_v12  ;;  %v623_v62 = vrot.slane %v11111_v18, 3 }
 0x167   : > { %v8767_v59 = vsel %vm521_vm0, %v600_v16, %v609_v8  ;;  %v614_v16 = vrot.slane %v11105_v53, 3  ;;  %v8804_v47 = vrot.slane %v11109_v49, 3  ;;  %v1029_v55 = vor.u32 %v8576_v13, %v8572_v52 }
 0x168   : > { %v1157_v45 = vor.u32 %v8509_v42, %v11107_v25  ;;  %11108 = vst [vmem:[#allocation53_spill] sm:$0xff] %v8791_v0  ;;  %v10946_v6 = vshll.u32 %v8791_v0, 16  ;;  %v1025_v42 = vor.u32 %v8552_v26, %v8548_v61  ;;  %v11115_v20 = vshrl.u32 %v8520_v15, 16 }
 0x169   : > { %2209 = vmatpush1.bf16.msra.mxu0 %v7254_v14  ;;  %v7261_v14 = vld [vmem:[#allocation6 + $0x20] sm:$0xff]   ;;  %v618_v39 = vor.u32 %v617_v4, %v614_v16  ;;  %v11116_v16 = vshll.u32 %v8520_v15, 16 }
 0x16a   : > { %2210 = vmatprep.subr.bf16.mxu0 %v11099_v33  ;;  %v1159_v37 = vsel %vm785_vm1, %v1157_v45, %v8540_v21  ;;  %v1026_v61 = vsel %vm521_vm0, %v1021_v48, %v1025_v42  ;;  %v7269_v4 = vld [vmem:[#allocation6 + $0x40] sm:$0xff]  }
 0x16b   : > { %v8797_v56 = vsel %vm521_vm0, %v609_v8, %v618_v39  ;;  %v11112_v8 = vshll.u32 %v8495_v57, 16  ;;  %v635_v30 = vrot.slane %v11116_v16, 4  ;;  %v1030_v57 = vsel %vm521_vm0, %v1025_v42, %v1029_v55 }
 0x16c   : > { %1819 = vmatmul.mubr.bf16.gmra.mrb[20].mxu1 %v1018_v63  ;;  %6593 = vmatmul.mubr.bf16.gmra.mrb[16].mxu0 %v1150_v38  ;;  %v7265_v38 = vld [vmem:[#allocation6 + $0x30] sm:$0xff]   ;;  %v10949_v42 = vshrl.u32 %v8676_v2, 16 }
 0x16d   : > { %2211 = vmatpush1.bf16.msra.mxu0 %v7257_v11  ;;  %1826 = vmatprep.mubr.bf16.mxu1 %v8520_v15  ;;  %v1160_v11 = vor.u32 %v8540_v21, %v11110_v31  ;;  %v626_v63 = vrot.slane %v11112_v8, 4  ;;  %v7272_v15 = vld [vmem:[#allocation6 + $0x48] sm:$0xff]   ;;  %v1196_v31 = vrot.slane %v10946_v6, 1 }
 0x16e   : > { %2212 = vmatprep.subr.bf16.mxu0 %v11099_v33  ;;  %6596 = vmatprep.mubr.bf16.mxu0 %v1153_v50  ;;  %v11113_v50 = vmov %v11105_v53  ;;  %v632_v53 = vrot.slane %v11115_v20, 3 }
 0x16f   : > { %v627_v12 = vor.u32 %v626_v63, %v623_v62  ;;  %v1162_v3 = vsel %vm785_vm1, %v1160_v11, %v8556_v54  ;;  %v7273_v11 = vld [vmem:[#allocation6 + $0x50] sm:$0xff]   ;;  %v11122_v62 = vld [vmem:[#allocation46_spill] sm:$0xff] }
 0x170   : > { %v8844_v45 = vor.u32 %v635_v30, %v632_v53  ;;  %v11131_v53 = vld [vmem:[#allocation51_spill] sm:$0xff] }
 0x171   : > { %2213 = vmatpush1.bf16.msra.mxu0 %v7260_v41  ;;  %v1163_v41 = vor.u32 %v8556_v54, %v11113_v50  ;;  %v8825_v21 = vsel %vm521_vm0, %v618_v39, %v627_v12  ;;  %v11114_v54 = vmov %v11111_v18  ;;  %v11118_v39 = vshll.u32 %v8643_v60, 16  ;;  %v11125_v50 = vld [vmem:[#allocation47_spill] sm:$0xff] }
 0x172   : > { %2214 = vmatprep.subr.bf16.mxu0 %v11099_v33  ;;  %v1166_v48 = vor.u32 %v8568_v34, %v11114_v54  ;;  %v8851_v52 = vsel %vm521_vm0, %v627_v12, %v8844_v45  ;;  %v11121_v18 = vshrl.u32 %v8559_v40, 16  ;;  %v7276_v12 = vld [vmem:[#allocation6 + $0x58] sm:$0xff]   ;;  %v424_v30 = vld [vmem:[%s8186_s24 + $0xa8] sm:$0xf] }
 0x173   : > { %v1165_v26 = vsel %vm785_vm1, %v1163_v41, %v8568_v34 }
 0x174   : > { %1827 = vmatmul.mubr.bf16.gmra.mrb[24].mxu1 %v1022_v35  ;;  %6597 = vmatmul.mubr.bf16.gmra.mrb[20].mxu0 %v1156_v19  ;;  %v1168_v34 = vsel %vm785_vm1, %v1166_v48, %v8582_v36  ;;  %v1040_v35 = vrot.slane %v11118_v39, 4  ;;  %v1188_v19 = vrot.slane %v10948_v17, 1  ;;  %v1175_v8 = vor.u32 %v11122_v62, %v11121_v18 }
 0x175   : > { %2215 = vmatpush1.bf16.msra.mxu0 %v7261_v14  ;;  %1834 = vmatprep.mubr.bf16.mxu1 %v8536_v24  ;;  %v11117_v14 = vmov %v11115_v20  ;;  %v5924_v39 = vcombine.low %v424_v30, %v424_v30  ;;  %v10947_v18 = vshrl.u32 %v8791_v0, 16 }
 0x176   : > { %6600 = vmatprep.mubr.bf16.mxu0 %v1159_v37  ;;  %2216 = vmatprep.subr.bf16.mxu0 %v11099_v33  ;;  %v1169_v25 = vor.u32 %v8582_v36, %v11117_v14  ;;  %v11119_v36 = vld [vmem:[#allocation45_spill] sm:$0xff]  ;;  %v1177_v41 = vsel %vm785_vm1, %v1175_v8, %v11125_v50 }
 0x177   : > { %v1033_v37 = vor.u32 %v11119_v36, %v8616_v51  ;;  %v384_v36 = vld [vmem:[%s8186_s24 + $0x8] sm:$0xf] }
 0x178   : > { %v1171_v13 = vsel %vm785_vm1, %v1169_v25, %v8597_v32 }
 0x179   : > { %2217 = vmatpush1.bf16.msra.mxu0 %v7264_v27  ;;  %v11120_v27 = vshrl.u32 %v8536_v24, 16  ;;  %v1034_v63 = vsel %vm521_vm0, %v1029_v55, %v1033_v37  ;;  %v11129_v55 = vshrl.u32 %v8578_v10, 16 }
 0x17a   : > { %2218 = vmatprep.subr.bf16.mxu0 %v11099_v33 }
 0x17b   : > { %v1172_v49 = vor.u32 %v8597_v32, %v11120_v27  ;;  %v11123_v32 = vld [vmem:[#allocation48_spill] sm:$0xff]  ;;  %v1178_v54 = vor.u32 %v11125_v50, %v11129_v55 }
 0x17c   : > { %1835 = vmatmul.mubr.bf16.gmra.mrb[28].mxu1 %v1026_v61  ;;  %6601 = vmatmul.mubr.bf16.gmra.mrb[24].mxu0 %v1162_v3  ;;  %v11126_v61 = vld [vmem:[#allocation43_spill] sm:$0xff]  ;;  %v11127_v3 = vld [vmem:[#allocation49_spill] sm:$0xff]  ;;  %v385_v27 = vld [vmem:[%s8186_s24 + $0xc] sm:$0xf] }
 0x17d   : > { %2219 = vmatpush1.bf16.msra.mxu0 %v7265_v38  ;;  %1842 = vmatprep.mubr.bf16.mxu1 %v8559_v40  ;;  %v1174_v51 = vsel %vm785_vm1, %v1172_v49, %v11122_v62  ;;  %v8878_v38 = vcombine.low %v11123_v32, %v8773_v46  ;;  %v11130_v20 = vshrl.u32 %v11126_v61, 16  ;;  %v1180_v25 = vsel %vm785_vm1, %v1178_v54, %v11131_v53 }
 0x17e   : > { %6604 = vmatprep.mubr.bf16.mxu0 %v1165_v26  ;;  %2220 = vmatprep.subr.bf16.mxu0 %v11099_v33  ;;  %v11128_v26 = vld [vmem:[#allocation50_spill] sm:$0xff]  ;;  %v1192_v49 = vor.u32 %v10949_v42, %v1188_v19 }
 0x17f   : > { %11124 = vst [vmem:[#allocation45_spill] sm:$0xff] %v8878_v38  ;;  %v10944_v46 = vshrl.u32 %v8878_v38, 16  ;;  %v10945_v48 = vshll.u32 %v8878_v38, 16  ;;  %v1181_v16 = vor.u32 %v11131_v53, %v11130_v20  ;;  %v11134_v20 = vld [vmem:[#allocation44_spill] sm:$0xff] }
 0x180   : > { %v8931_v53 = vcombine.low %v385_v27, %v11134_v20 }
 0x181   : > { %2221 = vmatpush1.bf16.msra.mxu0 %v7268_v28  ;;  %v1037_v28 = vor.u32 %v11128_v26, %v11127_v3  ;;  %v1046_v8 = vrot.slane %v10944_v46, 3  ;;  %v7287_v3 = vld [vmem:[#allocation6 + $0x78] sm:$0xff]   ;;  %v7291_v26 = vld [vmem:[#allocation6 + $0x80] sm:$0xff]  }
 0x182   : > { %2222 = vmatprep.subr.bf16.mxu0 %v11099_v33 }
 0x183   : > { %v1038_v14 = vsel %vm521_vm0, %v1033_v37, %v1037_v28  ;;  %v1041_v37 = vor.u32 %v1040_v35, %v8804_v47  ;;  %v5882_v47 = vcombine.low %v384_v36, %v385_v27  ;;  %v1197_v35 = vsel %vm785_vm1, %v1192_v49, %v1196_v31  ;;  %v7298_v36 = vld [vmem:[#allocation6 + $0xb8] sm:$0xff]  }
 0x184   : > { %1843 = vmatmul.mubr.bf16.gmra.mrb[32].mxu1 %v1030_v57  ;;  %6605 = vmatmul.mubr.bf16.gmra.mrb[28].mxu0 %v1168_v34  ;;  %v1183_v57 = vsel %vm785_vm1, %v1181_v16, %v8723_v58  ;;  %v11132_v34 = vshrl.u32 %v8627_v43, 16  ;;  %v11140_v27 = vld [vmem:[#allocation30_spill] sm:$0xff] }
 0x185   : > { %2223 = vmatpush1.bf16.msra.mxu0 %v7269_v4  ;;  %1850 = vmatprep.mubr.bf16.mxu1 %v8578_v10  ;;  %v7281_v4 = vld [vmem:[#allocation6 + $0x60] sm:$0xff]   ;;  %v1042_v62 = vsel %vm521_vm0, %v1037_v28, %v1041_v37 }
 0x186   : > { %6608 = vmatprep.mubr.bf16.mxu0 %v1171_v13  ;;  %2224 = vmatprep.subr.bf16.mxu0 %v11099_v33  ;;  %v1184_v13 = vor.u32 %v8723_v58, %v11132_v34  ;;  %v1202_v58 = vshll.u32 %v5924_v39, 16  ;;  %v11136_v34 = vld [vmem:[#allocation28_spill] sm:$0xff]  ;;  %v11142_v49 = vld [vmem:[#allocation34_spill] sm:$0xff] }
 0x187   : > { %v7297_v39 = vld [vmem:[#allocation6 + $0xb0] sm:$0xff]  }
 0x188   : > { %v1204_v32 = vrot.slane %v1202_v58, 1  ;;  %v11144_v58 = vld [vmem:[#allocation36_spill] sm:$0xff] }
 0x189   : > { %2225 = vmatpush1.bf16.msra.mxu0 %v7272_v15  ;;  %v7282_v15 = vld [vmem:[#allocation6 + $0x68] sm:$0xff]  }
 0x18a   : > { %2226 = vmatprep.subr.bf16.mxu0 %v11099_v33 }
 0x18c   : > { %1851 = vmatmul.mubr.bf16.gmra.mrb[36].mxu1 %v1034_v63  ;;  %6609 = vmatmul.mubr.bf16.gmra.mrb[32].mxu0 %v1174_v51  ;;  %v1049_v63 = vrot.slane %v10945_v48, 4  ;;  %v7285_v51 = vld [vmem:[#allocation6 + $0x70] sm:$0xff]  }
 0x18d   : > { %2227 = vmatpush1.bf16.msra.mxu0 %v7273_v11  ;;  %1858 = vmatprep.mubr.bf16.mxu1 %v11126_v61  ;;  %v1189_v11 = vsel %vm785_vm1, %v1184_v13, %v1188_v19  ;;  %v1200_v19 = vor.u32 %v10947_v18, %v1196_v31  ;;  %v7295_v13 = vld [vmem:[#allocation6 + $0xa0] sm:$0xff]  }
 0x18e   : > { %6612 = vmatprep.mubr.bf16.mxu0 %v1177_v41  ;;  %2228 = vmatprep.subr.bf16.mxu0 %v11099_v33  ;;  %v8924_v50 = vor.u32 %v1049_v63, %v1046_v8  ;;  %v523_v41 = vshrl.u32 %v5882_v47, 16  ;;  %v11146_v8 = vshrl.u32 %v8536_v24, 16 }
 0x18f   : > { %v1205_v28 = vsel %vm785_vm1, %v1200_v19, %v1204_v32 }
 0x190   : > { %11133 = vst [vmem:[#allocation46_spill] sm:$0xff] %v8924_v50  ;;  %v1051_v55 = vsel %vm521_vm0, %v1041_v37, %v8924_v50  ;;  %v525_v54 = vrot.slane %v523_v41, 3  ;;  %v11141_v37 = vld [vmem:[#allocation32_spill] sm:$0xff]  ;;  %v641_v63 = vrot.slane %v11146_v8, 3  ;;  %v11150_v41 = vshrl.u32 %v8559_v40, 16 }
 0x191   : > { %2229 = vmatpush1.bf16.msra.mxu0 %v7276_v12  ;;  %v526_v12 = vshll.u32 %v5882_v47, 16  ;;  %v11147_v47 = vshll.u32 %v8536_v24, 16 }
 0x192   : > { %2230 = vmatprep.subr.bf16.mxu0 %v11099_v33 }
 0x193   : > { %v528_v31 = vrot.slane %v526_v12, 4  ;;  %v650_v12 = vrot.slane %v11150_v41, 3 }
 0x194   : > { %1859 = vmatmul.mubr.bf16.gmra.mrb[40].mxu1 %v1038_v14  ;;  %6613 = vmatmul.mubr.bf16.gmra.mrb[36].mxu0 %v1180_v25  ;;  %v11135_v14 = vld [vmem:[#allocation27_spill] sm:$0xff]  ;;  %v7293_v25 = vld [vmem:[#allocation6 + $0x90] sm:$0xff]  }
 0x195   : > { %1866 = vmatprep.mubr.bf16.mxu1 %v8627_v43  ;;  %6616 = vmatprep.mubr.bf16.mxu0 %v1183_v57  ;;  %v529_v16 = vor.u32 %v528_v31, %v525_v54  ;;  %v7294_v57 = vld [vmem:[#allocation6 + $0x98] sm:$0xff]   ;;  %v11154_v54 = vshrl.u32 %v8578_v10, 16  ;;  %v11167_v46 = vshll.u32 %v11135_v14, 16 }
 0x196   : > { %2231 = vmatpush1.bf16.msra.mxu0 %v7281_v4  ;;  %v7292_v4 = vld [vmem:[#allocation6 + $0x88] sm:$0xff]  }
 0x197   : > { %2232 = vmatprep.subr.bf16.mxu0 %v11099_v33  ;;  %v538_v30 = vsel %vm521_vm0, %v529_v16, %v8683_v9  ;;  %v7296_v9 = vld [vmem:[#allocation6 + $0xa8] sm:$0xff]   ;;  %v659_v31 = vrot.slane %v11154_v54, 3  ;;  %v796_v48 = vrot.slane %v11167_v46, 1  ;;  %v11169_v46 = vshrl.u32 %v11135_v14, 16 }
 0x198   : > { %v11156_v16 = vld [vmem:[#allocation40_spill] sm:$0xff] }
 0x19a   : > { %2233 = vmatpush1.bf16.msra.mxu0 %v7282_v15  ;;  %v11137_v15 = vld [vmem:[#allocation31_spill] sm:$0xff] }
 0x19b   : > { %2234 = vmatprep.subr.bf16.mxu0 %v11099_v33 }
 0x19c   : > { %1867 = vmatmul.mubr.bf16.gmra.mrb[44].mxu1 %v1042_v62  ;;  %6617 = vmatmul.mubr.bf16.gmra.mrb[40].mxu0 %v1189_v11  ;;  %v11143_v11 = vld [vmem:[#allocation35_spill] sm:$0xff]  ;;  %v11145_v62 = vld [vmem:[#allocation37_spill] sm:$0xff] }
 0x19d   : > { %6620 = vmatprep.mubr.bf16.mxu0 %v1197_v35  ;;  %1874 = vmatprep.mubr.bf16.mxu1 %v8676_v2  ;;  %v644_v35 = vrot.slane %v11147_v47, 4 }
 0x19e   : > { %2235 = vmatpush1.bf16.msra.mxu0 %v7285_v51  ;;  %v11148_v51 = vld [vmem:[#allocation38_spill] sm:$0xff] }
 0x19f   : > { %2236 = vmatprep.subr.bf16.mxu0 %v11099_v33  ;;  %v645_v19 = vor.u32 %v644_v35, %v641_v63 }
 0x1a1   : > { %v8967_v32 = vsel %vm521_vm0, %v8844_v45, %v645_v19  ;;  %v11155_v45 = vshll.u32 %v8578_v10, 16  ;;  %v11159_v10 = vshll.u32 %v11126_v61, 16 }
 0x1a2   : > { %2237 = vmatpush1.bf16.msra.mxu0 %v7287_v3  ;;  %11149 = vst [vmem:[#allocation48_spill] sm:$0xff] %v8967_v32  ;;  %v11151_v3 = vshll.u32 %v8559_v40, 16 }
 0x1a3   : > { %6624 = vmatprep.subr.bf16.mxu0 %v7291_v26  ;;  %v662_v20 = vrot.slane %v11155_v45, 4  ;;  %v671_v8 = vrot.slane %v11159_v10, 4  ;;  %v11163_v45 = vshll.u32 %v8627_v43, 16 }
 0x1a4   : > { %6621 = vmatmul.mubr.bf16.gmra.mrb[44].mxu0 %v1205_v28  ;;  %1875 = vmatmul.mubr.bf16.gmra.mrb[48].mxu1 %v1051_v55  ;;  %v11152_v28 = vld [vmem:[#allocation39_spill] sm:$0xff] }
 0x1a5   : > { %2238 = vmatprep.mubr.bf16.mxu0 %v8931_v53  ;;  %1882 = vmatprep.mubr.bf16.mxu1 %v8791_v0  ;;  %v663_v40 = vor.u32 %v662_v20, %v659_v31  ;;  %v680_v20 = vrot.slane %v11163_v45, 4 }
 0x1ac   : > { %2239 = vmatmul.mubr.bf16.vlgmr.msra.gmra.mrb[48].mxu0 %v538_v30 }
 0x1ad   : > { %6625 = vmatpush3.bf16.msra.mxu0 %v7291_v26  ;;  %2244 = vmatprep.mubr.bf16.mxu0 %v11135_v14  ;;  %v653_v26 = vrot.slane %v11151_v3, 4 }
 0x1ae   : > { %6626 = vmatprep.subr.bf16.mxu0 %v7292_v4 }
 0x1af   : > { %v654_v24 = vor.u32 %v653_v26, %v650_v12  ;;  %v7402_v26 = vld [vmem:[%s8186_s24 + $0x98] sm:$0xf] }
 0x1b1   : > { %6627 = vmatpush3.bf16.msra.mxu0 %v7292_v4  ;;  %v8976_v55 = vsel %vm521_vm0, %v645_v19, %v654_v24  ;;  %v11160_v19 = vld [vmem:[#allocation41_spill] sm:$0xff] }
 0x1b2   : > { %6628 = vmatprep.subr.bf16.mxu0 %v7293_v25  ;;  %11153 = vst [vmem:[#allocation47_spill] sm:$0xff] %v8976_v55 }
 0x1b4   : > { %2245 = vmatmul.mubr.bf16.gmra.mrb[4].mxu0 %v8698_v44  ;;  %v11138_v44 = vld [vmem:[#allocation33_spill] sm:$0xff] }
 0x1b5   : > { %2252 = vmatprep.mubr.bf16.mxu0 %v11136_v34  ;;  %6629 = vmatpush3.bf16.msra.mxu0 %v7293_v25 }
 0x1b6   : > { %6630 = vmatprep.subr.bf16.mxu0 %v7294_v57 }
 0x1b9   : > { %6631 = vmatpush3.bf16.msra.mxu0 %v7294_v57 }
 0x1ba   : > { %6632 = vmatprep.subr.bf16.mxu0 %v7295_v13 }
 0x1bc   : > { %2253 = vmatmul.mubr.bf16.gmra.mrb[52].mxu0 %v8703_v1  ;;  %v11139_v1 = vld [vmem:[#allocation29_spill] sm:$0xff] }
 0x1bd   : > { %2260 = vmatprep.mubr.bf16.mxu0 %v11137_v15  ;;  %6633 = vmatpush3.bf16.msra.mxu0 %v7295_v13 }
 0x1be   : > { %6634 = vmatprep.subr.bf16.mxu0 %v7296_v9 }
 0x1c1   : > { %6635 = vmatpush3.bf16.msra.mxu0 %v7296_v9  ;;  %v8987_v9 = vsel %vm521_vm0, %v654_v24, %v663_v40  ;;  %v5900_v24 = vcombine.low %v7402_v26, %v7402_v26 }
 0x1c2   : > { %6636 = vmatprep.subr.bf16.mxu0 %v7297_v39  ;;  %11157 = vst [vmem:[#allocation43_spill] sm:$0xff] %v8987_v9 }
 0x1c4   : > { %2261 = vmatmul.mubr.bf16.gmra.mrb[56].mxu0 %v8708_v29 }
 0x1c5   : > { %2268 = vmatprep.mubr.bf16.mxu0 %v11138_v44  ;;  %6637 = vmatpush3.bf16.msra.mxu0 %v7297_v39  ;;  %v11158_v39 = vshrl.u32 %v11126_v61, 16  ;;  %v11162_v61 = vshrl.u32 %v8627_v43, 16 }
 0x1c6   : > { %6638 = vmatprep.subr.bf16.mxu0 %v7298_v36 }
 0x1c7   : > { %v677_v31 = vrot.slane %v11162_v61, 3 }
 0x1c9   : > { %6639 = vmatpush3.bf16.msra.mxu0 %v7298_v36  ;;  %v668_v36 = vrot.slane %v11158_v39, 3  ;;  %v684_v39 = vshrl.u32 %v5900_v24, 16 }
 0x1ca   : > { %2798 = vmatprep.subr.bf16.mxu0 %v11099_v33 }
 0x1cb   : > { %v672_v41 = vor.u32 %v671_v8, %v668_v36  ;;  %v687_v36 = vshll.u32 %v5900_v24, 16  ;;  %v686_v26 = vrot.slane %v684_v39, 3 }
 0x1cc   : > { %2269 = vmatmul.mubr.bf16.gmra.mrb[60].mxu0 %v8713_v22 }
 0x1cd   : > { %2276 = vmatprep.mubr.bf16.mxu0 %v11139_v1  ;;  %v9001_v54 = vsel %vm521_vm0, %v663_v40, %v672_v41  ;;  %v789_v40 = vshll.u32 %v8931_v53, 16  ;;  %v689_v61 = vrot.slane %v687_v36, 4 }
 0x1ce   : > { %11161 = vst [vmem:[#allocation49_spill] sm:$0xff] %v9001_v54 }
 0x1cf   : > { %v791_v24 = vrot.slane %v789_v40, 1 }
 0x1d4   : > { %2277 = vmatmul.mubr.bf16.gmra.mrb[64].mxu0 %v8716_v5 }
 0x1d5   : > { %2284 = vmatprep.mubr.bf16.mxu0 %v11140_v27 }
 0x1dc   : > { %2285 = vmatmul.mubr.bf16.gmra.mrb[68].mxu0 %v8730_v23 }
 0x1dd   : > { %2292 = vmatprep.mubr.bf16.mxu0 %v11141_v37 }
 0x1e4   : > { %2293 = vmatmul.mubr.bf16.gmra.mrb[72].mxu0 %v8744_v7 }
 0x1e5   : > { %2300 = vmatprep.mubr.bf16.mxu0 %v11142_v49 }
 0x1ec   : > { %2301 = vmatmul.mubr.bf16.gmra.mrb[76].mxu0 %v8767_v59 }
 0x1ed   : > { %2308 = vmatprep.mubr.bf16.mxu0 %v11143_v11 }
 0x1f4   : > { %2309 = vmatmul.mubr.bf16.gmra.mrb[80].mxu0 %v8797_v56 }
 0x1f5   : > { %2316 = vmatprep.mubr.bf16.mxu0 %v11144_v58 }
 0x1fc   : > { %2317 = vmatmul.mubr.bf16.gmra.mrb[84].mxu0 %v8825_v21 }
 0x1fd   : > { %2324 = vmatprep.mubr.bf16.mxu0 %v11145_v62 }
 0x204   : > { %2325 = vmatmul.mubr.bf16.gmra.mrb[88].mxu0 %v8851_v52 }
 0x205   : > { %2332 = vmatprep.mubr.bf16.mxu0 %v11148_v51 }
 0x20c   : > { %2333 = vmatmul.mubr.bf16.gmra.mrb[92].mxu0 %v8967_v32  ;;  %v7309_v32 = vld [vmem:[#allocation6 + $0x1d0] sm:$0xff]  }
 0x20d   : > { %2340 = vmatprep.mubr.bf16.mxu0 %v11152_v28 }
 0x214   : > { %2341 = vmatmul.mubr.bf16.gmra.mrb[96].mxu0 %v8976_v55 }
 0x215   : > { %2348 = vmatprep.mubr.bf16.mxu0 %v11156_v16 }
 0x217   : > { %v1750_v30 = vpop.f32.mrb[0].mxu0  ;;  %v8984_v4 = vpop.f32.mrb[0].mxu1 }
 0x218   : > { %v1751_v25 = vpop.f32.mrb[1].mxu0  ;;  %v1782_v57 = vpop.f32.mrb[1].mxu1 }
 0x219   : > { %v1752_v13 = vpop.f32.mrb[2].mxu0  ;;  %v8993_v63 = vpop.f32.mrb[2].mxu1  ;;  %v11164_v57 = vld [vmem:[#allocation42_spill] sm:$0xff] }
 0x21a   : > { %v1753_v47 = vpop.f32.mrb[3].mxu0  ;;  %v1785_v35 = vpop.f32.mrb[3].mxu1  ;;  %v9011_v13 = vor.u32 %v680_v20, %v677_v31  ;;  %v787_v20 = vshrl.u32 %v8931_v53, 16 }
 0x21c   : > { %2349 = vmatmul.mubr.bf16.gmra.mrb[100].mxu0 %v8987_v9  ;;  %11165 = vst [vmem:[#allocation50_spill] sm:$0xff] %v9011_v13 }
 0x21d   : > { %2356 = vmatprep.mubr.bf16.mxu0 %v11160_v19 }
 0x21f   : > { %v8997_v12 = vpop.f32.mrb[4].mxu1 }
 0x220   : > { %v1790_v3 = vpop.f32.mrb[5].mxu1 }
 0x221   : > { %v9007_v30 = vpop.f32.mrb[6].mxu1  ;;  %v9018_v3 = vsel %vm521_vm0, %v672_v41, %v9011_v13 }
 0x222   : > { %v1793_v25 = vpop.f32.mrb[7].mxu1  ;;  %11166 = vst [vmem:[#allocation51_spill] sm:$0xff] %v9018_v3 }
 0x224   : > { %2357 = vmatmul.mubr.bf16.gmra.mrb[104].mxu0 %v9001_v54  ;;  %v7307_v54 = vld [vmem:[#allocation6 + $0x1c0] sm:$0xff]  }
 0x225   : > { %2364 = vmatprep.mubr.bf16.mxu0 %v11164_v57 }
 0x227   : > { %v1764_v10 = vpop.f32.mrb[8].mxu0  ;;  %v9014_v8 = vpop.f32.mrb[8].mxu1 }
 0x228   : > { %v1766_v47 = vpop.f32.mrb[9].mxu0  ;;  %v1798_v35 = vpop.f32.mrb[9].mxu1 }
 0x229   : > { %v1767_v43 = vpop.f32.mrb[10].mxu0  ;;  %v9020_v45 = vpop.f32.mrb[10].mxu1  ;;  %v690_v47 = vor.u32 %v689_v61, %v686_v26  ;;  %v792_v35 = vor.u32 %v791_v24, %v787_v20  ;;  %v11168_v26 = vshll.u32 %v11136_v34, 16  ;;  %v800_v20 = vor.u32 %v11169_v46, %v796_v48 }
 0x22a   : > { %v1769_v31 = vpop.f32.mrb[11].mxu0  ;;  %v1801_v25 = vpop.f32.mrb[11].mxu1  ;;  %v11170_v24 = vshrl.u32 %v11136_v34, 16  ;;  %v7300_v34 = vld [vmem:[#allocation6 + $0x188] sm:$0xff]  }
 0x22b   : > { %v691_v53 = vsel %vm521_vm0, %v9011_v13, %v690_v47  ;;  %v797_v25 = vsel %vm785_vm1, %v792_v35, %v796_v48  ;;  %v804_v61 = vrot.slane %v11168_v26, 1  ;;  %v11172_v48 = vshll.u32 %v11138_v44, 16 }
 0x22c   : > { %2365 = vmatmul.mubr.bf16.gmra.mrb[108].mxu0 %v9018_v3  ;;  %v7305_v3 = vld [vmem:[#allocation6 + $0x1b0] sm:$0xff]  }
 0x22d   : > { %2372 = vmatprep.mubr.bf16.mxu0 %v8643_v60  ;;  %v805_v35 = vsel %vm785_vm1, %v800_v20, %v804_v61  ;;  %v820_v14 = vrot.slane %v11172_v48, 1 }
 0x22f   : > { %v1772_v41 = vpop.f32.mrb[12].mxu0  ;;  %v9027_v6 = vpop.f32.mrb[12].mxu1 }
 0x230   : > { %v1774_v39 = vpop.f32.mrb[13].mxu0  ;;  %v1806_v36 = vpop.f32.mrb[13].mxu1 }
 0x231   : > { %v1775_v18 = vpop.f32.mrb[14].mxu0  ;;  %v9031_v40 = vpop.f32.mrb[14].mxu1  ;;  %v808_v39 = vor.u32 %v11170_v24, %v804_v61  ;;  %v11171_v36 = vshll.u32 %v11137_v15, 16  ;;  %v11174_v61 = vshrl.u32 %v11138_v44, 16  ;;  %v11175_v24 = vshll.u32 %v11139_v1, 16 }
 0x232   : > { %v1777_v31 = vpop.f32.mrb[15].mxu0  ;;  %v1809_v17 = vpop.f32.mrb[15].mxu1 }
 0x233   : > { %v812_v47 = vrot.slane %v11171_v36, 1  ;;  %v7299_v17 = vld [vmem:[#allocation6 + $0x180] sm:$0xff]   ;;  %v824_v20 = vor.u32 %v11174_v61, %v820_v14  ;;  %v828_v36 = vrot.slane %v11175_v24, 1 }
 0x234   : > { %2373 = vmatmul.mubr.bf16.gmra.mrb[112].mxu0 %v691_v53 }
 0x235   : > { %6640 = vmatprep.mubr.bf16.mxu0 %v797_v25  ;;  %v813_v26 = vsel %vm785_vm1, %v808_v39, %v812_v47  ;;  %v11173_v25 = vshrl.u32 %v11137_v15, 16 }
 0x237   : > { %v9042_v42 = vpop.f32.mrb[16].mxu1  ;;  %v816_v46 = vor.u32 %v11173_v25, %v812_v47  ;;  %v7301_v25 = vld [vmem:[#allocation6 + $0x190] sm:$0xff]  }
 0x238   : > { %v1814_v31 = vpop.f32.mrb[17].mxu1 }
 0x239   : > { %v9045_v53 = vpop.f32.mrb[18].mxu1  ;;  %v9064_v47 = vsel %vm785_vm1, %v816_v46, %v820_v14 }
 0x23a   : > { %v1817_v50 = vpop.f32.mrb[19].mxu1  ;;  %11176 = vst [vmem:[#allocation44_spill] sm:$0xff] %v9064_v47 }
 0x23c   : > { %6641 = vmatmul.mubr.bf16.vlgmr.msra.gmra.mrb[4].mxu0 %v805_v35 }
 0x23d   : > { %2799 = vmatpush1.bf16.msra.mxu0 %v7299_v17  ;;  %6644 = vmatprep.mubr.bf16.mxu0 %v813_v26 }
 0x23e   : > { %2800 = vmatprep.subr.bf16.mxu0 %v11099_v33 }
 0x23f   : > { %v6594_v39 = vpop.f32.mrb[16].mxu0  ;;  %v9057_v50 = vpop.f32.mrb[20].mxu1 }
 0x240   : > { %v9059_v31 = vadd.f32 %v6594_v39, %v1772_v41  ;;  %v1937_v35 = vpop.f32.mrb[17].mxu0  ;;  %v1822_v17 = vpop.f32.mrb[21].mxu1  ;;  %v9072_v41 = vsel %vm785_vm1, %v824_v20, %v828_v36  ;;  %v11180_v20 = vshrl.u32 %v11140_v27, 16 }
 0x241   : > { %v9061_v48 = vadd.f32 %v1937_v35, %v1764_v10  ;;  %v6595_v26 = vpop.f32.mrb[18].mxu0  ;;  %2801 = vmatpush1.bf16.msra.mxu0 %v7300_v34  ;;  %v9066_v38 = vpop.f32.mrb[22].mxu1  ;;  %11177 = vst [vmem:[#allocation27_spill] sm:$0xff] %v9072_v41  ;;  %v11178_v10 = vshll.u32 %v11140_v27, 16  ;;  %v7302_v34 = vld [vmem:[#allocation6 + $0x198] sm:$0xff]  }
 0x242   : > { %v9068_v61 = vadd.f32 %v6595_v26, %v1775_v18  ;;  %v1940_v24 = vpop.f32.mrb[19].mxu0  ;;  %2802 = vmatprep.subr.bf16.mxu0 %v11099_v33  ;;  %v1825_v39 = vpop.f32.mrb[23].mxu1  ;;  %v11179_v18 = vshrl.u32 %v11139_v1, 16 }
 0x243   : > { %v9074_v17 = vadd.f32 %v1940_v24, %v1767_v43  ;;  %v836_v14 = vrot.slane %v11178_v10, 1  ;;  %v11181_v43 = vshll.u32 %v11141_v37, 16 }
 0x244   : > { %6645 = vmatmul.mubr.bf16.gmra.mrb[116].mxu0 %v9064_v47  ;;  %v832_v46 = vor.u32 %v11179_v18, %v828_v36 }
 0x245   : > { %2803 = vmatpush1.bf16.msra.mxu0 %v7301_v25  ;;  %6648 = vmatprep.mubr.bf16.mxu0 %v9072_v41  ;;  %v840_v35 = vor.u32 %v11180_v20, %v836_v14  ;;  %v844_v26 = vrot.slane %v11181_v43, 1  ;;  %v7303_v20 = vld [vmem:[#allocation6 + $0x1a0] sm:$0xff]  }
 0x246   : > { %2804 = vmatprep.subr.bf16.mxu0 %v11099_v33  ;;  %v9096_v18 = vsel %vm785_vm1, %v832_v46, %v836_v14  ;;  %v11184_v14 = vshll.u32 %v11142_v49, 16 }
 0x247   : > { %v6598_v24 = vpop.f32.mrb[20].mxu0  ;;  %v9087_v39 = vpop.f32.mrb[24].mxu1  ;;  %11182 = vst [vmem:[#allocation28_spill] sm:$0xff] %v9096_v18 }
 0x248   : > { %v9090_v10 = vadd.f32 %v6598_v24, %v8997_v12  ;;  %v1953_v25 = vpop.f32.mrb[21].mxu0  ;;  %v1830_v41 = vpop.f32.mrb[25].mxu1  ;;  %v9105_v12 = vsel %vm785_vm1, %v840_v35, %v844_v26  ;;  %v7304_v24 = vld [vmem:[#allocation6 + $0x1a8] sm:$0xff]   ;;  %v11186_v35 = vshrl.u32 %v11142_v49, 16 }
 0x249   : > { %v9093_v47 = vadd.f32 %v1953_v25, %v8984_v4  ;;  %v6599_v36 = vpop.f32.mrb[22].mxu0  ;;  %2805 = vmatpush1.bf16.msra.mxu0 %v7302_v34  ;;  %v9098_v0 = vpop.f32.mrb[26].mxu1  ;;  %11183 = vst [vmem:[#allocation31_spill] sm:$0xff] %v9105_v12  ;;  %v852_v34 = vrot.slane %v11184_v14, 1 }
 0x24a   : > { %v9101_v43 = vadd.f32 %v6599_v36, %v9007_v30  ;;  %v1956_v13 = vpop.f32.mrb[23].mxu0  ;;  %2806 = vmatprep.subr.bf16.mxu0 %v11099_v33  ;;  %v1833_v41 = vpop.f32.mrb[27].mxu1  ;;  %v11185_v30 = vshrl.u32 %v11141_v37, 16 }
 0x24b   : > { %v9108_v4 = vadd.f32 %v1956_v13, %v8993_v63  ;;  %v856_v25 = vor.u32 %v11186_v35, %v852_v34  ;;  %v11187_v63 = vshll.u32 %v11143_v11, 16 }
 0x24c   : > { %6649 = vmatmul.mubr.bf16.gmra.mrb[120].mxu0 %v9096_v18  ;;  %v848_v46 = vor.u32 %v11185_v30, %v844_v26 }
 0x24d   : > { %2807 = vmatpush1.bf16.msra.mxu0 %v7303_v20  ;;  %6652 = vmatprep.mubr.bf16.mxu0 %v9105_v12  ;;  %v860_v13 = vrot.slane %v11187_v63, 1 }
 0x24e   : > { %2808 = vmatprep.subr.bf16.mxu0 %v11099_v33  ;;  %v9128_v30 = vsel %vm785_vm1, %v848_v46, %v852_v34  ;;  %v11190_v34 = vshll.u32 %v11144_v58, 16 }
 0x24f   : > { %v6602_v36 = vpop.f32.mrb[24].mxu0  ;;  %v1836_v41 = vpop.f32.mrb[28].mxu1  ;;  %11188 = vst [vmem:[#allocation33_spill] sm:$0xff] %v9128_v30 }
 0x250   : > { %v9122_v18 = vadd.f32 %v6602_v36, %v9027_v6  ;;  %v1969_v20 = vpop.f32.mrb[25].mxu0  ;;  %v1838_v14 = vpop.f32.mrb[29].mxu1  ;;  %v9135_v6 = vsel %vm785_vm1, %v856_v25, %v860_v13  ;;  %v868_v46 = vrot.slane %v11190_v34, 1  ;;  %v11192_v25 = vshrl.u32 %v11144_v58, 16 }
 0x251   : > { %v9125_v12 = vadd.f32 %v1969_v20, %v9014_v8  ;;  %v6603_v26 = vpop.f32.mrb[26].mxu0  ;;  %2809 = vmatpush1.bf16.msra.mxu0 %v7304_v24  ;;  %v1839_v35 = vpop.f32.mrb[30].mxu1  ;;  %11189 = vst [vmem:[#allocation29_spill] sm:$0xff] %v9135_v6  ;;  %v7306_v20 = vld [vmem:[#allocation6 + $0x1b8] sm:$0xff]  }
 0x252   : > { %v9131_v2 = vadd.f32 %v6603_v26, %v9031_v40  ;;  %v1972_v63 = vpop.f32.mrb[27].mxu0  ;;  %2810 = vmatprep.subr.bf16.mxu0 %v11099_v33  ;;  %v1841_v36 = vpop.f32.mrb[31].mxu1  ;;  %v11191_v40 = vshrl.u32 %v11143_v11, 16  ;;  %v872_v14 = vor.u32 %v11192_v25, %v868_v46 }
 0x253   : > { %v9138_v8 = vadd.f32 %v1972_v63, %v9020_v45  ;;  %v11193_v45 = vshll.u32 %v11145_v62, 16 }
 0x254   : > { %6653 = vmatmul.mubr.bf16.gmra.mrb[124].mxu0 %v9128_v30  ;;  %v864_v24 = vor.u32 %v11191_v40, %v860_v13 }
 0x255   : > { %2811 = vmatpush1.bf16.msra.mxu0 %v7305_v3  ;;  %6656 = vmatprep.mubr.bf16.mxu0 %v9135_v6  ;;  %v876_v26 = vrot.slane %v11193_v45, 1 }
 0x256   : > { %2812 = vmatprep.subr.bf16.mxu0 %v11099_v33  ;;  %v9158_v40 = vsel %vm785_vm1, %v864_v24, %v868_v46  ;;  %v11197_v46 = vshll.u32 %v11148_v51, 16 }
 0x257   : > { %v6606_v63 = vpop.f32.mrb[28].mxu0  ;;  %v1844_v36 = vpop.f32.mrb[32].mxu1  ;;  %11194 = vst [vmem:[#allocation30_spill] sm:$0xff] %v9158_v40 }
 0x258   : > { %v9152_v30 = vadd.f32 %v6606_v63, %v9057_v50  ;;  %v1985_v3 = vpop.f32.mrb[29].mxu0  ;;  %v1846_v34 = vpop.f32.mrb[33].mxu1  ;;  %v9165_v50 = vsel %vm785_vm1, %v872_v14, %v876_v26  ;;  %v884_v24 = vrot.slane %v11197_v46, 1  ;;  %v11199_v14 = vshrl.u32 %v11148_v51, 16 }
 0x259   : > { %v9155_v6 = vadd.f32 %v1985_v3, %v9042_v42  ;;  %v6607_v13 = vpop.f32.mrb[30].mxu0  ;;  %2813 = vmatpush1.bf16.msra.mxu0 %v7306_v20  ;;  %v1847_v25 = vpop.f32.mrb[34].mxu1  ;;  %11196 = vst [vmem:[#allocation34_spill] sm:$0xff] %v9165_v50  ;;  %v7308_v3 = vld [vmem:[#allocation6 + $0x1c8] sm:$0xff]  }
 0x25a   : > { %v9161_v9 = vadd.f32 %v6607_v13, %v9066_v38  ;;  %v1988_v45 = vpop.f32.mrb[31].mxu0  ;;  %2814 = vmatprep.subr.bf16.mxu0 %v11099_v33  ;;  %v1849_v63 = vpop.f32.mrb[35].mxu1  ;;  %v11198_v38 = vshrl.u32 %v11145_v62, 16  ;;  %v888_v34 = vor.u32 %v11199_v14, %v884_v24 }
 0x25b   : > { %v9168_v42 = vadd.f32 %v1988_v45, %v9045_v53  ;;  %v11200_v53 = vshll.u32 %v11152_v28, 16 }
 0x25c   : > { %11195 = vst [vmem:[#allocation32_spill] sm:$0xff] %v9161_v9  ;;  %6657 = vmatmul.mubr.bf16.gmra.mrb[128].mxu0 %v9158_v40  ;;  %v880_v20 = vor.u32 %v11198_v38, %v876_v26 }
 0x25d   : > { %2815 = vmatpush1.bf16.msra.mxu0 %v7307_v54  ;;  %6660 = vmatprep.mubr.bf16.mxu0 %v9165_v50  ;;  %v892_v13 = vrot.slane %v11200_v53, 1 }
 0x25e   : > { %2816 = vmatprep.subr.bf16.mxu0 %v11099_v33  ;;  %v9187_v26 = vsel %vm785_vm1, %v880_v20, %v884_v24  ;;  %v7310_v20 = vld [vmem:[#allocation6 + $0x1d8] sm:$0xff]  }
 0x25f   : > { %v6610_v45 = vpop.f32.mrb[32].mxu0  ;;  %v1852_v63 = vpop.f32.mrb[36].mxu1  ;;  %11202 = vst [vmem:[#allocation36_spill] sm:$0xff] %v9187_v26 }
 0x260   : > { %v9181_v40 = vadd.f32 %v6610_v45, %v1836_v41  ;;  %v2001_v46 = vpop.f32.mrb[33].mxu0  ;;  %v1854_v54 = vpop.f32.mrb[37].mxu1  ;;  %v9193_v41 = vsel %vm785_vm1, %v888_v34, %v892_v13 }
 0x261   : > { %v9184_v50 = vadd.f32 %v2001_v46, %v9087_v39  ;;  %v6611_v55 = vpop.f32.mrb[34].mxu0  ;;  %2817 = vmatpush1.bf16.msra.mxu0 %v7308_v3  ;;  %v1855_v38 = vpop.f32.mrb[38].mxu1  ;;  %11204 = vst [vmem:[#allocation38_spill] sm:$0xff] %v9193_v41  ;;  %v11205_v39 = vshll.u32 %v11156_v16, 16  ;;  %v11207_v3 = vshrl.u32 %v11156_v16, 16 }
 0x262   : > { %11201 = vst [vmem:[#allocation35_spill] sm:$0xff] %v9181_v40  ;;  %v9189_v14 = vadd.f32 %v6611_v55, %v1839_v35  ;;  %v2004_v9 = vpop.f32.mrb[35].mxu0  ;;  %2818 = vmatprep.subr.bf16.mxu0 %v11099_v33  ;;  %v1857_v53 = vpop.f32.mrb[39].mxu1  ;;  %v11206_v55 = vshrl.u32 %v11152_v28, 16 }
 0x263   : > { %v9196_v45 = vadd.f32 %v2004_v9, %v9098_v0  ;;  %v900_v24 = vrot.slane %v11205_v39, 1  ;;  %v11208_v0 = vshll.u32 %v11160_v19, 16 }
 0x264   : > { %11203 = vst [vmem:[#allocation37_spill] sm:$0xff] %v9189_v14  ;;  %6661 = vmatmul.mubr.bf16.gmra.mrb[132].mxu0 %v9187_v26  ;;  %v896_v35 = vor.u32 %v11206_v55, %v892_v13  ;;  %v7311_v14 = vld [vmem:[#allocation6 + $0x1e0] sm:$0xff]  }
 0x265   : > { %2819 = vmatpush1.bf16.msra.mxu0 %v7309_v32  ;;  %6664 = vmatprep.mubr.bf16.mxu0 %v9193_v41  ;;  %v904_v34 = vor.u32 %v11207_v3, %v900_v24  ;;  %v908_v9 = vrot.slane %v11208_v0, 1 }
 0x266   : > { %2820 = vmatprep.subr.bf16.mxu0 %v11099_v33  ;;  %v9214_v13 = vsel %vm785_vm1, %v896_v35, %v900_v24  ;;  %v7312_v35 = vld [vmem:[#allocation6 + $0x1e8] sm:$0xff]  }
 0x267   : > { %v6614_v46 = vpop.f32.mrb[36].mxu0  ;;  %v1860_v54 = vpop.f32.mrb[40].mxu1  ;;  %11211 = vst [vmem:[#allocation41_spill] sm:$0xff] %v9214_v13 }
 0x268   : > { %v9209_v53 = vadd.f32 %v6614_v46, %v1852_v63  ;;  %v2017_v39 = vpop.f32.mrb[37].mxu0  ;;  %v1862_v32 = vpop.f32.mrb[41].mxu1  ;;  %v9220_v63 = vsel %vm785_vm1, %v904_v34, %v908_v9  ;;  %v11217_v34 = vshrl.u32 %v11164_v57, 16 }
 0x269   : > { %v9211_v26 = vadd.f32 %v2017_v39, %v1844_v36  ;;  %v6615_v41 = vpop.f32.mrb[38].mxu0  ;;  %v1863_v55 = vpop.f32.mrb[42].mxu1  ;;  %2821 = vmatpush1.bf16.msra.mxu0 %v7310_v20  ;;  %11213 = vst [vmem:[#allocation55_spill] sm:$0xff] %v9220_v63  ;;  %v11215_v36 = vshll.u32 %v11164_v57, 16  ;;  %v7403_v20 = vld [vmem:[%s8186_s24 + $0x9c] sm:$0xf] }
 0x26a   : > { %11209 = vst [vmem:[#allocation39_spill] sm:$0xff] %v9209_v53  ;;  %v9216_v3 = vadd.f32 %v6615_v41, %v1855_v38  ;;  %v2020_v40 = vpop.f32.mrb[39].mxu0  ;;  %v1865_v0 = vpop.f32.mrb[43].mxu1  ;;  %2822 = vmatprep.subr.bf16.mxu0 %v11099_v33  ;;  %v11216_v38 = vshrl.u32 %v11160_v19, 16  ;;  %v5919_v39 = vcombine.low %v7403_v20, %v7403_v20  ;;  %v7314_v57 = vld [vmem:[#allocation6 + $0x1f0] sm:$0xff]  }
 0x26b   : > { %11210 = vst [vmem:[#allocation40_spill] sm:$0xff] %v9211_v26  ;;  %v9222_v46 = vadd.f32 %v2020_v40, %v1847_v25  ;;  %v916_v24 = vrot.slane %v11215_v36, 1  ;;  %v11218_v25 = vshll.u32 %v8643_v60, 16 }
 0x26c   : > { %11212 = vst [vmem:[#allocation54_spill] sm:$0xff] %v9216_v3  ;;  %6665 = vmatmul.mubr.bf16.gmra.mrb[136].mxu0 %v9214_v13  ;;  %v912_v41 = vor.u32 %v11216_v38, %v908_v9  ;;  %v930_v53 = vshll.u32 %v5919_v39, 16 }
 0x26d   : > { %11214 = vst [vmem:[#allocation56_spill] sm:$0xff] %v9222_v46  ;;  %6668 = vmatprep.mubr.bf16.mxu0 %v9220_v63  ;;  %2823 = vmatpush1.bf16.msra.mxu0 %v7311_v14  ;;  %v920_v40 = vor.u32 %v11217_v34, %v916_v24  ;;  %v924_v32 = vrot.slane %v11218_v25, 1 }
 0x26e   : > { %2824 = vmatprep.subr.bf16.mxu0 %v11099_v33  ;;  %v9241_v20 = vsel %vm785_vm1, %v912_v41, %v916_v24  ;;  %v932_v24 = vrot.slane %v930_v53, 1  ;;  %v7315_v41 = vld [vmem:[#allocation6 + $0x1f8] sm:$0xff]  }
 0x26f   : > { %v1868_v0 = vpop.f32.mrb[44].mxu1  ;;  %v6618_v13 = vpop.f32.mrb[40].mxu0  ;;  %v9246_v26 = vsel %vm785_vm1, %v920_v40, %v924_v32 }
 0x270   : > { %v9236_v36 = vadd.f32 %v6618_v13, %v1868_v0  ;;  %v1870_v63 = vpop.f32.mrb[45].mxu1  ;;  %v2033_v14 = vpop.f32.mrb[41].mxu0 }
 0x271   : > { %v9238_v3 = vadd.f32 %v2033_v14, %v1860_v54  ;;  %v1871_v9 = vpop.f32.mrb[46].mxu1  ;;  %v6619_v38 = vpop.f32.mrb[42].mxu0  ;;  %2825 = vmatpush1.bf16.msra.mxu0 %v7312_v35  ;;  %v11219_v54 = vshrl.u32 %v8643_v60, 16  ;;  %v7316_v35 = vld [vmem:[#allocation6 + $0x200] sm:$0xff]  }
 0x272   : > { %v9243_v34 = vadd.f32 %v6619_v38, %v1871_v9  ;;  %v2036_v46 = vpop.f32.mrb[43].mxu0  ;;  %v1873_v25 = vpop.f32.mrb[47].mxu1  ;;  %2826 = vmatprep.subr.bf16.mxu0 %v11099_v33 }
 0x273   : > { %v9249_v13 = vadd.f32 %v2036_v46, %v1863_v55  ;;  %v9255_v63 = vor.u32 %v11219_v54, %v924_v32 }
 0x274   : > { %6669 = vmatmul.mubr.bf16.gmra.mrb[140].mxu0 %v9241_v20 }
 0x275   : > { %6672 = vmatprep.mubr.bf16.mxu0 %v9246_v26  ;;  %2827 = vmatpush1.bf16.msra.mxu0 %v7314_v57  ;;  %v933_v38 = vsel %vm785_vm1, %v9255_v63, %v932_v24  ;;  %v7318_v24 = vld [vmem:[#allocation6 + $0x210] sm:$0xff]  }
 0x276   : > { %2828 = vmatprep.subr.bf16.mxu0 %v11099_v33 }
 0x277   : > { %v6622_v39 = vpop.f32.mrb[44].mxu0  ;;  %v1876_v40 = vpop.f32.mrb[48].mxu1 }
 0x278   : > { %v2049_v0 = vpop.f32.mrb[45].mxu0  ;;  %v1878_v14 = vpop.f32.mrb[49].mxu1 }
 0x279   : > { %v9258_v55 = vadd.f32 %v2049_v0, %v1876_v40  ;;  %v6623_v46 = vpop.f32.mrb[46].mxu0  ;;  %v1879_v9 = vpop.f32.mrb[50].mxu1  ;;  %2829 = vmatpush1.bf16.msra.mxu0 %v7315_v41  ;;  %v7317_v40 = vld [vmem:[#allocation6 + $0x208] sm:$0xff]   ;;  %v7319_v41 = vld [vmem:[#allocation6 + $0x218] sm:$0xff]  }
 0x27a   : > { %v2052_v32 = vpop.f32.mrb[47].mxu0  ;;  %6676 = vmatprep.subr.bf16.mxu0 %v7316_v35  ;;  %v1881_v53 = vpop.f32.mrb[51].mxu1 }
 0x27b   : > { %v9262_v57 = vadd.f32 %v2052_v32, %v1879_v9  ;;  %v7321_v9 = vld [vmem:[#allocation6 + $0x228] sm:$0xff]  }
 0x27c   : > { %6673 = vmatmul.mubr.bf16.gmra.mrb[144].mxu0 %v933_v38 }
 0x27d   : > { %2830 = vmatprep.mubr.bf16.mxu0 %v11137_v15  ;;  %v7320_v15 = vld [vmem:[#allocation6 + $0x220] sm:$0xff]  }
 0x27f   : > { %v2240_v33 = vpop.f32.mrb[48].mxu0 }
 0x280   : > { %v2241_v25 = vpop.f32.mrb[49].mxu0  ;;  %v7323_v33 = vld [vmem:[#allocation6 + $0x238] sm:$0xff]  }
 0x281   : > { %v2242_v54 = vpop.f32.mrb[50].mxu0 }
 0x282   : > { %v2243_v39 = vpop.f32.mrb[51].mxu0 }
 0x284   : > { %2831 = vmatmul.mubr.bf16.vlgmr.msra.gmra.mrb[148].mxu0 %v8708_v29 }
 0x285   : > { %6677 = vmatpush3.bf16.msra.mxu0 %v7316_v35  ;;  %2836 = vmatprep.mubr.bf16.mxu0 %v11138_v44 }
 0x286   : > { %6678 = vmatprep.subr.bf16.mxu0 %v7317_v40 }
 0x289   : > { %6679 = vmatpush3.bf16.msra.mxu0 %v7317_v40 }
 0x28a   : > { %6680 = vmatprep.subr.bf16.mxu0 %v7318_v24 }
 0x28c   : > { %2837 = vmatmul.mubr.bf16.gmra.mrb[4].mxu0 %v8713_v22  ;;  %v7322_v22 = vld [vmem:[#allocation6 + $0x230] sm:$0xff]  }
 0x28d   : > { %2844 = vmatprep.mubr.bf16.mxu0 %v11139_v1  ;;  %6681 = vmatpush3.bf16.msra.mxu0 %v7318_v24 }
 0x28e   : > { %6682 = vmatprep.subr.bf16.mxu0 %v7319_v41 }
 0x28f   : > { %v2254_v0 = vpop.f32.mrb[52].mxu0 }
 0x290   : > { %v9270_v14 = vadd.f32 %v2254_v0, %v9061_v48  ;;  %v2256_v29 = vpop.f32.mrb[53].mxu0 }
 0x291   : > { %v2257_v35 = vpop.f32.mrb[54].mxu0  ;;  %6683 = vmatpush3.bf16.msra.mxu0 %v7319_v41 }
 0x292   : > { %v9273_v44 = vadd.f32 %v2257_v35, %v9074_v17  ;;  %v2259_v46 = vpop.f32.mrb[55].mxu0  ;;  %6684 = vmatprep.subr.bf16.mxu0 %v7320_v15 }
 0x293   : > { %v3285_v46 = vld [vmem:[%s8167_s7 + $0x28] sm:$0xff] }
 0x294   : > { %2845 = vmatmul.mubr.bf16.gmra.mrb[152].mxu0 %v8716_v5 }
 0x295   : > { %2852 = vmatprep.mubr.bf16.mxu0 %v11140_v27  ;;  %6685 = vmatpush3.bf16.msra.mxu0 %v7320_v15 }
 0x296   : > { %6686 = vmatprep.subr.bf16.mxu0 %v7321_v9 }
 0x297   : > { %v2262_v1 = vpop.f32.mrb[56].mxu0 }
 0x298   : > { %v9278_v48 = vadd.f32 %v2262_v1, %v9059_v31  ;;  %v2264_v38 = vpop.f32.mrb[57].mxu0 }
 0x299   : > { %v2265_v32 = vpop.f32.mrb[58].mxu0  ;;  %6687 = vmatpush3.bf16.msra.mxu0 %v7321_v9  ;;  %v3289_v9 = vld [vmem:[%s8167_s7 + $0x48] sm:$0xff]  ;;  %v3290_v38 = vld [vmem:[%s8167_s7 + $0x50] sm:$0xff] }
 0x29a   : > { %v9281_v17 = vadd.f32 %v2265_v32, %v9068_v61  ;;  %v2267_v53 = vpop.f32.mrb[59].mxu0  ;;  %6688 = vmatprep.subr.bf16.mxu0 %v7322_v22 }
 0x29b   : > { %v3292_v53 = vld [vmem:[%s8167_s7 + $0x60] sm:$0xff] }
 0x29c   : > { %2853 = vmatmul.mubr.bf16.gmra.mrb[156].mxu0 %v8730_v23 }
 0x29d   : > { %2860 = vmatprep.mubr.bf16.mxu0 %v11141_v37  ;;  %6689 = vmatpush3.bf16.msra.mxu0 %v7322_v22 }
 0x29e   : > { %6690 = vmatprep.subr.bf16.mxu0 %v7323_v33 }
 0x29f   : > { %v2270_v5 = vpop.f32.mrb[60].mxu0 }
 0x2a0   : > { %v9286_v27 = vadd.f32 %v2270_v5, %v9093_v47  ;;  %v2272_v31 = vpop.f32.mrb[61].mxu0 }
 0x2a1   : > { %v2273_v25 = vpop.f32.mrb[62].mxu0  ;;  %6691 = vmatpush3.bf16.msra.mxu0 %v7323_v33  ;;  %v3293_v33 = vld [vmem:[%s8167_s7 + $0x68] sm:$0xff]  ;;  %v9339_v31 = vld [vmem:[%s8186_s24 + $0xa4] sm:$0xf] }
 0x2a2   : > { %v9289_v54 = vadd.f32 %v2273_v25, %v9108_v4  ;;  %v2275_v61 = vpop.f32.mrb[63].mxu0  ;;  %v9342_v25 = vld [vmem:[%s8186_s24 + $0xa8] sm:$0xf] }
 0x2a4   : > { %2861 = vmatmul.mubr.bf16.gmra.mrb[160].mxu0 %v8744_v7 }
 0x2a5   : > { %2868 = vmatprep.mubr.bf16.mxu0 %v11142_v49 }
 0x2a7   : > { %v2278_v23 = vpop.f32.mrb[64].mxu0 }
 0x2a8   : > { %v9294_v37 = vadd.f32 %v2278_v23, %v9090_v10  ;;  %v2280_v39 = vpop.f32.mrb[65].mxu0  ;;  %v11220_v23 = vld [vmem:[#allocation32_spill] sm:$0xff] }
 0x2a9   : > { %v2281_v40 = vpop.f32.mrb[66].mxu0 }
 0x2aa   : > { %v9297_v47 = vadd.f32 %v2281_v40, %v9101_v43  ;;  %v2283_v24 = vpop.f32.mrb[67].mxu0  ;;  %v3286_v43 = vld [vmem:[%s8167_s7 + $0x30] sm:$0xff] }
 0x2ab   : > { %3336 = vperm.xlu0 %7208, %v3286_v43   ;;  %v9356_v24 = vld [vmem:[%s8186_s24 + $0xb0] sm:$0xf]  ;;  %v3296_v43 = vld [vmem:[%s8167_s7 + $0x80] sm:$0xff] }
 0x2ac   : > { %2869 = vmatmul.mubr.bf16.gmra.mrb[164].mxu0 %v8767_v59 }
 0x2ad   : > { %2876 = vmatprep.mubr.bf16.mxu0 %v11143_v11  ;;  %v3284_v11 = vld [vmem:[%s8167_s7 + $0x20] sm:$0xff] }
 0x2ae   : > { %3326 = vperm.xlu1 %7209, %v3284_v11  }
 0x2af   : > { %v2286_v4 = vpop.f32.mrb[68].mxu0 }
 0x2b0   : > { %v9302_v7 = vadd.f32 %v2286_v4, %v9125_v12  ;;  %v2288_v49 = vpop.f32.mrb[69].mxu0 }
 0x2b1   : > { %v2289_v41 = vpop.f32.mrb[70].mxu0 }
 0x2b2   : > { %v9305_v10 = vadd.f32 %v2289_v41, %v9138_v8  ;;  %v2291_v15 = vpop.f32.mrb[71].mxu0  ;;  %v3287_v8 = vld [vmem:[%s8167_s7 + $0x38] sm:$0xff]  ;;  %3331 = vperm.xlu1 %7209, %v3285_v46  }
 0x2b3   : > { %3341 = vperm.xlu0 %7208, %v3287_v8   ;;  %v3295_v41 = vld [vmem:[%s8167_s7 + $0x78] sm:$0xff]  ;;  %v11221_v15 = vld [vmem:[#allocation48_spill] sm:$0xff] }
 0x2b4   : > { %2877 = vmatmul.mubr.bf16.gmra.mrb[168].mxu0 %v8797_v56  ;;  %v3297_v8 = vld [vmem:[%s8167_s7 + $0x88] sm:$0xff] }
 0x2b5   : > { %2884 = vmatprep.mubr.bf16.mxu0 %v11144_v58  ;;  %v3288_v58 = vld [vmem:[%s8167_s7 + $0x40] sm:$0xff] }
 0x2b6   : > { %3351 = vperm.xlu1 %7209, %v3289_v9   ;;  %v3298_v9 = vld [vmem:[%s8167_s7 + $0x90] sm:$0xff] }
 0x2b7   : > { %v2294_v59 = vpop.f32.mrb[72].mxu0  ;;  %3346 = vperm.xlu0 %7208, %v3288_v58  }
 0x2b8   : > { %v9312_v12 = vadd.f32 %v2294_v59, %v9122_v18  ;;  %v2296_v0 = vpop.f32.mrb[73].mxu0 }
 0x2b9   : > { %v2297_v29 = vpop.f32.mrb[74].mxu0 }
 0x2ba   : > { %v9316_v35 = vadd.f32 %v2297_v29, %v9131_v2  ;;  %v2299_v56 = vpop.f32.mrb[75].mxu0 }
 0x2bb   : > { %3356 = vperm.xlu0 %7208, %v3290_v38  }
 0x2bc   : > { %2885 = vmatmul.mubr.bf16.gmra.mrb[172].mxu0 %v8825_v21 }
 0x2bd   : > { %2892 = vmatprep.mubr.bf16.mxu0 %v11145_v62  ;;  %v3291_v62 = vld [vmem:[%s8167_s7 + $0x58] sm:$0xff] }
 0x2be   : > { %3361 = vperm.xlu1 %7209, %v3291_v62   ;;  %v3300_v62 = vld [vmem:[%s8167_s7 + $0xa0] sm:$0xff] }
 0x2bf   : > { %v2302_v18 = vpop.f32.mrb[76].mxu0  ;;  %3366 = vperm.xlu0 %7208, %v3292_v53   ;;  %v3301_v53 = vld [vmem:[%s8167_s7 + $0xa8] sm:$0xff] }
 0x2c0   : > { %v9324_v22 = vadd.f32 %v2302_v18, %v9155_v6  ;;  %v2304_v2 = vpop.f32.mrb[77].mxu0 }
 0x2c1   : > { %v2305_v1 = vpop.f32.mrb[78].mxu0 }
 0x2c2   : > { %v9328_v21 = vadd.f32 %v2305_v1, %v9168_v42  ;;  %v2307_v32 = vpop.f32.mrb[79].mxu0  ;;  %3371 = vperm.xlu1 %7209, %v3293_v33  }
 0x2c3   : > { %v3299_v32 = vld [vmem:[%s8167_s7 + $0x98] sm:$0xff] }
 0x2c4   : > { %2893 = vmatmul.mubr.bf16.gmra.mrb[176].mxu0 %v8851_v52  ;;  %v9346_v52 = vcombine.low %v9339_v31, %v9342_v25 }
 0x2c5   : > { %2900 = vmatprep.mubr.bf16.mxu0 %v11148_v51  ;;  %v3294_v51 = vld [vmem:[%s8167_s7 + $0x70] sm:$0xff] }
 0x2c6   : > { %3376 = vperm.xlu0 %7208, %v3294_v51   ;;  %v1326_v4 = vshll.u32 %v9346_v52, 16  ;;  %3381 = vperm.xlu1 %7209, %v3295_v41   ;;  %v1330_v0 = vshrl.u32 %v9346_v52, 16  ;;  %v3302_v51 = vld [vmem:[%s8167_s7 + $0xb0] sm:$0xff]  ;;  %v3303_v41 = vld [vmem:[%s8167_s7 + $0xb8] sm:$0xff] }
 0x2c7   : > { %v2310_v6 = vpop.f32.mrb[80].mxu0 }
 0x2c8   : > { %v9336_v5 = vadd.f32 %v2310_v6, %v9152_v30  ;;  %v2312_v42 = vpop.f32.mrb[81].mxu0  ;;  %v9353_v30 = vld [vmem:[%s8186_s24 + $0xac] sm:$0xf]  ;;  %v9368_v11 = vrot.slane %v1326_v4, 1  ;;  %v11223_v6 = vld [vmem:[#allocation35_spill] sm:$0xff] }
 0x2c9   : > { %v2313_v61 = vpop.f32.mrb[82].mxu0  ;;  %v9361_v49 = vcombine.low %v9353_v30, %v9356_v24 }
 0x2ca   : > { %v9350_v39 = vadd.f32 %v2313_v61, %v11220_v23  ;;  %v2315_v40 = vpop.f32.mrb[83].mxu0  ;;  %3386 = vperm.xlu0 %7208, %v3296_v43   ;;  %3391 = vperm.xlu1 %7209, %v3297_v8   ;;  %v11224_v23 = vld [vmem:[#allocation37_spill] sm:$0xff]  ;;  %v3305_v43 = vld [vmem:[%s8167_s7 + $0xc8] sm:$0xff] }
 0x2cb   : > { %v1334_v59 = vshll.u32 %v9361_v49, 16 }
 0x2cc   : > { %2901 = vmatmul.mubr.bf16.gmra.mrb[180].mxu0 %v11221_v15  ;;  %v11225_v15 = vld [vmem:[#allocation43_spill] sm:$0xff] }
 0x2cd   : > { %2908 = vmatprep.mubr.bf16.mxu0 %v11152_v28  ;;  %v9372_v56 = vrot.slane %v1334_v59, 1  ;;  %v1332_v28 = vor.u32 %v1330_v0, %v9368_v11  ;;  %v3306_v0 = vld [vmem:[%s8167_s7 + $0xd0] sm:$0xff] }
 0x2ce   : > { %3396 = vperm.xlu0 %7208, %v3298_v9   ;;  %3401 = vperm.xlu1 %7209, %v3299_v32   ;;  %v11227_v9 = vld [vmem:[#allocation56_spill] sm:$0xff] }
 0x2cf   : > { %v2318_v29 = vpop.f32.mrb[84].mxu0  ;;  %v9384_v38 = vsel %vm785_vm1, %v1332_v28, %v9372_v56 }
 0x2d0   : > { %v9375_v46 = vadd.f32 %v2318_v29, %v9184_v50  ;;  %v2320_v58 = vpop.f32.mrb[85].mxu0  ;;  %v11222_v50 = vld [vmem:[#allocation47_spill] sm:$0xff]  ;;  %v11226_v29 = vld [vmem:[#allocation40_spill] sm:$0xff] }
 0x2d1   : > { %v2321_v18 = vpop.f32.mrb[86].mxu0 }
 0x2d2   : > { %v9380_v2 = vadd.f32 %v2321_v18, %v9196_v45  ;;  %v2323_v1 = vpop.f32.mrb[87].mxu0  ;;  %3406 = vperm.xlu0 %7208, %v3300_v62   ;;  %3411 = vperm.xlu1 %7209, %v3301_v53   ;;  %v3307_v18 = vld [vmem:[%s8167_s7 + $0xd8] sm:$0xff]  ;;  %v3309_v53 = vld [vmem:[%s8167_s7 + $0xe8] sm:$0xff] }
 0x2d3   : > { %v11229_v62 = vld [vmem:[#allocation42_spill] sm:$0xff] }
 0x2d4   : > { %2909 = vmatmul.mubr.bf16.gmra.mrb[184].mxu0 %v11222_v50  ;;  %v3308_v50 = vld [vmem:[%s8167_s7 + $0xe0] sm:$0xff] }
 0x2d5   : > { %2916 = vmatprep.mubr.bf16.mxu0 %v11156_v16  ;;  %v3304_v16 = vld [vmem:[%s8167_s7 + $0xc0] sm:$0xff] }
 0x2d6   : > { %3416 = vperm.xlu0 %7208, %v3302_v51   ;;  %3421 = vperm.xlu1 %7209, %v3303_v41  }
 0x2d7   : > { %v2326_v45 = vpop.f32.mrb[88].mxu0 }
 0x2d8   : > { %v9392_v33 = vadd.f32 %v2326_v45, %v11223_v6  ;;  %v2328_v42 = vpop.f32.mrb[89].mxu0  ;;  %v11230_v6 = vld [vmem:[#allocation39_spill] sm:$0xff] }
 0x2d9   : > { %v2329_v61 = vpop.f32.mrb[90].mxu0 }
 0x2da   : > { %v9396_v40 = vadd.f32 %v2329_v61, %v11224_v23  ;;  %v2331_v4 = vpop.f32.mrb[91].mxu0  ;;  %3426 = vperm.xlu0 %7208, %v3304_v16   ;;  %3431 = vperm.xlu1 %7209, %v3305_v43   ;;  %v11231_v23 = vld [vmem:[#allocation52_spill] sm:$0xff]  ;;  %v3310_v43 = vld [vmem:[%s8167_s7 + $0xf0] sm:$0xff] }
 0x2db   : > { %v11232_v4 = vshrl.u32 %v11231_v23, 16  ;;  %v11233_v16 = vshll.u32 %v11231_v23, 16 }
 0x2dc   : > { %2917 = vmatmul.mubr.bf16.gmra.mrb[188].mxu0 %v11225_v15 }
 0x2dd   : > { %2924 = vmatprep.mubr.bf16.mxu0 %v11160_v19  ;;  %v11228_v19 = vld [vmem:[#allocation49_spill] sm:$0xff]  ;;  %v1248_v41 = vrot.slane %v11232_v4, 3  ;;  %v1249_v15 = vrot.slane %v11233_v16, 4 }
 0x2de   : > { %3436 = vperm.xlu0 %7208, %v3306_v0   ;;  %3441 = vperm.xlu1 %7209, %v3307_v18   ;;  %v11235_v18 = vld [vmem:[#allocation51_spill] sm:$0xff] }
 0x2df   : > { %v2334_v59 = vpop.f32.mrb[92].mxu0 }
 0x2e0   : > { %v9405_v8 = vadd.f32 %v2334_v59, %v11226_v29  ;;  %v2336_v58 = vpop.f32.mrb[93].mxu0  ;;  %v11234_v59 = vld [vmem:[#allocation54_spill] sm:$0xff] }
 0x2e1   : > { %v2337_v28 = vpop.f32.mrb[94].mxu0  ;;  %v3311_v58 = vld [vmem:[%s8167_s7 + $0xf8] sm:$0xff] }
 0x2e2   : > { %v9409_v1 = vadd.f32 %v2337_v28, %v11227_v9  ;;  %v2339_v32 = vpop.f32.mrb[95].mxu0  ;;  %3446 = vperm.xlu0 %7208, %v3308_v50   ;;  %3451 = vperm.xlu1 %7209, %v3309_v53   ;;  %v3282_v28 = vld [vmem:[%s8167_s7 + $0x10] sm:$0xff]  ;;  %v1250_v9 = vor.u32 %v1249_v15, %v1248_v41  ;;  %v3283_v50 = vld [vmem:[%s8167_s7 + $0x18] sm:$0xff]  ;;  %v5925_v41 = vcombine.low %v9342_v25, %v9353_v30 }
 0x2e3   : > { %v11236_v53 = vld [vmem:[#allocation50_spill] sm:$0xff]  ;;  %v11240_v15 = vld [vmem:[#allocation45_spill] sm:$0xff] }
 0x2e4   : > { %2925 = vmatmul.mubr.bf16.gmra.mrb[192].mxu0 %v11228_v19 }
 0x2e5   : > { %2932 = vmatprep.mubr.bf16.mxu0 %v11229_v62 }
 0x2e6   : > { %3456 = vperm.xlu0 %7208, %v3310_v43   ;;  %3461 = vperm.xlu1 %7209, %v3311_v58  }
 0x2e7   : > { %v2342_v45 = vpop.f32.mrb[96].mxu0 }
 0x2e8   : > { %v9416_v42 = vadd.f32 %v2342_v45, %v11230_v6  ;;  %v2344_v61 = vpop.f32.mrb[97].mxu0  ;;  %v1251_v6 = vsel %vm521_vm0, %v11236_v53, %v1250_v9 }
 0x2e9   : > { %v2345_v51 = vpop.f32.mrb[98].mxu0  ;;  %v11237_v61 = vld [vmem:[#allocation53_spill] sm:$0xff] }
 0x2ea   : > { %v9424_v0 = vadd.f32 %v2345_v51, %v11234_v59  ;;  %v2347_v29 = vpop.f32.mrb[99].mxu0  ;;  %3316 = vperm.xlu0 %7208, %v3282_v28   ;;  %3321 = vperm.xlu1 %7209, %v3283_v50   ;;  %v11238_v51 = vshrl.u32 %v11237_v61, 16  ;;  %v11239_v4 = vshll.u32 %v11237_v61, 16  ;;  %v1257_v59 = vshrl.u32 %v5925_v41, 16 }
 0x2eb   : > { %v1260_v29 = vshll.u32 %v5925_v41, 16 }
 0x2ec   : > { %2933 = vmatmul.mubr.bf16.gmra.mrb[196].mxu0 %v11235_v18  ;;  %v1252_v23 = vrot.slane %v11238_v51, 3  ;;  %v1259_v30 = vrot.slane %v1257_v59, 3 }
 0x2ed   : > { %2940 = vmatprep.mubr.bf16.mxu0 %v8643_v60  ;;  %v1253_v60 = vrot.slane %v11239_v4, 4 }
 0x2ef   : > { %v2350_v32 = vpop.f32.mrb[100].mxu0  ;;  %v1254_v43 = vor.u32 %v1253_v60, %v1252_v23 }
 0x2f0   : > { %v9432_v19 = vadd.f32 %v2350_v32, %v9238_v3  ;;  %v2352_v62 = vpop.f32.mrb[101].mxu0  ;;  %v3312_v32 = vld [vmem:[%s8167_s7 + $0x100] sm:$0xff] }
 0x2f1   : > { %v2353_v45 = vpop.f32.mrb[102].mxu0  ;;  %v1255_v25 = vsel %vm521_vm0, %v1250_v9, %v1254_v43  ;;  %v5926_v62 = vcombine.low %v9356_v24, %v9356_v24  ;;  %3466 = vperm.xlu0 %7208, %v3312_v32  }
 0x2f2   : > { %v9443_v16 = vadd.f32 %v2353_v45, %v9249_v13  ;;  %v2355_v3 = vpop.f32.mrb[103].mxu0  ;;  %v1262_v13 = vrot.slane %v1260_v29, 4 }
 0x2f3   : > { %v1266_v61 = vshrl.u32 %v5926_v62, 16  ;;  %v1269_v51 = vshll.u32 %v5926_v62, 16  ;;  %v7329_v62 = vld [vmem:[#allocation8 + $0x100] sm:$0xff]  }
 0x2f4   : > { %2941 = vmatmul.mubr.bf16.gmra.mrb[200].mxu0 %v1251_v6  ;;  %v3313_v6 = vld [vmem:[%s8167_s7 + $0x108] sm:$0xff]  ;;  %6248 = vmatprep.subr.bf16.mxu1 %v7329_v62  ;;  %s11396_s7 = sld [smem:[#allocation80_spill]] }
 0x2f5   : > { %2948 = vmatprep.mubr.bf16.mxu0 %v11240_v15  ;;  %3471 = vperm.xlu1 %7209, %v3313_v6   ;;  %v1268_v41 = vrot.slane %v1266_v61, 3  ;;  %v7330_v61 = vld [vmem:[#allocation8 + $0xc0] sm:$0xff]  }
 0x2f6   : > { %6249 = vmatpush3.bf16.msra.mxu1 %v7330_v61 }
 0x2f7   : > { %v2358_v58 = vpop.f32.mrb[104].mxu0 }
 0x2f8   : > { %v9447_v28 = vadd.f32 %v2358_v58, %v9236_v36  ;;  %v2360_v18 = vpop.f32.mrb[105].mxu0  ;;  %v1263_v36 = vor.u32 %v1262_v13, %v1259_v30 }
 0x2f9   : > { %v2361_v50 = vpop.f32.mrb[106].mxu0 }
 0x2fa   : > { %v9454_v45 = vadd.f32 %v2361_v50, %v9243_v34  ;;  %v2363_v53 = vpop.f32.mrb[107].mxu0  ;;  %v1264_v24 = vsel %vm521_vm0, %v1254_v43, %v1263_v36  ;;  %v1271_v34 = vrot.slane %v1269_v51, 4  ;;  %v11241_v50 = vld [vmem:[#allocation44_spill] sm:$0xff]  ;;  %v11242_v43 = vld [vmem:[#allocation27_spill] sm:$0xff]  ;;  %s11397_s13 = smov %s11396_s7  ;;  %s10767_s12 = scalar_lea.hbm %s11396_s7, %s6106_s3 }
 0x2fc   : > { %2949 = vmatmul.mubr.bf16.gmra.mrb[204].mxu0 %v1255_v25  ;;  %v11243_v25 = vld [vmem:[#allocation28_spill] sm:$0xff] }
 0x2fd   : > { %2956 = vmatprep.mubr.bf16.mxu0 %v9346_v52  ;;  %v1272_v52 = vor.u32 %v1271_v34, %v1268_v41 }
 0x2ff   : > { %v2366_v23 = vpop.f32.mrb[108].mxu0 }
 0x300   : > { %v9459_v9 = vadd.f32 %v2366_v23, %v9258_v55  ;;  %v2368_v4 = vpop.f32.mrb[109].mxu0  ;;  %v1273_v55 = vsel %vm521_vm0, %v1263_v36, %v1272_v52 }
 0x301   : > { %v2369_v60 = vpop.f32.mrb[110].mxu0  ;;  %v11244_v4 = vld [vmem:[#allocation31_spill] sm:$0xff] }
 0x302   : > { %v9463_v3 = vadd.f32 %v2369_v60, %v9262_v57  ;;  %v2371_v59 = vpop.f32.mrb[111].mxu0 }
 0x304   : > { %2957 = vmatmul.mubr.bf16.gmra.mrb[208].mxu0 %v1264_v24 }
 0x305   : > { %2964 = vmatprep.mubr.bf16.mxu0 %v9361_v49 }
 0x307   : > { %v2374_v29 = vpop.f32.mrb[112].mxu0 }
 0x308   : > { %v2375_v58 = vpop.f32.mrb[113].mxu0  ;;  %v11246_v29 = vld [vmem:[#allocation29_spill] sm:$0xff] }
 0x309   : > { %v2376_v18 = vpop.f32.mrb[114].mxu0  ;;  %v11247_v58 = vld [vmem:[#allocation30_spill] sm:$0xff] }
 0x30a   : > { %v2377_v32 = vpop.f32.mrb[115].mxu0  ;;  %v7332_v18 = vld [vmem:[#allocation8 + $0xc8] sm:$0xff]  }
 0x30c   : > { %2965 = vmatmul.mubr.bf16.gmra.mrb[212].mxu0 %v1273_v55 }
 0x30d   : > { %6692 = vmatprep.mubr.bf16.mxu0 %v11241_v50 }
 0x314   : > { %6693 = vmatmul.mubr.bf16.vlgmr.msra.gmra.mrb[4].mxu0 %v11242_v43 }
 0x315   : > { %6696 = vmatprep.mubr.bf16.mxu0 %v11243_v25  ;;  %v11248_v25 = vld [vmem:[#allocation34_spill] sm:$0xff] }
 0x317   : > { %v6646_v57 = vpop.f32.mrb[116].mxu0 }
 0x318   : > { %v9471_v30 = vadd.f32 %v6646_v57, %v9278_v48  ;;  %v2427_v13 = vpop.f32.mrb[117].mxu0  ;;  %v11245_v48 = vld [vmem:[#allocation33_spill] sm:$0xff]  ;;  %v11249_v57 = vld [vmem:[#allocation36_spill] sm:$0xff] }
 0x319   : > { %v9474_v53 = vadd.f32 %v2427_v13, %v9270_v14  ;;  %v6647_v6 = vpop.f32.mrb[118].mxu0 }
 0x31a   : > { %v9477_v36 = vadd.f32 %v6647_v6, %v9281_v17  ;;  %v2430_v51 = vpop.f32.mrb[119].mxu0 }
 0x31b   : > { %v9480_v23 = vadd.f32 %v2430_v51, %v9273_v44  ;;  %v7331_v44 = vld [vmem:[#allocation8 + $0x108] sm:$0xff]   ;;  %v7333_v51 = vld [vmem:[#allocation8 + $0x110] sm:$0xff]  }
 0x31c   : > { %6697 = vmatmul.mubr.bf16.gmra.mrb[216].mxu0 %v11244_v4  ;;  %6250 = vmatprep.subr.bf16.mxu1 %v7331_v44 }
 0x31d   : > { %6700 = vmatprep.mubr.bf16.mxu0 %v11245_v48  ;;  %6251 = vmatpush3.bf16.msra.mxu1 %v7332_v18  ;;  %v11250_v48 = vld [vmem:[#allocation38_spill] sm:$0xff] }
 0x31e   : > { %6252 = vmatprep.subr.bf16.mxu1 %v7333_v51 }
 0x31f   : > { %v6650_v60 = vpop.f32.mrb[120].mxu0 }
 0x320   : > { %v9485_v24 = vadd.f32 %v6650_v60, %v9294_v37  ;;  %v2443_v14 = vpop.f32.mrb[121].mxu0  ;;  %v11251_v60 = vld [vmem:[#allocation41_spill] sm:$0xff] }
 0x321   : > { %v9488_v41 = vadd.f32 %v2443_v14, %v9286_v27  ;;  %v6651_v17 = vpop.f32.mrb[122].mxu0 }
 0x322   : > { %v9491_v34 = vadd.f32 %v6651_v17, %v9297_v47  ;;  %v2446_v59 = vpop.f32.mrb[123].mxu0 }
 0x323   : > { %v9494_v52 = vadd.f32 %v2446_v59, %v9289_v54 }
 0x324   : > { %6701 = vmatmul.mubr.bf16.gmra.mrb[220].mxu0 %v11246_v29  ;;  %v11256_v29 = vld [vmem:[#allocation55_spill] sm:$0xff] }
 0x325   : > { %6704 = vmatprep.mubr.bf16.mxu0 %v11247_v58  ;;  %v11257_v58 = vshll.u32 %v11240_v15, 16 }
 0x327   : > { %v6654_v37 = vpop.f32.mrb[124].mxu0 }
 0x328   : > { %v9499_v55 = vadd.f32 %v6654_v37, %v9312_v12  ;;  %v2459_v27 = vpop.f32.mrb[125].mxu0 }
 0x329   : > { %v9502_v32 = vadd.f32 %v2459_v27, %v9302_v7  ;;  %v6655_v47 = vpop.f32.mrb[126].mxu0 }
 0x32a   : > { %v9505_v50 = vadd.f32 %v6655_v47, %v9316_v35  ;;  %v2462_v54 = vpop.f32.mrb[127].mxu0 }
 0x32b   : > { %v9508_v43 = vadd.f32 %v2462_v54, %v9305_v10  ;;  %v7334_v10 = vld [vmem:[#allocation8 + $0xd0] sm:$0xff]   ;;  %v7335_v54 = vld [vmem:[#allocation8 + $0x118] sm:$0xff]  }
 0x32c   : > { %6705 = vmatmul.mubr.bf16.gmra.mrb[224].mxu0 %v11248_v25  ;;  %6253 = vmatpush3.bf16.msra.mxu1 %v7334_v10  ;;  %v7336_v25 = vld [vmem:[#allocation8 + $0xd8] sm:$0xff]  }
 0x32d   : > { %6708 = vmatprep.mubr.bf16.mxu0 %v11249_v57  ;;  %6254 = vmatprep.subr.bf16.mxu1 %v7335_v54 }
 0x32f   : > { %v6658_v13 = vpop.f32.mrb[128].mxu0 }
 0x330   : > { %v9513_v12 = vadd.f32 %v6658_v13, %v9336_v5  ;;  %v2475_v62 = vpop.f32.mrb[129].mxu0  ;;  %v7328_v13 = vld [vmem:[%s8186_s24 + $0xb4] ss:$0 sps:$4 sm:$0xff]   ;;  %6255 = vmatpush3.bf16.msra.mxu1 %v7336_v25 }
 0x331   : > { %v9516_v7 = vadd.f32 %v2475_v62, %v9324_v22  ;;  %v6659_v6 = vpop.f32.mrb[130].mxu0  ;;  %v1342_v51 = vshll.u32 %v7328_v13, 16  ;;  %v5921_v13 = vcombine.low %v9339_v31, %v9339_v31  ;;  %v7343_v31 = vld [vmem:[#allocation8 + $0x138] sm:$0xff]  }
 0x332   : > { %v9519_v35 = vadd.f32 %v6659_v6, %v9350_v39  ;;  %v2478_v61 = vpop.f32.mrb[131].mxu0 }
 0x333   : > { %v9522_v4 = vadd.f32 %v2478_v61, %v9328_v21 }
 0x334   : > { %6709 = vmatmul.mubr.bf16.gmra.mrb[228].mxu0 %v11250_v48 }
 0x335   : > { %6712 = vmatprep.mubr.bf16.mxu0 %v11251_v60 }
 0x337   : > { %v6662_v5 = vpop.f32.mrb[132].mxu0 }
 0x338   : > { %v9527_v22 = vadd.f32 %v6662_v5, %v9392_v33  ;;  %v2491_v14 = vpop.f32.mrb[133].mxu0  ;;  %v1322_v33 = vrot.slane %v11257_v58, 1 }
 0x339   : > { %v9530_v39 = vadd.f32 %v2491_v14, %v9375_v46  ;;  %v6663_v17 = vpop.f32.mrb[134].mxu0  ;;  %v7337_v14 = vld [vmem:[#allocation8 + $0x120] sm:$0xff]  }
 0x33a   : > { %11252 = vst [vmem:[#allocation32_spill] sm:$0xff] %v9527_v22  ;;  %v9533_v59 = vadd.f32 %v6663_v17, %v9396_v40  ;;  %v2494_v21 = vpop.f32.mrb[135].mxu0  ;;  %v7338_v17 = vld [vmem:[#allocation8 + $0xe0] sm:$0xff]   ;;  %6256 = vmatprep.subr.bf16.mxu1 %v7337_v14 }
 0x33b   : > { %11253 = vst [vmem:[#allocation48_spill] sm:$0xff] %v9530_v39  ;;  %v9536_v44 = vadd.f32 %v2494_v21, %v9380_v2  ;;  %6257 = vmatpush3.bf16.msra.mxu1 %v7338_v17 }
 0x33c   : > { %11254 = vst [vmem:[#allocation47_spill] sm:$0xff] %v9533_v59  ;;  %6713 = vmatmul.mubr.bf16.gmra.mrb[232].mxu0 %v11256_v29 }
 0x33d   : > { %11255 = vst [vmem:[#allocation35_spill] sm:$0xff] %v9536_v44  ;;  %6716 = vmatprep.mubr.bf16.mxu0 %v9241_v20  ;;  %v1323_v20 = vsel %vm785_vm1, %v9255_v63, %v1322_v33 }
 0x33f   : > { %v6666_v37 = vpop.f32.mrb[136].mxu0 }
 0x340   : > { %v9543_v46 = vadd.f32 %v6666_v37, %v9416_v42  ;;  %v2507_v18 = vpop.f32.mrb[137].mxu0  ;;  %v7340_v37 = vld [vmem:[#allocation8 + $0xe8] sm:$0xff]  }
 0x341   : > { %v9546_v40 = vadd.f32 %v2507_v18, %v9405_v8  ;;  %v6667_v27 = vpop.f32.mrb[138].mxu0  ;;  %v11262_v8 = vshrl.u32 %v11240_v15, 16 }
 0x342   : > { %11258 = vst [vmem:[#allocation37_spill] sm:$0xff] %v9543_v46  ;;  %v9549_v2 = vadd.f32 %v6667_v27, %v9424_v0  ;;  %v2510_v47 = vpop.f32.mrb[139].mxu0 }
 0x343   : > { %11259 = vst [vmem:[#allocation43_spill] sm:$0xff] %v9546_v40  ;;  %v9554_v57 = vadd.f32 %v2510_v47, %v9409_v1  ;;  %v1324_v42 = vor.u32 %v1322_v33, %v11262_v8  ;;  %v7339_v33 = vld [vmem:[#allocation8 + $0x128] sm:$0xff]  }
 0x344   : > { %11260 = vst [vmem:[#allocation40_spill] sm:$0xff] %v9549_v2  ;;  %6717 = vmatmul.mubr.bf16.gmra.mrb[236].mxu0 %v9246_v26  ;;  %v1338_v26 = vshrl.u32 %v9361_v49, 16  ;;  %6258 = vmatprep.subr.bf16.mxu1 %v7339_v33 }
 0x345   : > { %11261 = vst [vmem:[#allocation56_spill] sm:$0xff] %v9554_v57  ;;  %6720 = vmatprep.mubr.bf16.mxu0 %v1323_v20  ;;  %v1329_v1 = vsel %vm785_vm1, %v1324_v42, %v9368_v11  ;;  %6259 = vmatpush3.bf16.msra.mxu1 %v7340_v37  ;;  %v7341_v20 = vld [vmem:[#allocation8 + $0x130] sm:$0xff]  }
 0x346   : > { %6260 = vmatprep.subr.bf16.mxu1 %v7341_v20  ;;  %v9612_v20 = vld [vmem:[#allocation8 + $0x140] sm:$0xff]  }
 0x347   : > { %v6670_v0 = vpop.f32.mrb[140].mxu0 }
 0x348   : > { %v9561_v62 = vadd.f32 %v6670_v0, %v9447_v28  ;;  %v2523_v6 = vpop.f32.mrb[141].mxu0  ;;  %v1344_v28 = vrot.slane %v1342_v51, 1  ;;  %v1053_v0 = vshrl.u32 %v5921_v13, 16 }
 0x349   : > { %v9564_v63 = vadd.f32 %v2523_v6, %v9432_v19  ;;  %v6671_v61 = vpop.f32.mrb[142].mxu0  ;;  %v1340_v19 = vor.u32 %v1338_v26, %v9372_v56  ;;  %v1056_v6 = vshll.u32 %v5921_v13, 16 }
 0x34a   : > { %11263 = vst [vmem:[#allocation49_spill] sm:$0xff] %v9561_v62  ;;  %v9570_v15 = vadd.f32 %v6671_v61, %v9454_v45  ;;  %v2526_v10 = vpop.f32.mrb[143].mxu0  ;;  %v1055_v26 = vrot.slane %v1053_v0, 3  ;;  %v9621_v0 = vpop.permute.xlu1 %3326 }
 0x34b   : > { %11264 = vst [vmem:[#allocation42_spill] sm:$0xff] %v9564_v63  ;;  %v9573_v48 = vadd.f32 %v2526_v10, %v9443_v16  ;;  %v1345_v45 = vsel %vm785_vm1, %v1340_v19, %v1344_v28  ;;  %v1058_v51 = vrot.slane %v1056_v6, 4 }
 0x34c   : > { %11265 = vst [vmem:[#allocation39_spill] sm:$0xff] %v9570_v15  ;;  %6721 = vmatmul.mubr.bf16.gmra.mrb[240].mxu0 %v1329_v1 }
 0x34d   : > { %11266 = vst [vmem:[#allocation52_spill] sm:$0xff] %v9573_v48  ;;  %6724 = vmatprep.mubr.bf16.mxu0 %v9384_v38  ;;  %v1059_v28 = vor.u32 %v1058_v51, %v1055_v26 }
 0x34e   : > { %v9627_v51 = vpop.permute.xlu1 %3331 }
 0x34f   : > { %v6674_v60 = vpop.f32.mrb[144].mxu0 }
 0x350   : > { %v2539_v5 = vpop.f32.mrb[145].mxu0  ;;  %v11269_v60 = vld [vmem:[#allocation46_spill] sm:$0xff] }
 0x351   : > { %v9578_v11 = vadd.f32 %v2539_v5, %v9459_v9  ;;  %v6675_v49 = vpop.f32.mrb[146].mxu0  ;;  %v1060_v5 = vsel %vm521_vm0, %v11269_v60, %v1059_v28 }
 0x352   : > { %v2542_v21 = vpop.f32.mrb[147].mxu0  ;;  %1883 = vmatmul.mubr.bf16.gmra.mrb[52].mxu1 %v1060_v5 }
 0x353   : > { %11267 = vst [vmem:[#allocation54_spill] sm:$0xff] %v9578_v11  ;;  %v9582_v16 = vadd.f32 %v2542_v21, %v9463_v3  ;;  %v7342_v3 = vld [vmem:[#allocation8 + $0xf0] sm:$0xff]   ;;  %v7344_v21 = vld [vmem:[#allocation8 + $0xf8] sm:$0xff]  }
 0x354   : > { %6725 = vmatmul.mubr.bf16.gmra.mrb[244].mxu0 %v1345_v45  ;;  %6261 = vmatpush3.bf16.msra.mxu1 %v7342_v3 }
 0x355   : > { %11268 = vst [vmem:[#allocation51_spill] sm:$0xff] %v9582_v16  ;;  %6262 = vmatprep.subr.bf16.mxu1 %v7343_v31 }
 0x357   : > { %v2832_v38 = vpop.f32.mrb[148].mxu0 }
 0x358   : > { %v2833_v56 = vpop.f32.mrb[149].mxu0  ;;  %6263 = vmatpush3.bf16.msra.mxu1 %v7344_v21 }
 0x359   : > { %v2834_v29 = vpop.f32.mrb[150].mxu0  ;;  %6728 = vmatprep.subr.bf16.mxu1 %v9612_v20 }
 0x35a   : > { %v2835_v58 = vpop.f32.mrb[151].mxu0 }
 0x367   : > { %v9584_v9 = vpop.f32.mrb[152].mxu0 }
 0x368   : > { %v2848_v18 = vpop.f32.mrb[153].mxu0 }
 0x369   : > { %v9586_v27 = vpop.f32.mrb[154].mxu0 }
 0x36a   : > { %v2851_v47 = vpop.f32.mrb[155].mxu0 }
 0x36f   : > { %v9588_v54 = vpop.f32.mrb[156].mxu0 }
 0x370   : > { %v2856_v25 = vpop.f32.mrb[157].mxu0 }
 0x371   : > { %v9590_v8 = vpop.f32.mrb[158].mxu0 }
 0x372   : > { %v2859_v42 = vpop.f32.mrb[159].mxu0 }
 0x373   : > { %v9617_v42 = vpop.permute.xlu0 %3336 }
 0x377   : > { %v9594_v61 = vpop.f32.mrb[160].mxu0 }
 0x378   : > { %v2864_v1 = vpop.f32.mrb[161].mxu0 }
 0x379   : > { %v9596_v10 = vpop.f32.mrb[162].mxu0  ;;  %v9623_v1 = vpop.permute.xlu0 %3341 }
 0x37a   : > { %v2867_v19 = vpop.f32.mrb[163].mxu0 }
 0x37d   : > { %v9631_v5 = vpop.permute.xlu0 %3346 }
 0x37f   : > { %v9600_v14 = vpop.f32.mrb[164].mxu0 }
 0x380   : > { %v2872_v49 = vpop.f32.mrb[165].mxu0 }
 0x381   : > { %v9602_v45 = vpop.f32.mrb[166].mxu0  ;;  %v9633_v49 = vpop.permute.xlu1 %3351 }
 0x382   : > { %v2875_v17 = vpop.f32.mrb[167].mxu0 }
 0x387   : > { %v9604_v38 = vpop.f32.mrb[168].mxu0 }
 0x388   : > { %v2880_v56 = vpop.f32.mrb[169].mxu0 }
 0x389   : > { %v9606_v29 = vpop.f32.mrb[170].mxu0 }
 0x38a   : > { %v2883_v58 = vpop.f32.mrb[171].mxu0 }
 0x38b   : > { %v9639_v58 = vpop.permute.xlu0 %3356 }
 0x38f   : > { %v9608_v33 = vpop.f32.mrb[172].mxu0 }
 0x390   : > { %v2888_v37 = vpop.f32.mrb[173].mxu0 }
 0x391   : > { %v9610_v18 = vpop.f32.mrb[174].mxu0  ;;  %v9641_v37 = vpop.permute.xlu1 %3361 }
 0x392   : > { %v2891_v47 = vpop.f32.mrb[175].mxu0 }
 0x397   : > { %v9615_v3 = vpop.f32.mrb[176].mxu0 }
 0x398   : > { %v2896_v25 = vpop.f32.mrb[177].mxu0 }
 0x399   : > { %v9619_v13 = vpop.f32.mrb[178].mxu0 }
 0x39a   : > { %v2899_v6 = vpop.f32.mrb[179].mxu0 }
 0x39b   : > { %v9645_v6 = vpop.permute.xlu0 %3366 }
 0x39f   : > { %v9625_v26 = vpop.f32.mrb[180].mxu0  ;;  %v9651_v11 = vpop.permute.xlu0 %3376 }
 0x3a0   : > { %v2904_v19 = vpop.f32.mrb[181].mxu0  ;;  %11273 = vst [vmem:[#allocation44_spill] sm:$0xff] %v9651_v11 }
 0x3a1   : > { %v9629_v28 = vpop.f32.mrb[182].mxu0 }
 0x3a2   : > { %v2907_v60 = vpop.f32.mrb[183].mxu0 }
 0x3a3   : > { %v9649_v60 = vpop.permute.xlu1 %3371  ;;  %v9659_v62 = vpop.permute.xlu0 %3386 }
 0x3a4   : > { %11277 = vst [vmem:[#allocation33_spill] sm:$0xff] %v9659_v62 }
 0x3a7   : > { %v9635_v31 = vpop.f32.mrb[184].mxu0  ;;  %v9655_v48 = vpop.permute.xlu1 %3381 }
 0x3a8   : > { %11270 = vst [vmem:[#allocation50_spill] sm:$0xff] %v9635_v31  ;;  %v2912_v17 = vpop.f32.mrb[185].mxu0  ;;  %11275 = vst [vmem:[#allocation28_spill] sm:$0xff] %v9655_v48  ;;  %v9667_v46 = vpop.permute.xlu0 %3396 }
 0x3a9   : > { %v9637_v21 = vpop.f32.mrb[186].mxu0  ;;  %11281 = vst [vmem:[#allocation36_spill] sm:$0xff] %v9667_v46 }
 0x3aa   : > { %11271 = vst [vmem:[#allocation53_spill] sm:$0xff] %v9637_v21  ;;  %v2915_v56 = vpop.f32.mrb[187].mxu0  ;;  %v9703_v21 = vld [vmem:[#allocation9] ss:$0 sm:$0xff] }
 0x3ac   : > { %v9673_v59 = vpop.permute.xlu0 %3406 }
 0x3ad   : > { %11284 = vst [vmem:[#allocation55_spill] sm:$0xff] %v9673_v59 }
 0x3af   : > { %v9643_v47 = vpop.f32.mrb[188].mxu0 }
 0x3b0   : > { %v2920_v25 = vpop.f32.mrb[189].mxu0  ;;  %v9679_v62 = vpop.permute.xlu0 %3416 }
 0x3b1   : > { %v9647_v19 = vpop.f32.mrb[190].mxu0  ;;  %v9661_v25 = vpop.permute.xlu1 %3391  ;;  %11287 = vst [vmem:[#allocation58_spill] sm:$0xff] %v9679_v62 }
 0x3b2   : > { %11272 = vst [vmem:[#allocation45_spill] sm:$0xff] %v9647_v19  ;;  %v2923_v16 = vpop.f32.mrb[191].mxu0  ;;  %11278 = vst [vmem:[#allocation29_spill] sm:$0xff] %v9661_v25 }
 0x3b4   : > { %v9687_v46 = vpop.permute.xlu0 %3426 }
 0x3b5   : > { %v9669_v44 = vpop.permute.xlu1 %3401  ;;  %11291 = vst [vmem:[#allocation62_spill] sm:$0xff] %v9687_v46 }
 0x3b6   : > { %11282 = vst [vmem:[#allocation38_spill] sm:$0xff] %v9669_v44 }
 0x3b7   : > { %v9653_v17 = vpop.f32.mrb[192].mxu0 }
 0x3b8   : > { %11274 = vst [vmem:[#allocation27_spill] sm:$0xff] %v9653_v17  ;;  %v2928_v56 = vpop.f32.mrb[193].mxu0 }
 0x3b9   : > { %v9657_v15 = vpop.f32.mrb[194].mxu0 }
 0x3ba   : > { %11276 = vst [vmem:[#allocation31_spill] sm:$0xff] %v9657_v15  ;;  %v2931_v63 = vpop.f32.mrb[195].mxu0  ;;  %v9677_v15 = vpop.permute.xlu1 %3411 }
 0x3bb   : > { %11286 = vst [vmem:[#allocation57_spill] sm:$0xff] %v9677_v15  ;;  %v9695_v15 = vpop.permute.xlu0 %3436 }
 0x3bc   : > { %11295 = vst [vmem:[#allocation66_spill] sm:$0xff] %v9695_v15 }
 0x3bf   : > { %v9663_v57 = vpop.f32.mrb[196].mxu0 }
 0x3c0   : > { %11279 = vst [vmem:[#allocation30_spill] sm:$0xff] %v9663_v57  ;;  %v2936_v2 = vpop.f32.mrb[197].mxu0 }
 0x3c1   : > { %v9665_v40 = vpop.f32.mrb[198].mxu0 }
 0x3c2   : > { %11280 = vst [vmem:[#allocation34_spill] sm:$0xff] %v9665_v40  ;;  %v2939_v16 = vpop.f32.mrb[199].mxu0  ;;  %v9683_v40 = vpop.permute.xlu1 %3421 }
 0x3c3   : > { %11289 = vst [vmem:[#allocation60_spill] sm:$0xff] %v9683_v40 }
 0x3c7   : > { %v9671_v17 = vpop.f32.mrb[200].mxu0 }
 0x3c8   : > { %11283 = vst [vmem:[#allocation41_spill] sm:$0xff] %v9671_v17  ;;  %v2944_v56 = vpop.f32.mrb[201].mxu0 }
 0x3c9   : > { %v9675_v63 = vpop.f32.mrb[202].mxu0  ;;  %v9689_v56 = vpop.permute.xlu1 %3431 }
 0x3ca   : > { %11285 = vst [vmem:[#allocation46_spill] sm:$0xff] %v9675_v63  ;;  %v2947_v25 = vpop.f32.mrb[203].mxu0  ;;  %11292 = vst [vmem:[#allocation63_spill] sm:$0xff] %v9689_v56 }
 0x3cd   : > { %v9697_v62 = vpop.permute.xlu1 %3441 }
 0x3ce   : > { %11296 = vst [vmem:[#allocation67_spill] sm:$0xff] %v9697_v62 }
 0x3cf   : > { %v9681_v2 = vpop.f32.mrb[204].mxu0 }
 0x3d0   : > { %11288 = vst [vmem:[#allocation59_spill] sm:$0xff] %v9681_v2  ;;  %v2952_v16 = vpop.f32.mrb[205].mxu0 }
 0x3d1   : > { %v9685_v57 = vpop.f32.mrb[206].mxu0  ;;  %v9699_v16 = vpop.permute.xlu0 %3446 }
 0x3d2   : > { %11290 = vst [vmem:[#allocation61_spill] sm:$0xff] %v9685_v57  ;;  %v2955_v44 = vpop.f32.mrb[207].mxu0  ;;  %11297 = vst [vmem:[#allocation68_spill] sm:$0xff] %v9699_v16 }
 0x3d3   : > { %v9701_v44 = vpop.permute.xlu1 %3451 }
 0x3d4   : > { %11298 = vst [vmem:[#allocation69_spill] sm:$0xff] %v9701_v44 }
 0x3d5   : > { %v9705_v56 = vpop.permute.xlu0 %3456 }
 0x3d6   : > { %11299 = vst [vmem:[#allocation70_spill] sm:$0xff] %v9705_v56 }
 0x3d7   : > { %v9691_v17 = vpop.f32.mrb[208].mxu0 }
 0x3d8   : > { %11293 = vst [vmem:[#allocation64_spill] sm:$0xff] %v9691_v17  ;;  %v2960_v63 = vpop.f32.mrb[209].mxu0  ;;  %v9707_v17 = vld [vmem:[#allocation9 + $0x1] ss:$0 sm:$0xff] }
 0x3d9   : > { %v9693_v59 = vpop.f32.mrb[210].mxu0  ;;  %v3317_v15 = vpop.permute.xlu0 %3316 }
 0x3da   : > { %11294 = vst [vmem:[#allocation65_spill] sm:$0xff] %v9693_v59  ;;  %v2963_v25 = vpop.f32.mrb[211].mxu0 }
 0x3db   : > { %v9709_v25 = vpop.permute.xlu1 %3461 }
 0x3dc   : > { %11300 = vst [vmem:[#allocation71_spill] sm:$0xff] %v9709_v25 }
 0x3df   : > { %v2966_v2 = vpop.f32.mrb[212].mxu0  ;;  %v3322_v19 = vpop.permute.xlu1 %3321 }
 0x3e0   : > { %v2967_v40 = vpop.f32.mrb[213].mxu0 }
 0x3e1   : > { %v2968_v57 = vpop.f32.mrb[214].mxu0 }
 0x3e2   : > { %v2969_v46 = vpop.f32.mrb[215].mxu0 }
 0x3e7   : > { %v6694_v63 = vpop.f32.mrb[4].mxu0 }
 0x3e8   : > { %v3181_v59 = vmul.f32 %v6694_v63, %v9703_v21  ;;  %v3005_v62 = vpop.f32.mrb[5].mxu0 }
 0x3e9   : > { %v6695_v2 = vpop.f32.mrb[6].mxu0 }
 0x3ea   : > { %v3218_v40 = vadd.f32 %v9707_v17, %v3181_v59  ;;  %v3182_v57 = vmul.f32 %v6695_v2, %v9703_v21  ;;  %v3007_v16 = vpop.f32.mrb[7].mxu0 }
 0x3ec   : > { %v3219_v46 = vadd.f32 %v9707_v17, %v3182_v57  ;;  %v3250_v44 = vmax.f32 %v3218_v40, 0.0 }
 0x3ee   : > { %v3251_v56 = vmax.f32 %v3219_v46, 0.0  ;;  %v3474_v11 = vmul.f32 %v3317_v15, %v3250_v44 }
 0x3ef   : > { %v6698_v39 = vpop.f32.mrb[216].mxu0 }
 0x3f0   : > { %v3475_v22 = vmul.f32 %v3322_v19, %v3251_v56  ;;  %v3028_v25 = vadd.f32 %v6698_v39, %v9588_v54  ;;  %v3019_v31 = vpop.f32.mrb[217].mxu0 }
 0x3f1   : > { %v3020_v62 = vadd.f32 %v3019_v31, %v9584_v9  ;;  %v6699_v63 = vpop.f32.mrb[218].mxu0 }
 0x3f2   : > { %v9717_v48 = vpack.c.bf16 %v3475_v22, %v3474_v11  ;;  %v3148_v59 = vadd.f32 %v3028_v25, %v9471_v30  ;;  %v3031_v16 = vadd.f32 %v6699_v63, %v9590_v8  ;;  %v3022_v2 = vpop.f32.mrb[219].mxu0 }
 0x3f3   : > { %v3146_v40 = vadd.f32 %v3020_v62, %v9474_v53  ;;  %v3023_v57 = vadd.f32 %v3022_v2, %v9586_v27 }
 0x3f4   : > { %v10977_v15 = vshrl.u32 %v9717_v48, 16  ;;  %v10976_v19 = vshll.u32 %v9717_v48, 16  ;;  %v3185_v39 = vmul.f32 %v9703_v21, %v3148_v59  ;;  %v3149_v9 = vadd.f32 %v3031_v16, %v9477_v36  ;;  %v11344_v16 = vld [vmem:[#allocation71_spill] sm:$0xff] }
 0x3f5   : > { %v3183_v22 = vmul.f32 %v9703_v21, %v3146_v40  ;;  %v3147_v11 = vadd.f32 %v3023_v57, %v9480_v23 }
 0x3f6   : > { %v3222_v30 = vadd.f32 %v9707_v17, %v3185_v39  ;;  %v3186_v54 = vmul.f32 %v9703_v21, %v3149_v9  ;;  %v9735_v31 = vrot.slane %v10977_v15, 4  ;;  %v9739_v36 = vrot.slane %v10976_v19, 5  ;;  %v11347_v19 = vld [vmem:[#allocation51_spill] sm:$0xff] }
 0x3f7   : > { %v3220_v53 = vadd.f32 %v9707_v17, %v3183_v22  ;;  %v3184_v27 = vmul.f32 %v9703_v21, %v3147_v11  ;;  %v6702_v8 = vpop.f32.mrb[220].mxu0 }
 0x3f8   : > { %v3254_v56 = vmax.f32 %v3222_v30, 0.0  ;;  %v3223_v23 = vadd.f32 %v9707_v17, %v3186_v54  ;;  %v3044_v44 = vadd.f32 %v6702_v8, %v9600_v14  ;;  %v3035_v25 = vpop.f32.mrb[221].mxu0 }
 0x3f9   : > { %v3252_v46 = vmax.f32 %v3220_v53, 0.0  ;;  %v3221_v62 = vadd.f32 %v9707_v17, %v3184_v27  ;;  %v3036_v63 = vadd.f32 %v3035_v25, %v9594_v61  ;;  %v6703_v59 = vpop.f32.mrb[222].mxu0 }
 0x3fa   : > { %v3255_v2 = vmax.f32 %v3223_v23, 0.0  ;;  %v3152_v40 = vadd.f32 %v3044_v44, %v9485_v24  ;;  %v3047_v57 = vadd.f32 %v6703_v59, %v9602_v45  ;;  %v3038_v39 = vpop.f32.mrb[223].mxu0  ;;  %v3478_v11 = vmul.f32 %v9617_v42, %v3254_v56 }
 0x3fb   : > { %v3253_v9 = vmax.f32 %v3221_v62, 0.0  ;;  %v3150_v22 = vadd.f32 %v3036_v63, %v9488_v41  ;;  %v3039_v14 = vadd.f32 %v3038_v39, %v9596_v10  ;;  %v3476_v53 = vmul.f32 %v9621_v0, %v3252_v46 }
 0x3fc   : > { %v3479_v30 = vmul.f32 %v9623_v1, %v3255_v2  ;;  %v3189_v61 = vmul.f32 %v9703_v21, %v3152_v40  ;;  %v3153_v54 = vadd.f32 %v3047_v57, %v9491_v34 }
 0x3fd   : > { %v3477_v24 = vmul.f32 %v9627_v51, %v3253_v9  ;;  %v3187_v45 = vmul.f32 %v9703_v21, %v3150_v22  ;;  %v3151_v27 = vadd.f32 %v3039_v14, %v9494_v52 }
 0x3fe   : > { %v3226_v41 = vadd.f32 %v9707_v17, %v3189_v61  ;;  %v3190_v10 = vmul.f32 %v9703_v21, %v3153_v54  ;;  %v9761_v8 = vpack.c.bf16 %v3479_v30, %v3478_v11 }
 0x3ff   : > { %v9763_v42 = vpack.c.bf16 %v3477_v24, %v3476_v53  ;;  %v3224_v1 = vadd.f32 %v9707_v17, %v3187_v45  ;;  %v3188_v34 = vmul.f32 %v9703_v21, %v3151_v27  ;;  %v6706_v56 = vpop.f32.mrb[224].mxu0 }
 0x400   : > { %v3258_v0 = vmax.f32 %v3226_v41, 0.0  ;;  %v3227_v51 = vadd.f32 %v9707_v17, %v3190_v10  ;;  %v3060_v23 = vadd.f32 %v6706_v56, %v9608_v33  ;;  %v3051_v52 = vpop.f32.mrb[225].mxu0  ;;  %v9770_v44 = vshrl.u32 %v9761_v8, 16  ;;  %4373 = vmatprep.mubr.bf16.mxu1 %v9761_v8 }
 0x401   : > { %v3256_v25 = vmax.f32 %v3224_v1, 0.0  ;;  %v3225_v46 = vadd.f32 %v9707_v17, %v3188_v34  ;;  %v3052_v62 = vadd.f32 %v3051_v52, %v9604_v38  ;;  %v9776_v63 = vshll.u32 %v9761_v8, 16  ;;  %v6707_v59 = vpop.f32.mrb[226].mxu0  ;;  %v7347_v1 = vld [vmem:[#allocation8 + $0x148] sm:$0xff]  }
 0x402   : > { %v3482_v2 = vmul.f32 %v9639_v58, %v3258_v0  ;;  %v3259_v40 = vmax.f32 %v3227_v51, 0.0  ;;  %v3156_v33 = vadd.f32 %v3060_v23, %v9499_v55  ;;  %v3063_v57 = vadd.f32 %v6707_v59, %v9610_v18  ;;  %v3054_v39 = vpop.f32.mrb[227].mxu0 }
 0x403   : > { %v3480_v9 = vmul.f32 %v9631_v5, %v3256_v25  ;;  %v3257_v22 = vmax.f32 %v3225_v46, 0.0  ;;  %v3154_v14 = vadd.f32 %v3052_v62, %v9502_v32  ;;  %v3055_v11 = vadd.f32 %v3054_v39, %v9606_v29  ;;  %v7348_v39 = vld [vmem:[#allocation8 + $0x150] sm:$0xff]  }
 0x404   : > { %v3483_v38 = vmul.f32 %v9641_v37, %v3259_v40  ;;  %v3193_v30 = vmul.f32 %v9703_v21, %v3156_v33  ;;  %v3157_v61 = vadd.f32 %v3063_v57, %v9505_v50  ;;  %v9788_v58 = vshrl.u32 %v9763_v42, 16 }
 0x405   : > { %v3481_v55 = vmul.f32 %v9633_v49, %v3257_v22  ;;  %v3191_v18 = vmul.f32 %v9703_v21, %v3154_v14  ;;  %v3155_v5 = vadd.f32 %v3055_v11, %v9508_v43  ;;  %v3803_v54 = vrot.slane %v9770_v44, 7 }
 0x406   : > { %v9795_v32 = vadd.f32 %v9707_v17, %v3193_v30  ;;  %v3194_v29 = vmul.f32 %v9703_v21, %v3157_v61  ;;  %v3802_v37 = vrot.slane %v9788_v58, 7  ;;  %v9799_v53 = vpack.c.bf16 %v3483_v38, %v3482_v2 }
 0x407   : > { %v3228_v50 = vadd.f32 %v9707_v17, %v3191_v18  ;;  %v3192_v24 = vmul.f32 %v9703_v21, %v3155_v5  ;;  %v6710_v49 = vpop.f32.mrb[228].mxu0  ;;  %v3804_v45 = vor.u32 %v3803_v54, %v9776_v63  ;;  %v9804_v27 = vpack.c.bf16 %v3481_v55, %v3480_v9 }
 0x408   : > { %v3231_v43 = vadd.f32 %v9707_v17, %v3194_v29  ;;  %v3076_v41 = vadd.f32 %v6710_v49, %v9625_v26  ;;  %v3067_v10 = vpop.f32.mrb[229].mxu0  ;;  %v3262_v52 = vmax.f32 %v9795_v32, 0.0  ;;  %v9815_v26 = vshrl.u32 %v9799_v53, 16  ;;  %v11303_v29 = vld [vmem:[#allocation28_spill] sm:$0xff] }
 0x409   : > { %v3260_v34 = vmax.f32 %v3228_v50, 0.0  ;;  %v3229_v56 = vadd.f32 %v9707_v17, %v3192_v24  ;;  %v3805_v0 = vsel %vm3801_vm2, %v3802_v37, %v3804_v45  ;;  %v3068_v51 = vadd.f32 %v3067_v10, %v9615_v3  ;;  %v6711_v23 = vpop.f32.mrb[230].mxu0  ;;  %v11304_v24 = vld [vmem:[#allocation50_spill] sm:$0xff] }
 0x40a   : > { %v3160_v25 = vadd.f32 %v3076_v41, %v9513_v12  ;;  %4374 = vmatmul.mubr.bf16.vlgmr.msra.gmra.mrb[56].mxu1 %v3805_v0  ;;  %v3079_v46 = vadd.f32 %v6711_v23, %v9629_v28  ;;  %v3070_v62 = vpop.f32.mrb[231].mxu0  ;;  %11301 = vst [vmem:[#allocation72_spill] sm:$0xff] %v9815_v26  ;;  %v3263_v59 = vmax.f32 %v3231_v43, 0.0  ;;  %v9819_v33 = vshrl.u32 %v9804_v27, 16  ;;  %v7349_v41 = vld [vmem:[#allocation8 + $0x158] sm:$0xff]  }
 0x40b   : > { %v3261_v2 = vmax.f32 %v3229_v56, 0.0  ;;  %v3158_v40 = vadd.f32 %v3068_v51, %v9516_v7  ;;  %4381 = vmatprep.mubr.bf16.mxu1 %v9804_v27  ;;  %6729 = vmatpush3.bf16.msra.mxu1 %v9612_v20  ;;  %v3484_v12 = vmul.f32 %v9645_v6, %v3260_v34  ;;  %v3071_v57 = vadd.f32 %v3070_v62, %v9619_v13  ;;  %v11305_v34 = vld [vmem:[#allocation32_spill] sm:$0xff]  ;;  %v11308_v62 = vld [vmem:[#allocation45_spill] sm:$0xff] }
 0x40c   : > { %11302 = vst [vmem:[#allocation73_spill] sm:$0xff] %v9819_v33  ;;  %v3197_v3 = vmul.f32 %v9703_v21, %v3160_v25  ;;  %v3161_v28 = vadd.f32 %v3079_v46, %v9519_v35  ;;  %6730 = vmatprep.subr.bf16.mxu1 %v7347_v1  ;;  %v9830_v22 = vshll.u32 %v9804_v27, 16  ;;  %v3806_v14 = vrot.slane %v9819_v33, 7  ;;  %v11306_v51 = vld [vmem:[#allocation44_spill] sm:$0xff] }
 0x40d   : > { %v3485_v9 = vmul.f32 %v9649_v60, %v3261_v2  ;;  %v3195_v7 = vmul.f32 %v9703_v21, %v3158_v40  ;;  %v3159_v11 = vadd.f32 %v3071_v57, %v9522_v4  ;;  %v9837_v35 = vshll.u32 %v9799_v53, 16  ;;  %v11307_v25 = vld [vmem:[#allocation48_spill] sm:$0xff]  ;;  %v11312_v57 = vld [vmem:[#allocation38_spill] sm:$0xff] }
 0x40e   : > { %v3234_v20 = vadd.f32 %v9707_v17, %v3197_v3  ;;  %v3198_v6 = vmul.f32 %v9703_v21, %v3161_v28  ;;  %v3807_v60 = vor.u32 %v3806_v14, %v9830_v22  ;;  %v3809_v30 = vrot.slane %v9815_v26, 7  ;;  %v11310_v40 = vld [vmem:[#allocation36_spill] sm:$0xff]  ;;  %v11311_v3 = vld [vmem:[#allocation33_spill] sm:$0xff] }
 0x40f   : > { %v3232_v13 = vadd.f32 %v9707_v17, %v3195_v7  ;;  %v6714_v38 = vpop.f32.mrb[232].mxu0  ;;  %6731 = vmatpush3.bf16.msra.mxu1 %v7347_v1  ;;  %v9842_v61 = vpack.c.bf16 %v3485_v9, %v3484_v12  ;;  %v3196_v5 = vmul.f32 %v9703_v21, %v3159_v11  ;;  %v3487_v37 = vmul.f32 %v11303_v29, %v3263_v59  ;;  %v11314_v11 = vld [vmem:[#allocation35_spill] sm:$0xff] }
 0x410   : > { %v3266_v55 = vmax.f32 %v3234_v20, 0.0  ;;  %v3235_v18 = vadd.f32 %v9707_v17, %v3198_v6  ;;  %v3092_v4 = vadd.f32 %v6714_v38, %v9643_v47  ;;  %v3083_v32 = vpop.f32.mrb[233].mxu0  ;;  %6732 = vmatprep.subr.bf16.mxu1 %v7348_v39  ;;  %v3808_v45 = vsel %vm3801_vm2, %v3803_v54, %v3807_v60  ;;  %v11309_v54 = vld [vmem:[#allocation53_spill] sm:$0xff]  ;;  %v7350_v60 = vld [vmem:[#allocation8 + $0x160] sm:$0xff]  }
 0x411   : > { %v3264_v50 = vmax.f32 %v3232_v13, 0.0  ;;  %v3084_v49 = vadd.f32 %v3083_v32, %v11304_v24  ;;  %v6715_v43 = vpop.f32.mrb[234].mxu0  ;;  %v3233_v1 = vadd.f32 %v9707_v17, %v3196_v5  ;;  %v3810_v47 = vor.u32 %v3809_v30, %v9837_v35 }
 0x412   : > { %v3267_v10 = vmax.f32 %v3235_v18, 0.0  ;;  %v3164_v56 = vadd.f32 %v3092_v4, %v11305_v34  ;;  %4382 = vmatmul.mubr.bf16.gmra.mrb[60].mxu1 %v3808_v45  ;;  %v3086_v0 = vpop.f32.mrb[235].mxu0  ;;  %v3486_v23 = vmul.f32 %v11306_v51, %v3262_v52  ;;  %v3095_v59 = vadd.f32 %v6715_v43, %v11308_v62  ;;  %v11313_v52 = vld [vmem:[#allocation47_spill] sm:$0xff]  ;;  %v11315_v45 = vld [vmem:[#allocation30_spill] sm:$0xff]  ;;  %v11318_v62 = vld [vmem:[#allocation37_spill] sm:$0xff] }
 0x413   : > { %v3162_v46 = vadd.f32 %v3084_v49, %v11307_v25  ;;  %4389 = vmatprep.mubr.bf16.mxu1 %v9799_v53  ;;  %v3087_v2 = vadd.f32 %v3086_v0, %v11309_v54  ;;  %v3490_v12 = vmul.f32 %v11310_v40, %v3266_v55  ;;  %v3488_v28 = vmul.f32 %v11311_v3, %v3264_v50  ;;  %v11316_v0 = vld [vmem:[#allocation27_spill] sm:$0xff]  ;;  %v11317_v25 = vld [vmem:[#allocation29_spill] sm:$0xff]  ;;  %v11319_v54 = vld [vmem:[#allocation34_spill] sm:$0xff] }
 0x414   : > { %v3491_v9 = vmul.f32 %v11312_v57, %v3267_v10  ;;  %v3201_v7 = vmul.f32 %v9703_v21, %v3164_v56  ;;  %6733 = vmatpush3.bf16.msra.mxu1 %v7348_v39  ;;  %v3165_v6 = vadd.f32 %v3095_v59, %v11313_v52  ;;  %v9868_v38 = vshrl.u32 %v9842_v61, 16  ;;  %v11320_v3 = vld [vmem:[#allocation58_spill] sm:$0xff] }
 0x415   : > { %v3199_v20 = vmul.f32 %v9703_v21, %v3162_v46  ;;  %v3163_v13 = vadd.f32 %v3087_v2, %v11314_v11  ;;  %6734 = vmatprep.subr.bf16.mxu1 %v7349_v41  ;;  %v3265_v18 = vmax.f32 %v3233_v1, 0.0  ;;  %v3811_v5 = vsel %vm3801_vm2, %v3806_v14, %v3810_v47  ;;  %v11322_v11 = vld [vmem:[#allocation55_spill] sm:$0xff] }
 0x416   : > { %v3238_v55 = vadd.f32 %v9707_v17, %v3201_v7  ;;  %v9872_v4 = vpack.c.bf16 %v3487_v37, %v3486_v23  ;;  %v3202_v32 = vmul.f32 %v9703_v21, %v3165_v6  ;;  %v3812_v24 = vrot.slane %v9868_v38, 7  ;;  %v7351_v23 = vld [vmem:[#allocation8 + $0x168] sm:$0xff]  }
 0x417   : > { %v3236_v39 = vadd.f32 %v9707_v17, %v3199_v20  ;;  %v3200_v29 = vmul.f32 %v9703_v21, %v3163_v13  ;;  %v6718_v50 = vpop.f32.mrb[236].mxu0  ;;  %v9880_v1 = vshll.u32 %v9842_v61, 16  ;;  %v3489_v46 = vmul.f32 %v11317_v25, %v3265_v18  ;;  %v11321_v20 = vld [vmem:[#allocation43_spill] sm:$0xff] }
 0x418   : > { %v3270_v49 = vmax.f32 %v3238_v55, 0.0  ;;  %v3108_v43 = vadd.f32 %v6718_v50, %v11315_v45  ;;  %v3099_v10 = vpop.f32.mrb[237].mxu0  ;;  %v9883_v14 = vshrl.u32 %v9872_v4, 16  ;;  %6735 = vmatpush3.bf16.msra.mxu1 %v7349_v41  ;;  %v3239_v34 = vadd.f32 %v9707_v17, %v3202_v32  ;;  %v11323_v55 = vld [vmem:[#allocation40_spill] sm:$0xff]  ;;  %v11325_v50 = vld [vmem:[#allocation57_spill] sm:$0xff] }
 0x419   : > { %v3268_v37 = vmax.f32 %v3236_v39, 0.0  ;;  %v3237_v56 = vadd.f32 %v9707_v17, %v3200_v29  ;;  %v3100_v47 = vadd.f32 %v3099_v10, %v11316_v0  ;;  %v6719_v51 = vpop.f32.mrb[238].mxu0  ;;  %6736 = vmatprep.subr.bf16.mxu1 %v7350_v60  ;;  %v9892_v41 = vshll.u32 %v9872_v4, 16  ;;  %v11324_v39 = vld [vmem:[#allocation31_spill] sm:$0xff]  ;;  %v7352_v10 = vld [vmem:[#allocation8 + $0x170] sm:$0xff]  }
 0x41a   : > { %v3168_v59 = vadd.f32 %v3108_v43, %v11318_v62  ;;  %4390 = vmatmul.mubr.bf16.gmra.mrb[64].mxu1 %v3811_v5  ;;  %v3111_v2 = vadd.f32 %v6719_v51, %v11319_v54  ;;  %v3102_v40 = vpop.f32.mrb[239].mxu0  ;;  %v9895_v57 = vmul.f32 %v11320_v3, %v3270_v49  ;;  %v3813_v6 = vor.u32 %v3812_v24, %v9880_v1  ;;  %v11326_v0 = vld [vmem:[#allocation56_spill] sm:$0xff]  ;;  %v11327_v3 = vld [vmem:[#allocation59_spill] sm:$0xff] }
 0x41b   : > { %v3269_v7 = vmax.f32 %v3237_v56, 0.0  ;;  %v3166_v52 = vadd.f32 %v3100_v47, %v11321_v20  ;;  %4397 = vmatprep.mubr.bf16.mxu1 %v9842_v61  ;;  %v3492_v13 = vmul.f32 %v11322_v11, %v3268_v37  ;;  %v3103_v32 = vadd.f32 %v3102_v40, %v11324_v39 }
 0x41c   : > { %v3205_v18 = vmul.f32 %v9703_v21, %v3168_v59  ;;  %v3169_v5 = vadd.f32 %v3111_v2, %v11323_v55  ;;  %6737 = vmatpush3.bf16.msra.mxu1 %v7350_v60  ;;  %v3271_v29 = vmax.f32 %v3239_v34, 0.0  ;;  %v3815_v43 = vrot.slane %v9883_v14, 7 }
 0x41d   : > { %v3493_v49 = vmul.f32 %v11325_v50, %v3269_v7  ;;  %v3203_v45 = vmul.f32 %v9703_v21, %v3166_v52  ;;  %6738 = vmatprep.subr.bf16.mxu1 %v7351_v23  ;;  %v3167_v47 = vadd.f32 %v3103_v32, %v11326_v0  ;;  %v9910_v51 = vpack.c.bf16 %v3489_v46, %v3488_v28  ;;  %v11328_v46 = vld [vmem:[#allocation41_spill] sm:$0xff] }
 0x41e   : > { %v3242_v56 = vadd.f32 %v9707_v17, %v3205_v18  ;;  %v3206_v37 = vmul.f32 %v9703_v21, %v3169_v5  ;;  %v3816_v34 = vor.u32 %v3815_v43, %v9892_v41  ;;  %v9916_v62 = vpack.c.bf16 %v3491_v9, %v3490_v12  ;;  %v11329_v18 = vld [vmem:[#allocation60_spill] sm:$0xff] }
 0x41f   : > { %v3240_v25 = vadd.f32 %v9707_v17, %v3203_v45  ;;  %v6722_v60 = vpop.f32.mrb[240].mxu0  ;;  %v9918_v59 = vpack.c.bf16 %v3493_v49, %v3492_v13  ;;  %v3204_v40 = vmul.f32 %v9703_v21, %v3167_v47  ;;  %v3814_v52 = vsel %vm3801_vm2, %v3809_v30, %v3813_v6  ;;  %v7353_v13 = vld [vmem:[#allocation8 + $0x178] sm:$0xff]  }
 0x420   : > { %v3274_v54 = vmax.f32 %v3242_v56, 0.0  ;;  %v3243_v2 = vadd.f32 %v9707_v17, %v3206_v37  ;;  %v3124_v7 = vadd.f32 %v6722_v60, %v11327_v3  ;;  %v3115_v28 = vpop.f32.mrb[241].mxu0  ;;  %6739 = vmatpush3.bf16.msra.mxu1 %v7351_v23  ;;  %v3817_v12 = vsel %vm3801_vm2, %v3812_v24, %v3816_v34  ;;  %v11330_v23 = vld [vmem:[#allocation49_spill] sm:$0xff]  ;;  %v11331_v49 = vld [vmem:[#allocation66_spill] sm:$0xff]  ;;  %v11336_v3 = vld [vmem:[#allocation52_spill] sm:$0xff] }
 0x421   : > { %v3116_v20 = vadd.f32 %v3115_v28, %v11328_v46  ;;  %v6723_v11 = vpop.f32.mrb[242].mxu0  ;;  %v9929_v9 = vshrl.u32 %v9910_v51, 16  ;;  %6740 = vmatprep.subr.bf16.mxu1 %v7352_v10  ;;  %v3495_v55 = vmul.f32 %v11329_v18, %v3271_v29  ;;  %v3272_v5 = vmax.f32 %v3240_v25, 0.0  ;;  %v11332_v30 = vld [vmem:[#allocation42_spill] sm:$0xff]  ;;  %v11333_v24 = vld [vmem:[#allocation61_spill] sm:$0xff] }
 0x422   : > { %v3241_v39 = vadd.f32 %v9707_v17, %v3204_v40  ;;  %v3172_v32 = vadd.f32 %v3124_v7, %v11330_v23  ;;  %4398 = vmatmul.mubr.bf16.gmra.mrb[68].mxu1 %v3814_v52  ;;  %v3118_v50 = vpop.f32.mrb[243].mxu0  ;;  %v9935_v45 = vmul.f32 %v11331_v49, %v3274_v54  ;;  %v3127_v56 = vadd.f32 %v6723_v11, %v11333_v24  ;;  %v11334_v37 = vld [vmem:[#allocation46_spill] sm:$0xff]  ;;  %v11335_v54 = vld [vmem:[#allocation39_spill] sm:$0xff] }
 0x423   : > { %v3170_v6 = vadd.f32 %v3116_v20, %v11332_v30  ;;  %4405 = vmatprep.mubr.bf16.mxu1 %v9872_v4  ;;  %v3119_v0 = vadd.f32 %v3118_v50, %v11334_v37  ;;  %v3275_v47 = vmax.f32 %v3243_v2, 0.0  ;;  %v9943_v60 = vshll.u32 %v9910_v51, 16  ;;  %v7354_v46 = vld [vmem:[#allocation8 + $0x40] sm:$0xff]  }
 0x424   : > { %v3273_v29 = vmax.f32 %v3241_v39, 0.0  ;;  %v3209_v25 = vmul.f32 %v9703_v21, %v3172_v32  ;;  %6741 = vmatpush3.bf16.msra.mxu1 %v7352_v10  ;;  %v3173_v40 = vadd.f32 %v3127_v56, %v11335_v54  ;;  %v3818_v28 = vrot.slane %v9929_v9, 7  ;;  %v11337_v20 = vld [vmem:[#allocation62_spill] sm:$0xff]  ;;  %v11338_v2 = vld [vmem:[#allocation63_spill] sm:$0xff] }
 0x425   : > { %v3207_v34 = vmul.f32 %v9703_v21, %v3170_v6  ;;  %v3171_v7 = vadd.f32 %v3119_v0, %v11336_v3  ;;  %6742 = vmatprep.subr.bf16.mxu1 %v7353_v13  ;;  %v3496_v52 = vmul.f32 %v11337_v20, %v3272_v5  ;;  %v9953_v39 = vshrl.u32 %v9916_v62, 16 }
 0x426   : > { %v3497_v11 = vmul.f32 %v11338_v2, %v3273_v29  ;;  %v3246_v18 = vadd.f32 %v9707_v17, %v3209_v25  ;;  %v3210_v23 = vmul.f32 %v9703_v21, %v3173_v40  ;;  %v3819_v49 = vor.u32 %v3818_v28, %v9943_v60  ;;  %v11339_v29 = vld [vmem:[#allocation64_spill] sm:$0xff]  ;;  %v11340_v2 = vld [vmem:[#allocation67_spill] sm:$0xff] }
 0x427   : > { %v3244_v10 = vadd.f32 %v9707_v17, %v3207_v34  ;;  %v3208_v32 = vmul.f32 %v9703_v21, %v3171_v7  ;;  %v6726_v50 = vpop.f32.mrb[244].mxu0  ;;  %v9960_v5 = vshll.u32 %v9916_v62, 16  ;;  %v3821_v24 = vrot.slane %v9953_v39, 7 }
 0x428   : > { %v3278_v30 = vmax.f32 %v3246_v18, 0.0  ;;  %v3131_v6 = vpop.f32.mrb[245].mxu0  ;;  %v9964_v56 = vshrl.u32 %v9918_v59, 16  ;;  %6743 = vmatpush3.bf16.msra.mxu1 %v7353_v13  ;;  %v3247_v37 = vadd.f32 %v9707_v17, %v3210_v23  ;;  %v9970_v54 = vshll.u32 %v9918_v59, 16  ;;  %v11341_v50 = vld [vmem:[#allocation54_spill] sm:$0xff] }
 0x429   : > { %v3245_v0 = vadd.f32 %v9707_v17, %v3208_v32  ;;  %v3132_v25 = vadd.f32 %v3131_v6, %v11339_v29  ;;  %v6727_v34 = vpop.f32.mrb[246].mxu0  ;;  %6356 = vmatprep.subr.bf16.mxu1 %v7354_v46  ;;  %v3276_v40 = vmax.f32 %v3244_v10, 0.0  ;;  %v3820_v7 = vsel %vm3801_vm2, %v3815_v43, %v3819_v49  ;;  %v11342_v46 = vld [vmem:[#allocation65_spill] sm:$0xff]  ;;  %v11343_v49 = vld [vmem:[#allocation70_spill] sm:$0xff] }
 0x42a   : > { %4406 = vmatmul.mubr.bf16.gmra.mrb[72].mxu1 %v3817_v12  ;;  %v3134_v3 = vpop.f32.mrb[247].mxu0  ;;  %v3822_v13 = vor.u32 %v3821_v24, %v9960_v5  ;;  %v3824_v20 = vrot.slane %v9964_v56, 7  ;;  %v3499_v18 = vmul.f32 %v11340_v2, %v3275_v47  ;;  %v3279_v23 = vmax.f32 %v3247_v37, 0.0  ;;  %v11345_v37 = vld [vmem:[#allocation69_spill] sm:$0xff] }
 0x42b   : > { %v3277_v32 = vmax.f32 %v3245_v0, 0.0  ;;  %v9979_v6 = vadd.f32 %v3132_v25, %v11341_v50  ;;  %4413 = vmatprep.mubr.bf16.mxu1 %v9910_v51  ;;  %v3135_v12 = vadd.f32 %v3134_v3, %v11342_v46  ;;  %v9986_v43 = vpack.c.bf16 %v3495_v55, %v9895_v57  ;;  %v11346_v25 = vld [vmem:[#allocation68_spill] sm:$0xff] }
 0x42c   : > { %v3823_v10 = vsel %vm3801_vm2, %v3818_v28, %v3822_v13  ;;  %v3825_v29 = vor.u32 %v3824_v20, %v9970_v54  ;;  %v3502_v34 = vmul.f32 %v11343_v49, %v3278_v30  ;;  %v3503_v47 = vmul.f32 %v11344_v16, %v3279_v23 }
 0x42d   : > { %v3501_v0 = vmul.f32 %v11345_v37, %v3277_v32  ;;  %v9991_v2 = vpack.c.bf16 %v3497_v11, %v3496_v52  ;;  %v3500_v50 = vmul.f32 %v11346_v25, %v3276_v40  ;;  %v9995_v15 = vadd.f32 %v3135_v12, %v11347_v19 }
 0x42e   : > { %v9998_v28 = vsel %vm3801_vm2, %v3821_v24, %v3825_v29  ;;  %v10001_v3 = vshrl.u32 %v9986_v43, 16  ;;  %v10003_v57 = vpack.c.bf16 %v3503_v47, %v3502_v34  ;;  %v10009_v16 = vshll.u32 %v9986_v43, 16 }
 0x42f   : > { %v10006_v55 = vshrl.u32 %v9991_v2, 16  ;;  %v10013_v11 = vpack.c.bf16 %v3499_v18, %v9935_v45  ;;  %v10015_v19 = vpack.c.bf16 %v3501_v0, %v3500_v50  ;;  %v10018_v30 = vshll.u32 %v9991_v2, 16 }
 0x430   : > { %v3827_v52 = vrot.slane %v10001_v3, 7  ;;  %v10984_v34 = vrot.slane %v9880_v1, 1  ;;  %v3891_v0 = vrot.slane %v9892_v41, 1  ;;  %v3676_v25 = vrot.slane %v9717_v48, 4 }
 0x431   : > { %11348 = vst [vmem:[#allocation28_spill] sm:$0xff] %v10015_v19  ;;  %v3830_v24 = vrot.slane %v10006_v55, 7  ;;  %v10023_v13 = vshrl.u32 %v10013_v11, 16  ;;  %v10028_v45 = vshrl.u32 %v10015_v19, 16  ;;  %v10034_v32 = vshll.u32 %v10013_v11, 16 }
 0x432   : > { %4414 = vmatmul.mubr.bf16.gmra.mrb[76].mxu1 %v3820_v7  ;;  %v3828_v40 = vor.u32 %v3827_v52, %v10009_v16  ;;  %v10042_v29 = vshll.u32 %v10015_v19, 16  ;;  %v11351_v26 = vshll.u32 %v9717_v48, 16  ;;  %v3893_v33 = vor.u32 %v3891_v0, %v9883_v14 }
 0x433   : > { %4421 = vmatprep.mubr.bf16.mxu1 %v9916_v62  ;;  %v3831_v23 = vor.u32 %v3830_v24, %v10018_v30  ;;  %v3833_v7 = vrot.slane %v10023_v13, 7  ;;  %v3839_v12 = vrot.slane %v10028_v45, 7  ;;  %v3900_v19 = vrot.slane %v9970_v54, 1 }
 0x434   : > { %v10031_v18 = vsel %vm3801_vm2, %v3824_v20, %v3828_v40  ;;  %v11349_v20 = vshrl.u32 %v9717_v48, 16  ;;  %v3894_v40 = vrot.slane %v9943_v60, 1 }
 0x435   : > { %v10038_v46 = vsel %vm3801_vm2, %v3827_v52, %v3831_v23  ;;  %v3834_v49 = vor.u32 %v3833_v7, %v10034_v32  ;;  %v3842_v37 = vor.u32 %v10042_v29, %v3839_v12  ;;  %v3890_v52 = vor.u32 %v10984_v34, %v9868_v38 }
 0x436   : > { %v3525_v47 = vrot.slane %v11349_v20, 3  ;;  %v3897_v23 = vrot.slane %v9960_v5, 1  ;;  %v3528_v20 = vrot.slane %v11351_v26, 4  ;;  %v10074_v48 = vsel %vm785_vm1, %v3893_v33, %v3894_v40 }
 0x437   : > { %v10052_v50 = vsel %vm3801_vm2, %v3830_v24, %v3834_v49  ;;  %v10062_v12 = vsel %vm3801_vm2, %v3833_v7, %v3842_v37  ;;  %v10067_v24 = vsel %vm785_vm1, %v3890_v52, %v3891_v0  ;;  %v3896_v49 = vor.u32 %v3894_v40, %v9929_v9  ;;  %11354 = vst [vmem:[#allocation48_spill] sm:$0xff] %v10074_v48 }
 0x438   : > { %11350 = vst [vmem:[#allocation50_spill] sm:$0xff] %v10052_v50  ;;  %11352 = vst [vmem:[#allocation32_spill] sm:$0xff] %v10062_v12  ;;  %v3899_v34 = vor.u32 %v3897_v23, %v9953_v39  ;;  %v3903_v50 = vrot.slane %v10009_v16, 1  ;;  %v3902_v26 = vor.u32 %v3900_v19, %v9964_v56  ;;  %v3906_v7 = vrot.slane %v10018_v30, 1 }
 0x439   : > { %11353 = vst [vmem:[#allocation44_spill] sm:$0xff] %v10067_v24  ;;  %v10080_v37 = vsel %vm785_vm1, %v3896_v49, %v3897_v23  ;;  %v3912_v24 = vrot.slane %v10042_v29, 1  ;;  %v10093_v48 = vshll.u32 %v10003_v57, 16  ;;  %v3533_v49 = vrot.slane %v9788_v58, 3 }
 0x43a   : > { %4422 = vmatmul.mubr.bf16.gmra.mrb[80].mxu1 %v3823_v10  ;;  %v3909_v10 = vrot.slane %v10034_v32, 1  ;;  %11355 = vst [vmem:[#allocation45_spill] sm:$0xff] %v10080_v37  ;;  %v10083_v0 = vsel %vm785_vm1, %v3899_v34, %v3900_v19  ;;  %v3905_v52 = vor.u32 %v3903_v50, %v10001_v3  ;;  %v10088_v12 = vsel %vm785_vm1, %v3902_v26, %v3903_v50 }
 0x43b   : > { %4429 = vmatprep.mubr.bf16.mxu1 %v9918_v59  ;;  %11356 = vst [vmem:[#allocation53_spill] sm:$0xff] %v10083_v0  ;;  %11357 = vst [vmem:[#allocation36_spill] sm:$0xff] %v10088_v12  ;;  %v3908_v33 = vor.u32 %v3906_v7, %v10006_v55  ;;  %v3914_v19 = vor.u32 %v3912_v24, %v10028_v45  ;;  %v3677_v34 = vrot.slane %v9763_v42, 4  ;;  %v3918_v26 = vrot.slane %v10093_v48, 1 }
 0x43c   : > { %v3911_v40 = vor.u32 %v3909_v10, %v10023_v13  ;;  %v10096_v23 = vsel %vm785_vm1, %v3905_v52, %v3906_v7  ;;  %v10985_v12 = vshll.u32 %v9763_v42, 16  ;;  %v3679_v7 = vrot.slane %v9761_v8, 4 }
 0x43d   : > { %11358 = vst [vmem:[#allocation33_spill] sm:$0xff] %v10096_v23  ;;  %v10102_v0 = vsel %vm785_vm1, %v3908_v33, %v3909_v10  ;;  %v10110_v37 = vsel %vm3675_vm3, %v3676_v25, %v3677_v34  ;;  %v10114_v52 = vsel %vm785_vm1, %v3914_v19, %v3918_v26  ;;  %v3681_v10 = vrot.slane %v9804_v27, 4 }
 0x43e   : > { %v10105_v50 = vsel %vm785_vm1, %v3911_v40, %v3912_v24  ;;  %v3536_v23 = vrot.slane %v10985_v12, 4  ;;  %v10121_v24 = vsel %vm3675_vm3, %v3677_v34, %v3679_v7  ;;  %v3683_v33 = vrot.slane %v9799_v53, 4 }
 0x43f   : > { %v3211_v25 = vmul.f32 %v9703_v21, %v9979_v6  ;;  %v3529_v8 = vor.u32 %v3528_v20, %v3525_v47  ;;  %v10130_v19 = vsel %vm3675_vm3, %v3679_v7, %v3681_v10  ;;  %v3569_v34 = vrot.slane %v9868_v38, 3 }
 0x440   : > { %v10127_v40 = vor.u32 %v3536_v23, %v3533_v49  ;;  %v10133_v27 = vsel %vm3675_vm3, %v3681_v10, %v3683_v33  ;;  %v3212_v53 = vmul.f32 %v9703_v21, %v9995_v15  ;;  %v3572_v47 = vrot.slane %v9880_v1, 4 }
 0x441   : > { %v3687_v23 = vrot.slane %v9872_v4, 4  ;;  %v3578_v49 = vrot.slane %v9883_v14, 3  ;;  %v3581_v21 = vrot.slane %v9892_v41, 4  ;;  %v3689_v15 = vrot.slane %v9910_v51, 4 }
 0x442   : > { %4430 = vmatmul.mubr.bf16.gmra.mrb[84].mxu1 %v9998_v28  ;;  %v3685_v28 = vrot.slane %v9842_v61, 4  ;;  %v10141_v6 = vsel %vm521_vm0, %v3529_v8, %v10127_v40  ;;  %v10150_v61 = vadd.f32 %v9707_v17, %v3211_v25  ;;  %v10152_v26 = vor.u32 %v3572_v47, %v3569_v34 }
 0x443   : > { %4437 = vmatprep.mubr.bf16.mxu1 %v9986_v43  ;;  %v3587_v10 = vrot.slane %v9929_v9, 3  ;;  %v3691_v4 = vrot.slane %v9916_v62, 4  ;;  %v10163_v8 = vadd.f32 %v9707_v17, %v3212_v53  ;;  %v3582_v25 = vor.u32 %v3581_v21, %v3578_v49 }
 0x444   : > { %v10145_v20 = vsel %vm3675_vm3, %v3683_v33, %v3685_v28  ;;  %v10157_v7 = vsel %vm3675_vm3, %v3685_v28, %v3687_v23  ;;  %v3590_v33 = vrot.slane %v9943_v60, 4  ;;  %v10166_v34 = vsel %vm3675_vm3, %v3687_v23, %v3689_v15 }
 0x445   : > { %11359 = vst [vmem:[#allocation38_spill] sm:$0xff] %v10157_v7  ;;  %11360 = vst [vmem:[#allocation47_spill] sm:$0xff] %v10166_v34  ;;  %v3596_v47 = vrot.slane %v9953_v39, 3  ;;  %v10171_v28 = vsel %vm3675_vm3, %v3689_v15, %v3691_v4  ;;  %v3599_v12 = vrot.slane %v9960_v5, 4  ;;  %v3693_v7 = vrot.slane %v9918_v59, 4 }
 0x446   : > { %v3591_v51 = vor.u32 %v3590_v33, %v3587_v10  ;;  %11361 = vst [vmem:[#allocation35_spill] sm:$0xff] %v10171_v28  ;;  %v10178_v17 = vsel %vm521_vm0, %v10152_v26, %v3582_v25  ;;  %v3605_v62 = vrot.slane %v9964_v56, 3  ;;  %v3608_v53 = vrot.slane %v9970_v54, 4 }
 0x447   : > { %v3600_v49 = vor.u32 %v3599_v12, %v3596_v47  ;;  %v10187_v21 = vsel %vm3675_vm3, %v3691_v4, %v3693_v7  ;;  %v3614_v59 = vrot.slane %v10001_v3, 3  ;;  %v3617_v33 = vrot.slane %v10009_v16, 4 }
 0x448   : > { %v10184_v23 = vsel %vm521_vm0, %v3582_v25, %v3591_v51  ;;  %11362 = vst [vmem:[#allocation30_spill] sm:$0xff] %v10187_v21  ;;  %v3609_v15 = vor.u32 %v3608_v53, %v3605_v62  ;;  %v3697_v28 = vrot.slane %v9991_v2, 4  ;;  %v3626_v12 = vrot.slane %v10018_v30, 4  ;;  %v1884_v53 = vpop.f32.mrb[52].mxu1 }
 0x449   : > { %v10196_v34 = vsel %vm521_vm0, %v3591_v51, %v3600_v49  ;;  %v10991_v4 = vrot.slane %v10013_v11, 4  ;;  %v3618_v47 = vor.u32 %v3617_v33, %v3614_v59  ;;  %v3632_v62 = vrot.slane %v10023_v13, 3  ;;  %v1885_v33 = vpop.f32.mrb[53].mxu1 }
 0x44a   : > { %4438 = vmatmul.mubr.bf16.gmra.mrb[88].mxu1 %v10031_v18  ;;  %v3695_v18 = vrot.slane %v9986_v43, 4  ;;  %v3623_v43 = vrot.slane %v10006_v55, 3  ;;  %v10202_v25 = vsel %vm521_vm0, %v3600_v49, %v3609_v15  ;;  %v3729_v21 = vrot.slane %v9788_v58, 4 }
 0x44b   : > { %4445 = vmatprep.mubr.bf16.mxu1 %v9991_v2  ;;  %v10211_v51 = vsel %vm3675_vm3, %v3697_v28, %v10991_v4  ;;  %v3280_v49 = vmax.f32 %v10150_v61, 0.0  ;;  %v3880_v59 = vrot.slane %v9776_v63, 1  ;;  %v11364_v53 = vshll.u32 %v9763_v42, 16 }
 0x44c   : > { %v10191_v10 = vsel %vm3675_vm3, %v3693_v7, %v3695_v18  ;;  %v10205_v7 = vsel %vm3675_vm3, %v3695_v18, %v3697_v28  ;;  %v3627_v2 = vor.u32 %v3626_v12, %v3623_v43  ;;  %v10218_v18 = vsel %vm521_vm0, %v3609_v15, %v3618_v47  ;;  %v1886_v12 = vpop.f32.mrb[54].mxu1  ;;  %v3467_v15 = vpop.permute.xlu0 %3466 }
 0x44d   : > { %11363 = vst [vmem:[#allocation27_spill] sm:$0xff] %v10191_v10  ;;  %v3635_v10 = vrot.slane %v10034_v32, 4  ;;  %v3730_v43 = vrot.slane %v11364_v53, 5  ;;  %v3281_v58 = vmax.f32 %v10163_v8, 0.0  ;;  %v1887_v61 = vpop.f32.mrb[55].mxu1  ;;  %v3881_v53 = vor.u32 %v3880_v59, %v9770_v44  ;;  %v3472_v12 = vpop.permute.xlu1 %3471 }
 0x44e   : > { %v10224_v28 = vsel %vm521_vm0, %v3618_v47, %v3627_v2  ;;  %v3745_v47 = vrot.slane %v9868_v38, 4  ;;  %v11365_v8 = vor.u32 %v9739_v36, %v9735_v31  ;;  %v3750_v38 = vrot.slane %v9892_v41, 5 }
 0x44f   : > { %v10226_v4 = vor.u32 %v3635_v10, %v3632_v62  ;;  %v10230_v33 = vor.u32 %v3730_v43, %v3729_v21  ;;  %v3746_v10 = vrot.slane %v9880_v1, 5  ;;  %v3504_v62 = vmul.f32 %v3467_v15, %v3280_v49 }
 0x450   : > { %v3749_v43 = vrot.slane %v9883_v14, 4  ;;  %v3753_v49 = vrot.slane %v9929_v9, 4  ;;  %v3505_v15 = vmul.f32 %v3472_v12, %v3281_v58  ;;  %v3754_v59 = vrot.slane %v9943_v60, 5  ;;  %v11367_v60 = vld [vmem:[#allocation50_spill] sm:$0xff] }
 0x451   : > { %v10245_v21 = vsel %vm3725_vm4, %v11365_v8, %v10230_v33  ;;  %v10249_v61 = vor.u32 %v3746_v10, %v3745_v47  ;;  %v3757_v42 = vrot.slane %v9953_v39, 4  ;;  %v3758_v31 = vrot.slane %v9960_v5, 5 }
 0x452   : > { %4446 = vmatmul.mubr.bf16.gmra.mrb[92].mxu1 %v10038_v46  ;;  %v10235_v46 = vsel %vm521_vm0, %v3627_v2, %v10226_v4  ;;  %v11366_v36 = vrot.slane %v9830_v22, 1  ;;  %v3751_v8 = vor.u32 %v3750_v38, %v3749_v43  ;;  %v3761_v2 = vrot.slane %v9964_v56, 4  ;;  %v11368_v56 = vld [vmem:[#allocation28_spill] sm:$0xff] }
 0x453   : > { %4453 = vmatprep.mubr.bf16.mxu1 %v10013_v11  ;;  %v3762_v47 = vrot.slane %v9970_v54, 5  ;;  %v3755_v10 = vor.u32 %v3754_v59, %v3753_v49  ;;  %v3759_v41 = vor.u32 %v3758_v31, %v3757_v42  ;;  %v3765_v9 = vrot.slane %v10001_v3, 4 }
 0x454   : > { %v3883_v14 = vsel %vm785_vm1, %v3881_v53, %v11366_v36  ;;  %v3766_v58 = vrot.slane %v10009_v16, 5  ;;  %v10266_v39 = vsel %vm3725_vm4, %v10249_v61, %v3751_v8  ;;  %v3769_v53 = vrot.slane %v10006_v55, 4 }
 0x455   : > { %v3763_v5 = vor.u32 %v3762_v47, %v3761_v2  ;;  %v3770_v43 = vrot.slane %v10018_v30, 5  ;;  %v10272_v54 = vsel %vm3725_vm4, %v3751_v8, %v3755_v10  ;;  %v10275_v3 = vsel %vm3725_vm4, %v3755_v10, %v3759_v41 }
 0x456   : > { %v3767_v16 = vor.u32 %v3766_v58, %v3765_v9  ;;  %v3773_v42 = vrot.slane %v10023_v13, 4  ;;  %v3774_v2 = vrot.slane %v10034_v32, 5  ;;  %v3981_v55 = vrot.slane %v11368_v56, 4 }
 0x457   : > { %v10279_v12 = vsel %vm3725_vm4, %v3759_v41, %v3763_v5  ;;  %v3771_v38 = vor.u32 %v3770_v43, %v3769_v53  ;;  %v3944_v49 = vrot.slane %v10028_v45, 3  ;;  %v3945_v59 = vrot.slane %v10042_v29, 4 }
 0x458   : > { %v10284_v30 = vsel %vm3725_vm4, %v3763_v5, %v3767_v16  ;;  %v3983_v31 = vrot.slane %v10003_v57, 4  ;;  %v3775_v13 = vor.u32 %v3774_v2, %v3773_v42  ;;  %v11369_v8 = vrot.slane %v10013_v11, 4  ;;  %v11370_v42 = vld [vmem:[#allocation32_spill] sm:$0xff] }
 0x459   : > { %v10290_v36 = vsel %vm3725_vm4, %v3767_v16, %v3771_v38  ;;  %v3948_v32 = vshrl.u32 %v10003_v57, 16  ;;  %v3946_v10 = vor.u32 %v3945_v59, %v3944_v49  ;;  %v3951_v9 = vrot.slane %v10093_v48, 4 }
 0x45a   : > { %4454 = vmatmul.mubr.bf16.gmra.mrb[96].mxu1 %v11367_v60  ;;  %v10295_v47 = vsel %vm3675_vm3, %v11369_v8, %v3981_v55  ;;  %v10299_v41 = vsel %vm3675_vm3, %v3981_v55, %v3983_v31  ;;  %v3521_v58 = vpack.c.bf16 %v3505_v15, %v3504_v62  ;;  %v10303_v60 = vsel %vm3725_vm4, %v3771_v38, %v3775_v13 }
 0x45b   : > { %4461 = vmatprep.mubr.bf16.mxu1 %v11368_v56  ;;  %v3950_v5 = vrot.slane %v3948_v32, 3  ;;  %v4002_v53 = vrot.slane %v10028_v45, 4  ;;  %v4003_v11 = vrot.slane %v10042_v29, 5  ;;  %v10309_v43 = vsel %vm521_vm0, %v10226_v4, %v3946_v10 }
 0x45c   : > { %v3985_v57 = vrot.slane %v3521_v58, 4  ;;  %v3955_v56 = vshrl.u32 %v3521_v58, 16  ;;  %v3958_v16 = vshll.u32 %v3521_v58, 16  ;;  %v4006_v62 = vrot.slane %v3948_v32, 4 }
 0x45d   : > { %v3952_v2 = vor.u32 %v3951_v9, %v3950_v5  ;;  %v4004_v55 = vor.u32 %v4003_v11, %v4002_v53  ;;  %v4007_v15 = vrot.slane %v10093_v48, 5  ;;  %v11371_v9 = vld [vmem:[#allocation73_spill] sm:$0xff]  ;;  %v11372_v32 = vrot.slane %v9830_v22, 1  ;;  %v7355_v53 = vld [vmem:[#allocation8] sm:$0xff]  }
 0x45e   : > { %v10314_v38 = vsel %vm3675_vm3, %v3983_v31, %v3985_v57  ;;  %v3957_v45 = vrot.slane %v3955_v56, 3  ;;  %v3960_v29 = vrot.slane %v3958_v16, 4  ;;  %v4010_v49 = vrot.slane %v3955_v56, 4  ;;  %v7356_v56 = vld [vmem:[#allocation8 + $0x48] sm:$0xff]  }
 0x45f   : > { %v10317_v4 = vsel %vm521_vm0, %v3946_v10, %v3952_v2  ;;  %v10320_v59 = vsel %vm3725_vm4, %v3775_v13, %v4004_v55  ;;  %v4008_v8 = vor.u32 %v4007_v15, %v4006_v62  ;;  %v4011_v58 = vrot.slane %v3958_v16, 5  ;;  %v11374_v10 = vld [vmem:[#allocation72_spill] sm:$0xff] }
 0x460   : > { %v3884_v5 = vor.u32 %v11372_v32, %v11371_v9  ;;  %v3961_v48 = vor.u32 %v3960_v29, %v3957_v45  ;;  %v11375_v57 = vrot.slane %v9837_v35, 1  ;;  %v7358_v45 = vld [vmem:[#allocation8 + $0x50] sm:$0xff]   ;;  %v7361_v32 = vld [vmem:[#allocation8 + $0x18] sm:$0xff]  }
 0x461   : > { %v4012_v31 = vor.u32 %v4011_v58, %v4010_v49  ;;  %v7359_v29 = vld [vmem:[#allocation8 + $0x10] sm:$0xff]   ;;  %v7360_v49 = vld [vmem:[#allocation8 + $0x58] sm:$0xff]  }
 0x462   : > { %4462 = vmatmul.mubr.bf16.gmra.mrb[100].mxu1 %v11370_v42  ;;  %v10329_v11 = vsel %vm521_vm0, %v3952_v2, %v3961_v48  ;;  %v3887_v13 = vor.u32 %v11375_v57, %v11374_v10  ;;  %v11377_v42 = vmov %v11375_v57  ;;  %v7357_v2 = vld [vmem:[#allocation8 + $0x8] sm:$0xff]  }
 0x463   : > { %6744 = vmatprep.mubr.bf16.mxu1 %v3883_v14  ;;  %v10326_v14 = vsel %vm3725_vm4, %v4004_v55, %v4008_v8  ;;  %v10335_v16 = vsel %vm3725_vm4, %v4008_v8, %v4012_v31  ;;  %v3886_v62 = vsel %vm785_vm1, %v3884_v5, %v11377_v42  ;;  %v11378_v55 = vrot.slane %v9880_v1, 1  ;;  %v11379_v8 = vld [vmem:[#allocation44_spill] sm:$0xff]  ;;  %v7362_v5 = vld [vmem:[#allocation8 + $0x60] sm:$0xff]   ;;  %v11381_v31 = vld [vmem:[#allocation45_spill] sm:$0xff] }
 0x464   : > { %11373 = vst [vmem:[#allocation29_spill] sm:$0xff] %v10326_v14  ;;  %11376 = vst [vmem:[#allocation37_spill] sm:$0xff] %v10335_v16  ;;  %v11380_v58 = vld [vmem:[#allocation48_spill] sm:$0xff]  ;;  %v7363_v1 = vld [vmem:[#allocation8 + $0x20] sm:$0xff]  }
 0x465   : > { %v3889_v15 = vsel %vm785_vm1, %v3887_v13, %v11378_v55  ;;  %v7364_v48 = vld [vmem:[#allocation8 + $0x68] sm:$0xff]   ;;  %v7366_v13 = vld [vmem:[#allocation8 + $0x70] sm:$0xff]   ;;  %v7368_v42 = vld [vmem:[#allocation8 + $0x78] sm:$0xff]  }
 0x466   : > { %v7365_v57 = vld [vmem:[#allocation8 + $0x28] sm:$0xff]   ;;  %v11384_v55 = vld [vmem:[#allocation33_spill] sm:$0xff] }
 0x467   : > { %v7395_v16 = vld [vmem:[#allocation8 + $0x208] sm:$0xff]  }
 0x46a   : > { %6745 = vmatmul.mubr.bf16.vlgmr.msra.gmra.mrb[104].mxu1 %v3886_v62  ;;  %v11383_v62 = vld [vmem:[#allocation36_spill] sm:$0xff] }
 0x46b   : > { %6748 = vmatprep.mubr.bf16.mxu1 %v3889_v15  ;;  %6357 = vmatpush3.bf16.msra.mxu1 %v7355_v53  ;;  %v11382_v53 = vld [vmem:[#allocation53_spill] sm:$0xff] }
 0x46c   : > { %6358 = vmatprep.subr.bf16.mxu1 %v7356_v56  ;;  %v7367_v56 = vld [vmem:[#allocation8 + $0x30] sm:$0xff]   ;;  %v7369_v15 = vld [vmem:[#allocation8 + $0x38] sm:$0xff]  }
 0x46f   : > { %6359 = vmatpush3.bf16.msra.mxu1 %v7357_v2  ;;  %v7370_v2 = vld [vmem:[#allocation8 + $0x80] sm:$0xff]  }
 0x470   : > { %6360 = vmatprep.subr.bf16.mxu1 %v7358_v45  ;;  %v7371_v45 = vld [vmem:[#allocation8 + $0x88] sm:$0xff]  }
 0x472   : > { %6749 = vmatmul.mubr.bf16.gmra.mrb[108].mxu1 %v11379_v8  ;;  %v7372_v8 = vld [vmem:[#allocation8 + $0x90] sm:$0xff]  }
 0x473   : > { %6752 = vmatprep.mubr.bf16.mxu1 %v11380_v58  ;;  %6361 = vmatpush3.bf16.msra.mxu1 %v7359_v29  ;;  %v3542_v29 = vrot.slane %v9770_v44, 3 }
 0x474   : > { %6362 = vmatprep.subr.bf16.mxu1 %v7360_v49  ;;  %v3545_v49 = vrot.slane %v9776_v63, 4 }
 0x476   : > { %v3546_v58 = vor.u32 %v3545_v49, %v3542_v29 }
 0x477   : > { %6363 = vmatpush3.bf16.msra.mxu1 %v7361_v32  ;;  %v7375_v32 = vld [vmem:[#allocation8 + $0xa8] sm:$0xff]  }
 0x478   : > { %6364 = vmatprep.subr.bf16.mxu1 %v7362_v5 }
 0x47a   : > { %6753 = vmatmul.mubr.bf16.gmra.mrb[112].mxu1 %v11381_v31  ;;  %v7377_v31 = vld [vmem:[#allocation8 + $0xb8] sm:$0xff]  }
 0x47b   : > { %6756 = vmatprep.mubr.bf16.mxu1 %v11382_v53  ;;  %6365 = vmatpush3.bf16.msra.mxu1 %v7363_v1  ;;  %v3560_v1 = vrot.slane %v11374_v10, 3 }
 0x47c   : > { %6366 = vmatprep.subr.bf16.mxu1 %v7364_v48  ;;  %v7376_v48 = vld [vmem:[#allocation8 + $0xb0] sm:$0xff]  }
 0x47f   : > { %6367 = vmatpush3.bf16.msra.mxu1 %v7365_v57  ;;  %v7378_v57 = vld [vmem:[#allocation8 + $0x1c0] sm:$0xff]  }
 0x480   : > { %6368 = vmatprep.subr.bf16.mxu1 %v7366_v13 }
 0x482   : > { %6757 = vmatmul.mubr.bf16.gmra.mrb[116].mxu1 %v11383_v62  ;;  %v11387_v62 = vld [vmem:[#allocation35_spill] sm:$0xff] }
 0x483   : > { %6760 = vmatprep.mubr.bf16.mxu1 %v11384_v55  ;;  %6369 = vmatpush3.bf16.msra.mxu1 %v7367_v56  ;;  %v11385_v56 = vld [vmem:[#allocation38_spill] sm:$0xff] }
 0x484   : > { %6370 = vmatprep.subr.bf16.mxu1 %v7368_v42  ;;  %v11386_v42 = vld [vmem:[#allocation47_spill] sm:$0xff]  ;;  %v11388_v55 = vld [vmem:[#allocation30_spill] sm:$0xff] }
 0x487   : > { %6371 = vmatpush3.bf16.msra.mxu1 %v7369_v15 }
 0x488   : > { %6768 = vmatprep.subr.bf16.mxu1 %v7370_v2 }
 0x48a   : > { %6761 = vmatmul.mubr.bf16.gmra.mrb[120].mxu1 %v10102_v0  ;;  %v7373_v0 = vld [vmem:[#allocation8 + $0x98] sm:$0xff]  }
 0x48b   : > { %6764 = vmatprep.mubr.bf16.mxu1 %v10105_v50  ;;  %v3547_v50 = vsel %vm521_vm0, %v10127_v40, %v3546_v58  ;;  %v3563_v40 = vrot.slane %v9837_v35, 4 }
 0x492   : > { %6765 = vmatmul.mubr.bf16.gmra.mrb[124].mxu1 %v10114_v52  ;;  %v3554_v52 = vrot.slane %v9830_v22, 4 }
 0x493   : > { %4775 = vmatprep.mubr.bf16.mxu1 %v10110_v37  ;;  %v3551_v37 = vrot.slane %v11371_v9, 3 }
 0x49a   : > { %4776 = vmatmul.mubr.bf16.vlgmr.msra.gmra.mrb[128].mxu1 %v10141_v6  ;;  %v3555_v6 = vor.u32 %v3554_v52, %v3551_v37 }
 0x49b   : > { %4783 = vmatprep.mubr.bf16.mxu1 %v10121_v24  ;;  %6769 = vmatpush3.bf16.msra.mxu1 %v7370_v2  ;;  %v7374_v24 = vld [vmem:[#allocation8 + $0xa0] sm:$0xff]  }
 0x49c   : > { %6770 = vmatprep.subr.bf16.mxu1 %v7371_v45  ;;  %v3556_v5 = vsel %vm521_vm0, %v3546_v58, %v3555_v6 }
 0x49f   : > { %6771 = vmatpush3.bf16.msra.mxu1 %v7371_v45 }
 0x4a0   : > { %6772 = vmatprep.subr.bf16.mxu1 %v7372_v8 }
 0x4a2   : > { %4784 = vmatmul.mubr.bf16.gmra.mrb[132].mxu1 %v3547_v50 }
 0x4a3   : > { %4791 = vmatprep.mubr.bf16.mxu1 %v10130_v19  ;;  %6773 = vmatpush3.bf16.msra.mxu1 %v7372_v8  ;;  %v3564_v19 = vor.u32 %v3563_v40, %v3560_v1 }
 0x4a4   : > { %6774 = vmatprep.subr.bf16.mxu1 %v7373_v0 }
 0x4a5   : > { %v10367_v53 = vsel %vm521_vm0, %v3555_v6, %v3564_v19  ;;  %v10373_v13 = vsel %vm521_vm0, %v3564_v19, %v10152_v26  ;;  %v11389_v26 = vld [vmem:[#allocation27_spill] sm:$0xff]  ;;  %v3733_v19 = vrot.slane %v9770_v44, 4 }
 0x4a6   : > { %v7380_v44 = vld [vmem:[#allocation8 + $0x1c8] sm:$0xff]  }
 0x4a7   : > { %6775 = vmatpush3.bf16.msra.mxu1 %v7373_v0 }
 0x4a8   : > { %6776 = vmatprep.subr.bf16.mxu1 %v7374_v24 }
 0x4aa   : > { %4792 = vmatmul.mubr.bf16.gmra.mrb[136].mxu1 %v3556_v5 }
 0x4ab   : > { %4799 = vmatprep.mubr.bf16.mxu1 %v10133_v27  ;;  %6777 = vmatpush3.bf16.msra.mxu1 %v7374_v24 }
 0x4ac   : > { %6778 = vmatprep.subr.bf16.mxu1 %v7375_v32 }
 0x4af   : > { %6779 = vmatpush3.bf16.msra.mxu1 %v7375_v32 }
 0x4b0   : > { %6780 = vmatprep.subr.bf16.mxu1 %v7376_v48 }
 0x4b2   : > { %4800 = vmatmul.mubr.bf16.gmra.mrb[140].mxu1 %v10367_v53 }
 0x4b3   : > { %4807 = vmatprep.mubr.bf16.mxu1 %v10145_v20  ;;  %6781 = vmatpush3.bf16.msra.mxu1 %v7376_v48 }
 0x4b4   : > { %6782 = vmatprep.subr.bf16.mxu1 %v7377_v31 }
 0x4b7   : > { %6783 = vmatpush3.bf16.msra.mxu1 %v7377_v31  ;;  %v3734_v31 = vrot.slane %v9776_v63, 5 }
 0x4b8   : > { %6464 = vmatprep.subr.bf16.mxu1 %v7378_v57  ;;  %v3737_v57 = vrot.slane %v11371_v9, 4  ;;  %v3741_v9 = vrot.slane %v11374_v10, 4  ;;  %v7384_v10 = vld [vmem:[#allocation8 + $0x1d8] sm:$0xff]  }
 0x4ba   : > { %4808 = vmatmul.mubr.bf16.gmra.mrb[144].mxu1 %v10373_v13 }
 0x4bb   : > { %4815 = vmatprep.mubr.bf16.mxu1 %v11385_v56 }
 0x4c2   : > { %4816 = vmatmul.mubr.bf16.gmra.mrb[148].mxu1 %v10178_v17 }
 0x4c3   : > { %4823 = vmatprep.mubr.bf16.mxu1 %v11386_v42 }
 0x4ca   : > { %4824 = vmatmul.mubr.bf16.gmra.mrb[152].mxu1 %v10184_v23 }
 0x4cb   : > { %4831 = vmatprep.mubr.bf16.mxu1 %v11387_v62 }
 0x4d2   : > { %4832 = vmatmul.mubr.bf16.gmra.mrb[156].mxu1 %v10196_v34 }
 0x4d3   : > { %4839 = vmatprep.mubr.bf16.mxu1 %v11388_v55 }
 0x4da   : > { %4840 = vmatmul.mubr.bf16.gmra.mrb[160].mxu1 %v10202_v25 }
 0x4db   : > { %4847 = vmatprep.mubr.bf16.mxu1 %v11389_v26 }
 0x4dd   : > { %v6264_v15 = vpop.f32.mrb[56].mxu1 }
 0x4de   : > { %v6265_v2 = vpop.f32.mrb[57].mxu1 }
 0x4df   : > { %v10385_v45 = vadd.f32 %v6265_v2, %v6264_v15  ;;  %v6267_v29 = vpop.f32.mrb[58].mxu1  ;;  %v3738_v15 = vrot.slane %v9830_v22, 5  ;;  %v3742_v22 = vrot.slane %v9837_v35, 5 }
 0x4e0   : > { %v6268_v49 = vpop.f32.mrb[59].mxu1 }
 0x4e1   : > { %v10387_v8 = vadd.f32 %v6268_v49, %v6267_v29  ;;  %v3735_v29 = vor.u32 %v3734_v31, %v3733_v19  ;;  %v3743_v31 = vor.u32 %v3742_v22, %v3741_v9 }
 0x4e2   : > { %4848 = vmatmul.mubr.bf16.gmra.mrb[164].mxu1 %v10218_v18 }
 0x4e3   : > { %4855 = vmatprep.mubr.bf16.mxu1 %v10205_v7  ;;  %v3736_v63 = vsel %vm3725_vm4, %v10230_v33, %v3735_v29  ;;  %v7383_v33 = vld [vmem:[#allocation8 + $0x190] sm:$0xff]  }
 0x4e5   : > { %v6270_v58 = vpop.f32.mrb[60].mxu1 }
 0x4e6   : > { %v6271_v0 = vpop.f32.mrb[61].mxu1 }
 0x4e7   : > { %v10391_v50 = vadd.f32 %v6271_v0, %v6270_v58  ;;  %v6273_v37 = vpop.f32.mrb[62].mxu1  ;;  %v3739_v58 = vor.u32 %v3738_v15, %v3737_v57 }
 0x4e8   : > { %v6274_v52 = vpop.f32.mrb[63].mxu1 }
 0x4e9   : > { %v10393_v24 = vadd.f32 %v6274_v52, %v6273_v37  ;;  %v7379_v52 = vld [vmem:[#allocation8 + $0x180] sm:$0xff]  }
 0x4ea   : > { %4856 = vmatmul.mubr.bf16.gmra.mrb[168].mxu1 %v10224_v28 }
 0x4eb   : > { %4863 = vmatprep.mubr.bf16.mxu1 %v10211_v51 }
 0x4ed   : > { %v6276_v6 = vpop.f32.mrb[64].mxu1 }
 0x4ee   : > { %v6277_v32 = vpop.f32.mrb[65].mxu1 }
 0x4ef   : > { %v10397_v5 = vadd.f32 %v6277_v32, %v6276_v6  ;;  %v6279_v1 = vpop.f32.mrb[66].mxu1 }
 0x4f0   : > { %v6280_v40 = vpop.f32.mrb[67].mxu1 }
 0x4f1   : > { %v10399_v48 = vadd.f32 %v6280_v40, %v6279_v1  ;;  %v7381_v1 = vld [vmem:[#allocation8 + $0x188] sm:$0xff]   ;;  %v7382_v40 = vld [vmem:[#allocation8 + $0x1d0] sm:$0xff]  }
 0x4f2   : > { %4864 = vmatmul.mubr.bf16.gmra.mrb[172].mxu1 %v10235_v46 }
 0x4f3   : > { %6784 = vmatprep.mubr.bf16.mxu1 %v10245_v21  ;;  %v3740_v21 = vsel %vm3725_vm4, %v3735_v29, %v3739_v58  ;;  %v10421_v29 = vsel %vm3725_vm4, %v3739_v58, %v3743_v31  ;;  %v7387_v58 = vld [vmem:[#allocation8 + $0x1a0] sm:$0xff]  }
 0x4f5   : > { %v6282_v2 = vpop.f32.mrb[68].mxu1 }
 0x4f6   : > { %v6283_v49 = vpop.f32.mrb[69].mxu1 }
 0x4f7   : > { %v10407_v0 = vadd.f32 %v6283_v49, %v6282_v2  ;;  %v6285_v37 = vpop.f32.mrb[70].mxu1 }
 0x4f8   : > { %v6286_v6 = vpop.f32.mrb[71].mxu1 }
 0x4f9   : > { %v10409_v32 = vadd.f32 %v6286_v6, %v6285_v37  ;;  %v10426_v37 = vsel %vm3725_vm4, %v3743_v31, %v10249_v61  ;;  %v7386_v6 = vld [vmem:[#allocation8 + $0x1e0] sm:$0xff]   ;;  %v7389_v61 = vld [vmem:[#allocation8 + $0x1a8] sm:$0xff]  }
 0x4fa   : > { %6785 = vmatmul.mubr.bf16.vlgmr.msra.gmra.mrb[104].mxu1 %v3736_v63 }
 0x4fb   : > { %6788 = vmatprep.mubr.bf16.mxu1 %v3740_v21  ;;  %6465 = vmatpush3.bf16.msra.mxu1 %v7379_v52  ;;  %v7385_v52 = vld [vmem:[#allocation8 + $0x198] sm:$0xff]  }
 0x4fc   : > { %6466 = vmatprep.subr.bf16.mxu1 %v7380_v44 }
 0x4fd   : > { %v6288_v19 = vpop.f32.mrb[72].mxu1 }
 0x4fe   : > { %v6289_v57 = vpop.f32.mrb[73].mxu1 }
 0x4ff   : > { %v10416_v15 = vadd.f32 %v6289_v57, %v6288_v19  ;;  %v6291_v2 = vpop.f32.mrb[74].mxu1  ;;  %6467 = vmatpush3.bf16.msra.mxu1 %v7381_v1  ;;  %v7388_v1 = vld [vmem:[#allocation8 + $0x1e8] sm:$0xff]   ;;  %v7390_v19 = vld [vmem:[#allocation8 + $0x1f0] sm:$0xff]  }
 0x500   : > { %v6292_v49 = vpop.f32.mrb[75].mxu1  ;;  %6468 = vmatprep.subr.bf16.mxu1 %v7382_v40 }
 0x501   : > { %v10418_v35 = vadd.f32 %v6292_v49, %v6291_v2  ;;  %v7391_v49 = vld [vmem:[#allocation8 + $0x1b0] sm:$0xff]  }
 0x502   : > { %6789 = vmatmul.mubr.bf16.gmra.mrb[108].mxu1 %v10421_v29 }
 0x503   : > { %6792 = vmatprep.mubr.bf16.mxu1 %v10426_v37  ;;  %6469 = vmatpush3.bf16.msra.mxu1 %v7383_v33 }
 0x504   : > { %6470 = vmatprep.subr.bf16.mxu1 %v7384_v10 }
 0x505   : > { %v6294_v44 = vpop.f32.mrb[76].mxu1 }
 0x506   : > { %v6295_v63 = vpop.f32.mrb[77].mxu1 }
 0x507   : > { %v10429_v9 = vadd.f32 %v6295_v63, %v6294_v44  ;;  %v6297_v22 = vpop.f32.mrb[78].mxu1  ;;  %6471 = vmatpush3.bf16.msra.mxu1 %v7385_v52  ;;  %v7392_v52 = vld [vmem:[#allocation8 + $0x1f8] sm:$0xff]   ;;  %v7394_v63 = vld [vmem:[#allocation8 + $0x200] sm:$0xff]  }
 0x508   : > { %v6298_v21 = vpop.f32.mrb[79].mxu1  ;;  %6472 = vmatprep.subr.bf16.mxu1 %v7386_v6  ;;  %v7393_v44 = vld [vmem:[#allocation8 + $0x1b8] sm:$0xff]  }
 0x509   : > { %v10431_v40 = vadd.f32 %v6298_v21, %v6297_v22 }
 0x50a   : > { %6793 = vmatmul.mubr.bf16.gmra.mrb[112].mxu1 %v10266_v39 }
 0x50b   : > { %6796 = vmatprep.mubr.bf16.mxu1 %v10272_v54  ;;  %6473 = vmatpush3.bf16.msra.mxu1 %v7387_v58 }
 0x50c   : > { %6474 = vmatprep.subr.bf16.mxu1 %v7388_v1 }
 0x50d   : > { %v6300_v31 = vpop.f32.mrb[80].mxu1 }
 0x50e   : > { %v6301_v57 = vpop.f32.mrb[81].mxu1 }
 0x50f   : > { %v10435_v2 = vadd.f32 %v6301_v57, %v6300_v31  ;;  %v6303_v33 = vpop.f32.mrb[82].mxu1  ;;  %6475 = vmatpush3.bf16.msra.mxu1 %v7389_v61 }
 0x510   : > { %v6304_v10 = vpop.f32.mrb[83].mxu1  ;;  %6476 = vmatprep.subr.bf16.mxu1 %v7390_v19 }
 0x511   : > { %v10437_v6 = vadd.f32 %v6304_v10, %v6303_v33 }
 0x512   : > { %6797 = vmatmul.mubr.bf16.gmra.mrb[116].mxu1 %v10275_v3 }
 0x513   : > { %6800 = vmatprep.mubr.bf16.mxu1 %v10279_v12  ;;  %6477 = vmatpush3.bf16.msra.mxu1 %v7391_v49 }
 0x514   : > { %6478 = vmatprep.subr.bf16.mxu1 %v7392_v52 }
 0x515   : > { %v6306_v22 = vpop.f32.mrb[84].mxu1 }
 0x516   : > { %v6307_v58 = vpop.f32.mrb[85].mxu1 }
 0x517   : > { %v10441_v21 = vadd.f32 %v6307_v58, %v6306_v22  ;;  %v6309_v1 = vpop.f32.mrb[86].mxu1  ;;  %6479 = vmatpush3.bf16.msra.mxu1 %v7393_v44 }
 0x518   : > { %v6310_v61 = vpop.f32.mrb[87].mxu1  ;;  %6808 = vmatprep.subr.bf16.mxu1 %v7394_v63 }
 0x519   : > { %v10443_v19 = vadd.f32 %v6310_v61, %v6309_v1 }
 0x51a   : > { %6801 = vmatmul.mubr.bf16.gmra.mrb[120].mxu1 %v10284_v30 }
 0x51b   : > { %6804 = vmatprep.mubr.bf16.mxu1 %v10290_v36 }
 0x51d   : > { %v6312_v31 = vpop.f32.mrb[88].mxu1 }
 0x51e   : > { %v6313_v57 = vpop.f32.mrb[89].mxu1 }
 0x51f   : > { %v10447_v33 = vadd.f32 %v6313_v57, %v6312_v31  ;;  %v6315_v49 = vpop.f32.mrb[90].mxu1  ;;  %v7396_v31 = vld [vmem:[#allocation8 + $0x210] sm:$0xff]  }
 0x520   : > { %v6316_v10 = vpop.f32.mrb[91].mxu1 }
 0x521   : > { %v10449_v52 = vadd.f32 %v6316_v10, %v6315_v49 }
 0x522   : > { %6805 = vmatmul.mubr.bf16.gmra.mrb[124].mxu1 %v10303_v60 }
 0x523   : > { %5261 = vmatprep.mubr.bf16.mxu1 %v10133_v27 }
 0x525   : > { %v6318_v44 = vpop.f32.mrb[92].mxu1 }
 0x526   : > { %v6319_v22 = vpop.f32.mrb[93].mxu1 }
 0x527   : > { %v10453_v58 = vadd.f32 %v6319_v22, %v6318_v44  ;;  %v6321_v1 = vpop.f32.mrb[94].mxu1  ;;  %v7397_v22 = vld [vmem:[#allocation8 + $0x218] sm:$0xff]  }
 0x528   : > { %v6322_v61 = vpop.f32.mrb[95].mxu1 }
 0x529   : > { %11390 = vst [vmem:[#allocation34_spill] sm:$0xff] %v10453_v58  ;;  %v10455_v14 = vadd.f32 %v6322_v61, %v6321_v1 }
 0x52a   : > { %5262 = vmatmul.mubr.bf16.vlgmr.msra.gmra.mrb[176].mxu1 %v10367_v53 }
 0x52b   : > { %5269 = vmatprep.mubr.bf16.mxu1 %v10145_v20  ;;  %6809 = vmatpush3.bf16.msra.mxu1 %v7394_v63  ;;  %v7398_v20 = vld [vmem:[#allocation8 + $0x220] sm:$0xff]  }
 0x52c   : > { %6810 = vmatprep.subr.bf16.mxu1 %v7395_v16 }
 0x52d   : > { %v6324_v57 = vpop.f32.mrb[96].mxu1 }
 0x52e   : > { %v6325_v49 = vpop.f32.mrb[97].mxu1 }
 0x52f   : > { %v10459_v10 = vadd.f32 %v6325_v49, %v6324_v57  ;;  %v6327_v27 = vpop.f32.mrb[98].mxu1  ;;  %6811 = vmatpush3.bf16.msra.mxu1 %v7395_v16  ;;  %v7399_v16 = vld [vmem:[#allocation8 + $0x228] sm:$0xff]  }
 0x530   : > { %v6328_v44 = vpop.f32.mrb[99].mxu1  ;;  %6812 = vmatprep.subr.bf16.mxu1 %v7396_v31 }
 0x531   : > { %v10461_v58 = vadd.f32 %v6328_v44, %v6327_v27 }
 0x532   : > { %5270 = vmatmul.mubr.bf16.gmra.mrb[180].mxu1 %v10373_v13  ;;  %v7400_v13 = vld [vmem:[#allocation8 + $0x230] sm:$0xff]  }
 0x533   : > { %5277 = vmatprep.mubr.bf16.mxu1 %v11385_v56  ;;  %6813 = vmatpush3.bf16.msra.mxu1 %v7396_v31  ;;  %v7401_v56 = vld [vmem:[#allocation8 + $0x238] sm:$0xff]  }
 0x534   : > { %6814 = vmatprep.subr.bf16.mxu1 %v7397_v22 }
 0x535   : > { %v6330_v53 = vpop.f32.mrb[100].mxu1 }
 0x536   : > { %v6331_v63 = vpop.f32.mrb[101].mxu1 }
 0x537   : > { %v10465_v1 = vadd.f32 %v6331_v63, %v6330_v53  ;;  %v6333_v61 = vpop.f32.mrb[102].mxu1  ;;  %6815 = vmatpush3.bf16.msra.mxu1 %v7397_v22 }
 0x538   : > { %v6334_v57 = vpop.f32.mrb[103].mxu1  ;;  %6816 = vmatprep.subr.bf16.mxu1 %v7398_v20 }
 0x539   : > { %v10467_v49 = vadd.f32 %v6334_v57, %v6333_v61 }
 0x53a   : > { %5278 = vmatmul.mubr.bf16.gmra.mrb[184].mxu1 %v10178_v17 }
 0x53b   : > { %5285 = vmatprep.mubr.bf16.mxu1 %v11386_v42  ;;  %6817 = vmatpush3.bf16.msra.mxu1 %v7398_v20 }
 0x53c   : > { %6818 = vmatprep.subr.bf16.mxu1 %v7399_v16 }
 0x53f   : > { %6819 = vmatpush3.bf16.msra.mxu1 %v7399_v16 }
 0x540   : > { %6820 = vmatprep.subr.bf16.mxu1 %v7400_v13 }
 0x542   : > { %5286 = vmatmul.mubr.bf16.gmra.mrb[188].mxu1 %v10184_v23 }
 0x543   : > { %5293 = vmatprep.mubr.bf16.mxu1 %v11387_v62  ;;  %6821 = vmatpush3.bf16.msra.mxu1 %v7400_v13 }
 0x544   : > { %6822 = vmatprep.subr.bf16.mxu1 %v7401_v56 }
 0x547   : > { %6823 = vmatpush3.bf16.msra.mxu1 %v7401_v56 }
 0x54a   : > { %5294 = vmatmul.mubr.bf16.gmra.mrb[192].mxu1 %v10196_v34 }
 0x54b   : > { %5301 = vmatprep.mubr.bf16.mxu1 %v11388_v55 }
 0x552   : > { %5302 = vmatmul.mubr.bf16.gmra.mrb[196].mxu1 %v10202_v25 }
 0x553   : > { %5309 = vmatprep.mubr.bf16.mxu1 %v11389_v26 }
 0x55a   : > { %5310 = vmatmul.mubr.bf16.gmra.mrb[200].mxu1 %v10218_v18 }
 0x55b   : > { %5317 = vmatprep.mubr.bf16.mxu1 %v10205_v7 }
 0x562   : > { %5318 = vmatmul.mubr.bf16.gmra.mrb[204].mxu1 %v10224_v28 }
 0x563   : > { %5325 = vmatprep.mubr.bf16.mxu1 %v10211_v51 }
 0x56a   : > { %5326 = vmatmul.mubr.bf16.gmra.mrb[208].mxu1 %v10235_v46 }
 0x56b   : > { %5333 = vmatprep.mubr.bf16.mxu1 %v10295_v47 }
 0x56d   : > { %v6372_v17 = vpop.f32.mrb[128].mxu1 }
 0x56e   : > { %v6373_v34 = vpop.f32.mrb[129].mxu1 }
 0x56f   : > { %v6374_v23 = vadd.f32 %v6373_v34, %v6372_v17  ;;  %v6375_v42 = vpop.f32.mrb[130].mxu1 }
 0x570   : > { %v6376_v62 = vpop.f32.mrb[131].mxu1 }
 0x571   : > { %v10484_v25 = vadd.f32 %v6374_v23, %v10385_v45  ;;  %v6377_v55 = vadd.f32 %v6376_v62, %v6375_v42 }
 0x572   : > { %5334 = vmatmul.mubr.bf16.gmra.mrb[212].mxu1 %v10309_v43 }
 0x573   : > { %v10488_v7 = vadd.f32 %v6377_v55, %v10387_v8  ;;  %5341 = vmatprep.mubr.bf16.mxu1 %v10299_v41 }
 0x575   : > { %v6378_v51 = vpop.f32.mrb[132].mxu1 }
 0x576   : > { %v6379_v18 = vpop.f32.mrb[133].mxu1 }
 0x577   : > { %v6380_v28 = vadd.f32 %v6379_v18, %v6378_v51  ;;  %v6381_v46 = vpop.f32.mrb[134].mxu1 }
 0x578   : > { %v6382_v47 = vpop.f32.mrb[135].mxu1 }
 0x579   : > { %v10492_v26 = vadd.f32 %v6380_v28, %v10391_v50  ;;  %v6383_v31 = vadd.f32 %v6382_v47, %v6381_v46 }
 0x57a   : > { %5342 = vmatmul.mubr.bf16.gmra.mrb[216].mxu1 %v10317_v4 }
 0x57b   : > { %v10496_v45 = vadd.f32 %v6383_v31, %v10393_v24  ;;  %5349 = vmatprep.mubr.bf16.mxu1 %v10314_v38 }
 0x57d   : > { %v6384_v43 = vpop.f32.mrb[136].mxu1 }
 0x57e   : > { %v6385_v8 = vpop.f32.mrb[137].mxu1 }
 0x57f   : > { %v6386_v27 = vadd.f32 %v6385_v8, %v6384_v43  ;;  %v6387_v41 = vpop.f32.mrb[138].mxu1 }
 0x580   : > { %v6388_v44 = vpop.f32.mrb[139].mxu1 }
 0x581   : > { %v10500_v22 = vadd.f32 %v6386_v27, %v10397_v5  ;;  %v6389_v20 = vadd.f32 %v6388_v44, %v6387_v41 }
 0x582   : > { %5350 = vmatmul.mubr.bf16.gmra.mrb[220].mxu1 %v10329_v11 }
 0x583   : > { %v10504_v50 = vadd.f32 %v6389_v20, %v10399_v48  ;;  %6824 = vmatprep.mubr.bf16.mxu1 %v10421_v29 }
 0x585   : > { %v6390_v4 = vpop.f32.mrb[140].mxu1 }
 0x586   : > { %v6391_v24 = vpop.f32.mrb[141].mxu1 }
 0x587   : > { %v6392_v53 = vadd.f32 %v6391_v24, %v6390_v4  ;;  %v6393_v38 = vpop.f32.mrb[142].mxu1  ;;  %v11392_v4 = vld [vmem:[#allocation37_spill] sm:$0xff] }
 0x588   : > { %v6394_v63 = vpop.f32.mrb[143].mxu1 }
 0x589   : > { %v10508_v61 = vadd.f32 %v6392_v53, %v10407_v0  ;;  %v6395_v57 = vadd.f32 %v6394_v63, %v6393_v38  ;;  %v11393_v63 = vld [vmem:[#allocation34_spill] sm:$0xff] }
 0x58a   : > { %6825 = vmatmul.mubr.bf16.vlgmr.msra.gmra.mrb[104].mxu1 %v10426_v37 }
 0x58b   : > { %v10512_v5 = vadd.f32 %v6395_v57, %v10409_v32  ;;  %6828 = vmatprep.mubr.bf16.mxu1 %v10266_v39 }
 0x58d   : > { %v6396_v11 = vpop.f32.mrb[144].mxu1 }
 0x58e   : > { %v6397_v48 = vpop.f32.mrb[145].mxu1 }
 0x58f   : > { %v6398_v16 = vadd.f32 %v6397_v48, %v6396_v11  ;;  %v6399_v29 = vpop.f32.mrb[146].mxu1 }
 0x590   : > { %v6400_v13 = vpop.f32.mrb[147].mxu1 }
 0x591   : > { %v10516_v56 = vadd.f32 %v6398_v16, %v10416_v15  ;;  %v6401_v17 = vadd.f32 %v6400_v13, %v6399_v29 }
 0x592   : > { %6829 = vmatmul.mubr.bf16.gmra.mrb[108].mxu1 %v10272_v54 }
 0x593   : > { %v10520_v0 = vadd.f32 %v6401_v17, %v10418_v35  ;;  %6832 = vmatprep.mubr.bf16.mxu1 %v10275_v3 }
 0x595   : > { %v6402_v32 = vpop.f32.mrb[148].mxu1 }
 0x596   : > { %v6403_v37 = vpop.f32.mrb[149].mxu1 }
 0x597   : > { %v6404_v34 = vadd.f32 %v6403_v37, %v6402_v32  ;;  %v6405_v39 = vpop.f32.mrb[150].mxu1 }
 0x598   : > { %v6406_v23 = vpop.f32.mrb[151].mxu1 }
 0x599   : > { %v10524_v42 = vadd.f32 %v6404_v34, %v10429_v9  ;;  %v6407_v62 = vadd.f32 %v6406_v23, %v6405_v39 }
 0x59a   : > { %6833 = vmatmul.mubr.bf16.gmra.mrb[112].mxu1 %v10279_v12 }
 0x59b   : > { %v10528_v15 = vadd.f32 %v6407_v62, %v10431_v40  ;;  %6836 = vmatprep.mubr.bf16.mxu1 %v10284_v30 }
 0x59d   : > { %v6408_v54 = vpop.f32.mrb[152].mxu1 }
 0x59e   : > { %v6409_v35 = vpop.f32.mrb[153].mxu1 }
 0x59f   : > { %v6410_v55 = vadd.f32 %v6409_v35, %v6408_v54  ;;  %v6411_v3 = vpop.f32.mrb[154].mxu1 }
 0x5a0   : > { %v6412_v51 = vpop.f32.mrb[155].mxu1 }
 0x5a1   : > { %v10532_v18 = vadd.f32 %v6410_v55, %v10435_v2  ;;  %v6413_v28 = vadd.f32 %v6412_v51, %v6411_v3 }
 0x5a2   : > { %6837 = vmatmul.mubr.bf16.gmra.mrb[116].mxu1 %v10290_v36  ;;  %v11391_v36 = vld [vmem:[#allocation29_spill] sm:$0xff] }
 0x5a3   : > { %v10536_v9 = vadd.f32 %v6413_v28, %v10437_v6  ;;  %6840 = vmatprep.mubr.bf16.mxu1 %v10303_v60 }
 0x5a5   : > { %v6414_v12 = vpop.f32.mrb[156].mxu1 }
 0x5a6   : > { %v6415_v40 = vpop.f32.mrb[157].mxu1 }
 0x5a7   : > { %v6416_v46 = vadd.f32 %v6415_v40, %v6414_v12  ;;  %v6417_v30 = vpop.f32.mrb[158].mxu1 }
 0x5a8   : > { %v6418_v47 = vpop.f32.mrb[159].mxu1 }
 0x5a9   : > { %v10540_v31 = vadd.f32 %v6416_v46, %v10441_v21  ;;  %v6419_v43 = vadd.f32 %v6418_v47, %v6417_v30 }
 0x5aa   : > { %6841 = vmatmul.mubr.bf16.gmra.mrb[120].mxu1 %v10320_v59 }
 0x5ab   : > { %v10544_v2 = vadd.f32 %v6419_v43, %v10443_v19  ;;  %6844 = vmatprep.mubr.bf16.mxu1 %v11391_v36 }
 0x5ad   : > { %v6420_v6 = vpop.f32.mrb[160].mxu1 }
 0x5ae   : > { %v6421_v8 = vpop.f32.mrb[161].mxu1 }
 0x5af   : > { %v6422_v27 = vadd.f32 %v6421_v8, %v6420_v6  ;;  %v6423_v60 = vpop.f32.mrb[162].mxu1 }
 0x5b0   : > { %v6424_v41 = vpop.f32.mrb[163].mxu1 }
 0x5b1   : > { %v10548_v44 = vadd.f32 %v6422_v27, %v10447_v33  ;;  %v6425_v20 = vadd.f32 %v6424_v41, %v6423_v60 }
 0x5b2   : > { %6845 = vmatmul.mubr.bf16.gmra.mrb[124].mxu1 %v11392_v4 }
 0x5b3   : > { %v10552_v21 = vadd.f32 %v6425_v20, %v10449_v52 }
 0x5b5   : > { %v6426_v59 = vpop.f32.mrb[164].mxu1 }
 0x5b6   : > { %v6427_v24 = vpop.f32.mrb[165].mxu1 }
 0x5b7   : > { %v6428_v19 = vadd.f32 %v6427_v24, %v6426_v59  ;;  %v6429_v53 = vpop.f32.mrb[166].mxu1 }
 0x5b8   : > { %v6430_v38 = vpop.f32.mrb[167].mxu1 }
 0x5b9   : > { %v10555_v57 = vadd.f32 %v6428_v19, %v11393_v63  ;;  %v6431_v11 = vadd.f32 %v6430_v38, %v6429_v53 }
 0x5bb   : > { %v10558_v48 = vadd.f32 %v6431_v11, %v10455_v14 }
 0x5bd   : > { %v6432_v33 = vpop.f32.mrb[168].mxu1 }
 0x5be   : > { %v6433_v16 = vpop.f32.mrb[169].mxu1 }
 0x5bf   : > { %v6434_v29 = vadd.f32 %v6433_v16, %v6432_v33  ;;  %v6435_v13 = vpop.f32.mrb[170].mxu1 }
 0x5c0   : > { %v6436_v17 = vpop.f32.mrb[171].mxu1 }
 0x5c1   : > { %v10561_v52 = vadd.f32 %v6434_v29, %v10459_v10  ;;  %v6437_v32 = vadd.f32 %v6436_v17, %v6435_v13 }
 0x5c3   : > { %v10564_v37 = vadd.f32 %v6437_v32, %v10461_v58 }
 0x5c5   : > { %v6438_v34 = vpop.f32.mrb[172].mxu1 }
 0x5c6   : > { %v6439_v39 = vpop.f32.mrb[173].mxu1 }
 0x5c7   : > { %v6440_v23 = vadd.f32 %v6439_v39, %v6438_v34  ;;  %v6441_v62 = vpop.f32.mrb[174].mxu1 }
 0x5c8   : > { %v6442_v54 = vpop.f32.mrb[175].mxu1 }
 0x5c9   : > { %v10567_v14 = vadd.f32 %v6440_v23, %v10465_v1  ;;  %v6443_v35 = vadd.f32 %v6442_v54, %v6441_v62 }
 0x5cb   : > { %v10570_v55 = vadd.f32 %v6443_v35, %v10467_v49 }
 0x5fd   : > { %v6480_v3 = vpop.f32.mrb[176].mxu1 }
 0x5fe   : > { %v6481_v51 = vpop.f32.mrb[177].mxu1 }
 0x5ff   : > { %v6482_v10 = vadd.f32 %v6481_v51, %v6480_v3  ;;  %v6483_v28 = vpop.f32.mrb[178].mxu1 }
 0x600   : > { %v6484_v12 = vpop.f32.mrb[179].mxu1 }
 0x601   : > { %v6485_v40 = vadd.f32 %v6484_v12, %v6483_v28  ;;  %v10573_v58 = vadd.f32 %v10484_v25, %v6482_v10 }
 0x603   : > { %v10576_v46 = vadd.f32 %v10488_v7, %v6485_v40 }
 0x605   : > { %v6486_v30 = vpop.f32.mrb[180].mxu1 }
 0x606   : > { %v6487_v47 = vpop.f32.mrb[181].mxu1 }
 0x607   : > { %v6488_v1 = vadd.f32 %v6487_v47, %v6486_v30  ;;  %v6489_v43 = vpop.f32.mrb[182].mxu1 }
 0x608   : > { %v6490_v36 = vpop.f32.mrb[183].mxu1 }
 0x609   : > { %v6491_v6 = vadd.f32 %v6490_v36, %v6489_v43  ;;  %v10579_v49 = vadd.f32 %v10492_v26, %v6488_v1 }
 0x60b   : > { %v10582_v8 = vadd.f32 %v10496_v45, %v6491_v6 }
 0x60d   : > { %v6492_v27 = vpop.f32.mrb[184].mxu1 }
 0x60e   : > { %v6493_v60 = vpop.f32.mrb[185].mxu1 }
 0x60f   : > { %v6494_v41 = vadd.f32 %v6493_v60, %v6492_v27  ;;  %v6495_v25 = vpop.f32.mrb[186].mxu1 }
 0x610   : > { %v6496_v20 = vpop.f32.mrb[187].mxu1 }
 0x611   : > { %v6497_v4 = vadd.f32 %v6496_v20, %v6495_v25  ;;  %v10585_v7 = vadd.f32 %v10500_v22, %v6494_v41 }
 0x613   : > { %v10588_v59 = vadd.f32 %v10504_v50, %v6497_v4 }
 0x615   : > { %v6498_v24 = vpop.f32.mrb[188].mxu1 }
 0x616   : > { %v6499_v19 = vpop.f32.mrb[189].mxu1 }
 0x617   : > { %v6500_v53 = vadd.f32 %v6499_v19, %v6498_v24  ;;  %v6501_v26 = vpop.f32.mrb[190].mxu1 }
 0x618   : > { %v6502_v38 = vpop.f32.mrb[191].mxu1 }
 0x619   : > { %v6503_v63 = vadd.f32 %v6502_v38, %v6501_v26  ;;  %v10591_v45 = vadd.f32 %v10508_v61, %v6500_v53 }
 0x61b   : > { %v10594_v11 = vadd.f32 %v10512_v5, %v6503_v63 }
 0x61d   : > { %v6504_v33 = vpop.f32.mrb[192].mxu1 }
 0x61e   : > { %v6505_v16 = vpop.f32.mrb[193].mxu1 }
 0x61f   : > { %v6506_v29 = vadd.f32 %v6505_v16, %v6504_v33  ;;  %v6507_v22 = vpop.f32.mrb[194].mxu1 }
 0x620   : > { %v6508_v13 = vpop.f32.mrb[195].mxu1 }
 0x621   : > { %v6509_v17 = vadd.f32 %v6508_v13, %v6507_v22  ;;  %v10597_v50 = vadd.f32 %v10516_v56, %v6506_v29 }
 0x623   : > { %v10600_v32 = vadd.f32 %v10520_v0, %v6509_v17 }
 0x625   : > { %v6510_v34 = vpop.f32.mrb[196].mxu1 }
 0x626   : > { %v6511_v39 = vpop.f32.mrb[197].mxu1 }
 0x627   : > { %v6512_v23 = vadd.f32 %v6511_v39, %v6510_v34  ;;  %v6513_v61 = vpop.f32.mrb[198].mxu1 }
 0x628   : > { %v6514_v62 = vpop.f32.mrb[199].mxu1 }
 0x629   : > { %v6515_v54 = vadd.f32 %v6514_v62, %v6513_v61  ;;  %v10603_v5 = vadd.f32 %v10524_v42, %v6512_v23 }
 0x62b   : > { %v10606_v35 = vadd.f32 %v10528_v15, %v6515_v54 }
 0x62d   : > { %v6516_v3 = vpop.f32.mrb[200].mxu1 }
 0x62e   : > { %v6517_v51 = vpop.f32.mrb[201].mxu1 }
 0x62f   : > { %v6518_v10 = vadd.f32 %v6517_v51, %v6516_v3  ;;  %v6519_v56 = vpop.f32.mrb[202].mxu1  ;;  %v6159_v51 = vld [vmem:[%s8186_s24 + $0x38] sm:$0xff]  }
 0x630   : > { %v6520_v28 = vpop.f32.mrb[203].mxu1 }
 0x631   : > { %v6521_v12 = vadd.f32 %v6520_v28, %v6519_v56  ;;  %v10609_v0 = vadd.f32 %v10532_v18, %v6518_v10  ;;  %v6158_v56 = vld [vmem:[%s8186_s24 + $0x30] sm:$0xff]   ;;  %v10650_v28 = vld [vmem:[#allocation11 + $0x1] ss:$0 sm:$0xff] }
 0x633   : > { %v10612_v40 = vadd.f32 %v10536_v9, %v6521_v12 }
 0x635   : > { %v6522_v30 = vpop.f32.mrb[204].mxu1 }
 0x636   : > { %v6523_v47 = vpop.f32.mrb[205].mxu1 }
 0x637   : > { %v6524_v1 = vadd.f32 %v6523_v47, %v6522_v30  ;;  %v6525_v42 = vpop.f32.mrb[206].mxu1  ;;  %v6116_v47 = vunpack.c.l.bf16 %v6159_v51 }
 0x638   : > { %v6526_v43 = vpop.f32.mrb[207].mxu1 }
 0x639   : > { %v6527_v36 = vadd.f32 %v6526_v43, %v6525_v42  ;;  %v10615_v15 = vadd.f32 %v10540_v31, %v6524_v1  ;;  %v6112_v43 = vunpack.c.l.bf16 %v6158_v56 }
 0x63b   : > { %v10618_v6 = vadd.f32 %v10544_v2, %v6527_v36 }
 0x63d   : > { %v6528_v27 = vpop.f32.mrb[208].mxu1 }
 0x63e   : > { %v6529_v60 = vpop.f32.mrb[209].mxu1 }
 0x63f   : > { %v6530_v41 = vadd.f32 %v6529_v60, %v6528_v27  ;;  %v6531_v18 = vpop.f32.mrb[210].mxu1  ;;  %v6117_v27 = vunpack.c.h.bf16 %v6159_v51 }
 0x640   : > { %v6532_v25 = vpop.f32.mrb[211].mxu1 }
 0x641   : > { %v6533_v20 = vadd.f32 %v6532_v25, %v6531_v18  ;;  %v10621_v9 = vadd.f32 %v10548_v44, %v6530_v41 }
 0x643   : > { %v10624_v4 = vadd.f32 %v10552_v21, %v6533_v20 }
 0x645   : > { %v6534_v24 = vpop.f32.mrb[212].mxu1 }
 0x646   : > { %v6535_v19 = vpop.f32.mrb[213].mxu1 }
 0x647   : > { %v6536_v53 = vadd.f32 %v6535_v19, %v6534_v24  ;;  %v6537_v31 = vpop.f32.mrb[214].mxu1 }
 0x648   : > { %v6538_v26 = vpop.f32.mrb[215].mxu1 }
 0x649   : > { %v6539_v38 = vadd.f32 %v6538_v26, %v6537_v31  ;;  %v10627_v2 = vadd.f32 %v10555_v57, %v6536_v53  ;;  %v6161_v53 = vld [vmem:[%s8186_s24 + $0x48] sm:$0xff]  }
 0x64b   : > { %v10630_v63 = vadd.f32 %v10558_v48, %v6539_v38 }
 0x64d   : > { %v6540_v33 = vpop.f32.mrb[216].mxu1 }
 0x64e   : > { %v6541_v16 = vpop.f32.mrb[217].mxu1 }
 0x64f   : > { %v6542_v29 = vadd.f32 %v6541_v16, %v6540_v33  ;;  %v6543_v44 = vpop.f32.mrb[218].mxu1  ;;  %v6160_v33 = vld [vmem:[%s8186_s24 + $0x40] sm:$0xff]  }
 0x650   : > { %v6544_v21 = vpop.f32.mrb[219].mxu1 }
 0x651   : > { %v6545_v22 = vadd.f32 %v6544_v21, %v6543_v44  ;;  %v10633_v13 = vadd.f32 %v10561_v52, %v6542_v29  ;;  %v10644_v52 = vld [vmem:[#allocation11] ss:$0 sm:$0xff] }
 0x653   : > { %v10636_v17 = vadd.f32 %v10564_v37, %v6545_v22 }
 0x655   : > { %v6546_v57 = vpop.f32.mrb[220].mxu1 }
 0x656   : > { %v6547_v34 = vpop.f32.mrb[221].mxu1 }
 0x657   : > { %v6548_v39 = vadd.f32 %v6547_v34, %v6546_v57  ;;  %v6549_v48 = vpop.f32.mrb[222].mxu1  ;;  %v6124_v34 = vunpack.c.l.bf16 %v6161_v53 }
 0x658   : > { %v6550_v23 = vpop.f32.mrb[223].mxu1 }
 0x659   : > { %v6551_v61 = vadd.f32 %v6550_v23, %v6549_v48  ;;  %v10639_v62 = vadd.f32 %v10567_v14, %v6548_v39 }
 0x65b   : > { %v10642_v54 = vadd.f32 %v10570_v55, %v6551_v61 }
 0x65d   : > { %v6826_v3 = vpop.f32.mrb[104].mxu1 }
 0x65e   : > { %v6882_v37 = vadd.f32 %v10579_v49, %v6826_v3  ;;  %v5392_v10 = vpop.f32.mrb[105].mxu1 }
 0x65f   : > { %v6885_v12 = vadd.f32 %v10573_v58, %v5392_v10  ;;  %v6827_v30 = vpop.f32.mrb[106].mxu1 }
 0x660   : > { %v5518_v14 = vmul.f32 %v6882_v37, %v10644_v52  ;;  %v6888_v55 = vadd.f32 %v10582_v8, %v6827_v30  ;;  %v5395_v1 = vpop.f32.mrb[107].mxu1  ;;  %v6113_v8 = vunpack.c.h.bf16 %v6158_v56  ;;  %v6125_v37 = vunpack.c.h.bf16 %v6161_v53 }
 0x661   : > { %v5516_v42 = vmul.f32 %v6885_v12, %v10644_v52  ;;  %v6891_v49 = vadd.f32 %v10576_v46, %v5395_v1  ;;  %v6121_v56 = vunpack.c.h.bf16 %v6160_v33 }
 0x662   : > { %v5547_v36 = vadd.f32 %v10650_v28, %v5518_v14  ;;  %v5519_v58 = vmul.f32 %v6888_v55, %v10644_v52  ;;  %v6163_v55 = vld [vmem:[%s8186_s24 + $0x58] sm:$0xff]  }
 0x663   : > { %v5545_v60 = vadd.f32 %v10650_v28, %v5516_v42  ;;  %v5517_v41 = vmul.f32 %v6891_v49, %v10644_v52 }
 0x664   : > { %v5623_v18 = vadd.f32 %v6116_v47, %v5547_v36  ;;  %v5548_v25 = vadd.f32 %v10650_v28, %v5519_v58  ;;  %v6162_v36 = vld [vmem:[%s8186_s24 + $0x50] sm:$0xff]  }
 0x665   : > { %v5621_v20 = vadd.f32 %v6112_v43, %v5545_v60  ;;  %v5546_v24 = vadd.f32 %v10650_v28, %v5517_v41  ;;  %v6830_v19 = vpop.f32.mrb[108].mxu1  ;;  %v6128_v53 = vunpack.c.l.bf16 %v6162_v36 }
 0x666   : > { %v5647_v46 = vmax.f32 %v5623_v18, 0.0  ;;  %v5624_v31 = vadd.f32 %v6117_v27, %v5548_v25  ;;  %v6894_v26 = vadd.f32 %v10591_v45, %v6830_v19  ;;  %v5408_v38 = vpop.f32.mrb[109].mxu1  ;;  %v6132_v25 = vunpack.c.l.bf16 %v6163_v55 }
 0x667   : > { %v5645_v16 = vmax.f32 %v5621_v20, 0.0  ;;  %v5622_v29 = vadd.f32 %v6113_v8, %v5546_v24  ;;  %v6897_v44 = vadd.f32 %v10585_v7, %v5408_v38  ;;  %v6831_v21 = vpop.f32.mrb[110].mxu1  ;;  %v6120_v7 = vunpack.c.l.bf16 %v6160_v33 }
 0x668   : > { %5671 = vst [vmem:[%s10669_s20 + $0x10] sm:$0xff] %v5647_v46  ;;  %v5648_v22 = vmax.f32 %v5624_v31, 0.0  ;;  %v5522_v57 = vmul.f32 %v6894_v26, %v10644_v52  ;;  %v6900_v45 = vadd.f32 %v10594_v11, %v6831_v21  ;;  %v5411_v39 = vpop.f32.mrb[111].mxu1  ;;  %v6133_v26 = vunpack.c.h.bf16 %v6163_v55 }
 0x669   : > { %5669 = vst [vmem:[%s10669_s20] sm:$0xff] %v5645_v16  ;;  %v5646_v48 = vmax.f32 %v5622_v29, 0.0  ;;  %v5520_v23 = vmul.f32 %v6897_v44, %v10644_v52  ;;  %v6903_v61 = vadd.f32 %v10588_v59, %v5411_v39  ;;  %v6129_v33 = vunpack.c.h.bf16 %v6162_v36 }
 0x66a   : > { %5672 = vst [vmem:[%s10669_s20 + $0x18] sm:$0xff] %v5648_v22  ;;  %v5551_v3 = vadd.f32 %v10650_v28, %v5522_v57  ;;  %v5523_v51 = vmul.f32 %v6900_v45, %v10644_v52  ;;  %v6165_v22 = vld [vmem:[%s8186_s24 + $0x68] sm:$0xff]  }
 0x66b   : > { %5670 = vst [vmem:[%s10669_s20 + $0x8] sm:$0xff] %v5646_v48  ;;  %v5549_v10 = vadd.f32 %v10650_v28, %v5520_v23  ;;  %v5521_v11 = vmul.f32 %v6903_v61, %v10644_v52  ;;  %v6164_v48 = vld [vmem:[%s8186_s24 + $0x60] sm:$0xff]  }
 0x66c   : > { %v5627_v12 = vadd.f32 %v6124_v34, %v5551_v3  ;;  %v5552_v30 = vadd.f32 %v10650_v28, %v5523_v51 }
 0x66d   : > { %v5625_v14 = vadd.f32 %v6120_v7, %v5549_v10  ;;  %v5550_v59 = vadd.f32 %v10650_v28, %v5521_v11  ;;  %v6834_v47 = vpop.f32.mrb[112].mxu1  ;;  %v6140_v10 = vunpack.c.l.bf16 %v6165_v22 }
 0x66e   : > { %v5651_v1 = vmax.f32 %v5627_v12, 0.0  ;;  %v5628_v42 = vadd.f32 %v6125_v37, %v5552_v30  ;;  %v6906_v43 = vadd.f32 %v10603_v5, %v6834_v47  ;;  %v5424_v49 = vpop.f32.mrb[113].mxu1  ;;  %v6136_v30 = vunpack.c.l.bf16 %v6164_v48 }
 0x66f   : > { %v5649_v58 = vmax.f32 %v5625_v14, 0.0  ;;  %v5626_v27 = vadd.f32 %v6121_v56, %v5550_v59  ;;  %v6909_v60 = vadd.f32 %v10597_v50, %v5424_v49  ;;  %v6835_v41 = vpop.f32.mrb[114].mxu1  ;;  %v6141_v47 = vunpack.c.h.bf16 %v6165_v22 }
 0x670   : > { %5675 = vst [vmem:[%s10669_s20 + $0x30] sm:$0xff] %v5651_v1  ;;  %v5652_v8 = vmax.f32 %v5628_v42, 0.0  ;;  %v5526_v18 = vmul.f32 %v6906_v43, %v10644_v52  ;;  %v6912_v20 = vadd.f32 %v10606_v35, %v6835_v41  ;;  %v5427_v24 = vpop.f32.mrb[115].mxu1  ;;  %v6137_v1 = vunpack.c.h.bf16 %v6164_v48 }
 0x671   : > { %5673 = vst [vmem:[%s10669_s20 + $0x20] sm:$0xff] %v5649_v58  ;;  %v5650_v19 = vmax.f32 %v5626_v27, 0.0  ;;  %v5524_v5 = vmul.f32 %v6909_v60, %v10644_v52  ;;  %v6915_v46 = vadd.f32 %v10600_v32, %v5427_v24  ;;  %v6167_v58 = vld [vmem:[%s8186_s24 + $0x78] sm:$0xff]  }
 0x672   : > { %5676 = vst [vmem:[%s10669_s20 + $0x38] sm:$0xff] %v5652_v8  ;;  %v5555_v50 = vadd.f32 %v10650_v28, %v5526_v18  ;;  %v5527_v31 = vmul.f32 %v6912_v20, %v10644_v52  ;;  %v6166_v18 = vld [vmem:[%s8186_s24 + $0x70] sm:$0xff]  }
 0x673   : > { %5674 = vst [vmem:[%s10669_s20 + $0x28] sm:$0xff] %v5650_v19  ;;  %v5553_v38 = vadd.f32 %v10650_v28, %v5524_v5  ;;  %v5525_v35 = vmul.f32 %v6915_v46, %v10644_v52  ;;  %v6148_v46 = vunpack.c.l.bf16 %v6167_v58 }
 0x674   : > { %v5631_v16 = vadd.f32 %v6132_v25, %v5555_v50  ;;  %v5556_v29 = vadd.f32 %v10650_v28, %v5527_v31 }
 0x675   : > { %v5629_v44 = vadd.f32 %v6128_v53, %v5553_v38  ;;  %v5554_v32 = vadd.f32 %v10650_v28, %v5525_v35  ;;  %v6838_v21 = vpop.f32.mrb[116].mxu1  ;;  %v6144_v38 = vunpack.c.l.bf16 %v6166_v18 }
 0x676   : > { %v5655_v57 = vmax.f32 %v5631_v16, 0.0  ;;  %v5632_v34 = vadd.f32 %v6133_v26, %v5556_v29  ;;  %v6918_v45 = vadd.f32 %v10615_v15, %v6838_v21  ;;  %v5440_v39 = vpop.f32.mrb[117].mxu1  ;;  %v6149_v16 = vunpack.c.h.bf16 %v6167_v58 }
 0x677   : > { %v5653_v23 = vmax.f32 %v5629_v44, 0.0  ;;  %v5630_v7 = vadd.f32 %v6129_v33, %v5554_v32  ;;  %v6921_v61 = vadd.f32 %v10609_v0, %v5440_v39  ;;  %v6839_v3 = vpop.f32.mrb[118].mxu1  ;;  %v6145_v44 = vunpack.c.h.bf16 %v6166_v18 }
 0x678   : > { %5679 = vst [vmem:[%s10669_s20 + $0x50] sm:$0xff] %v5655_v57  ;;  %v5656_v51 = vmax.f32 %v5632_v34, 0.0  ;;  %v5530_v37 = vmul.f32 %v6918_v45, %v10644_v52  ;;  %v6924_v11 = vadd.f32 %v10618_v6, %v6839_v3  ;;  %v5443_v56 = vpop.f32.mrb[119].mxu1  ;;  %v6169_v34 = vld [vmem:[%s8186_s24 + $0x88] sm:$0xff]  }
 0x679   : > { %5677 = vst [vmem:[%s10669_s20 + $0x40] sm:$0xff] %v5653_v23  ;;  %v5654_v12 = vmax.f32 %v5630_v7, 0.0  ;;  %v5528_v15 = vmul.f32 %v6921_v61, %v10644_v52  ;;  %v6927_v14 = vadd.f32 %v10612_v40, %v5443_v56  ;;  %v6168_v7 = vld [vmem:[%s8186_s24 + $0x80] sm:$0xff]   ;;  %v6156_v56 = vunpack.c.l.bf16 %v6169_v34  ;;  %s10773_s24 = scalar_lea.sflag [#allocation5], %s375_s4 }
 0x67a   : > { %5680 = vst [vmem:[%s10669_s20 + $0x58] sm:$0xff] %v5656_v51  ;;  %v5559_v0 = vadd.f32 %v10650_v28, %v5530_v37  ;;  %v5531_v59 = vmul.f32 %v6924_v11, %v10644_v52 }
 0x67b   : > { %5678 = vst [vmem:[%s10669_s20 + $0x48] sm:$0xff] %v5654_v12  ;;  %v5557_v55 = vadd.f32 %v10650_v28, %v5528_v15  ;;  %v5529_v6 = vmul.f32 %v6927_v14, %v10644_v52  ;;  %v6152_v14 = vunpack.c.l.bf16 %v6168_v7 }
 0x67c   : > { %v5635_v42 = vadd.f32 %v6140_v10, %v5559_v0  ;;  %v5560_v43 = vadd.f32 %v10650_v28, %v5531_v59 }
 0x67d   : > { %v5633_v49 = vadd.f32 %v6136_v30, %v5557_v55  ;;  %v5558_v40 = vadd.f32 %v10650_v28, %v5529_v6  ;;  %v6842_v36 = vpop.f32.mrb[120].mxu1  ;;  %v6153_v6 = vunpack.c.h.bf16 %v6168_v7 }
 0x67e   : > { %v5659_v27 = vmax.f32 %v5635_v42, 0.0  ;;  %v5636_v60 = vadd.f32 %v6141_v47, %v5560_v43  ;;  %v6930_v41 = vadd.f32 %v10627_v2, %v6842_v36  ;;  %v5456_v8 = vpop.f32.mrb[121].mxu1  ;;  %v6157_v47 = vunpack.c.h.bf16 %v6169_v34 }
 0x67f   : > { %v5657_v25 = vmax.f32 %v5633_v49, 0.0  ;;  %v5634_v20 = vadd.f32 %v6137_v1, %v5558_v40  ;;  %v6933_v24 = vadd.f32 %v10621_v9, %v5456_v8  ;;  %v6843_v19 = vpop.f32.mrb[122].mxu1 }
 0x680   : > { %5683 = vst [vmem:[%s10669_s20 + $0x70] sm:$0xff] %v5659_v27  ;;  %v5660_v5 = vmax.f32 %v5636_v60, 0.0  ;;  %v5534_v53 = vmul.f32 %v6930_v41, %v10644_v52  ;;  %v6936_v50 = vadd.f32 %v10630_v63, %v6843_v19  ;;  %v5459_v31 = vpop.f32.mrb[123].mxu1 }
 0x681   : > { %5681 = vst [vmem:[%s10669_s20 + $0x60] sm:$0xff] %v5657_v25  ;;  %v5658_v26 = vmax.f32 %v5634_v20, 0.0  ;;  %v5532_v2 = vmul.f32 %v6933_v24, %v10644_v52  ;;  %v6939_v35 = vadd.f32 %v10624_v4, %v5459_v31 }
 0x682   : > { %5684 = vst [vmem:[%s10669_s20 + $0x78] sm:$0xff] %v5660_v5  ;;  %v5563_v9 = vadd.f32 %v10650_v28, %v5534_v53  ;;  %v5535_v33 = vmul.f32 %v6936_v50, %v10644_v52 }
 0x683   : > { %5682 = vst [vmem:[%s10669_s20 + $0x68] sm:$0xff] %v5658_v26  ;;  %v5561_v63 = vadd.f32 %v10650_v28, %v5532_v2  ;;  %v5533_v29 = vmul.f32 %v6939_v35, %v10644_v52 }
 0x684   : > { %v5639_v32 = vadd.f32 %v6148_v46, %v5563_v9  ;;  %v5564_v21 = vadd.f32 %v10650_v28, %v5535_v33 }
 0x685   : > { %v5637_v4 = vadd.f32 %v6144_v38, %v5561_v63  ;;  %v5562_v22 = vadd.f32 %v10650_v28, %v5533_v29  ;;  %v6846_v57 = vpop.f32.mrb[124].mxu1 }
 0x686   : > { %v5663_v45 = vmax.f32 %v5639_v32, 0.0  ;;  %v5640_v39 = vadd.f32 %v6149_v16, %v5564_v21  ;;  %v6942_v48 = vadd.f32 %v10639_v62, %v6846_v57  ;;  %v5472_v23 = vpop.f32.mrb[125].mxu1 }
 0x687   : > { %v5661_v61 = vmax.f32 %v5637_v4, 0.0  ;;  %v5638_v3 = vadd.f32 %v6145_v44, %v5562_v22  ;;  %v6945_v51 = vadd.f32 %v10633_v13, %v5472_v23  ;;  %v6847_v37 = vpop.f32.mrb[126].mxu1 }
 0x688   : > { %5687 = vst [vmem:[%s10669_s20 + $0x90] sm:$0xff] %v5663_v45  ;;  %v5664_v10 = vmax.f32 %v5640_v39, 0.0  ;;  %v5538_v11 = vmul.f32 %v6942_v48, %v10644_v52  ;;  %v6948_v12 = vadd.f32 %v10642_v54, %v6847_v37  ;;  %v5475_v15 = vpop.f32.mrb[127].mxu1 }
 0x689   : > { %5685 = vst [vmem:[%s10669_s20 + $0x80] sm:$0xff] %v5661_v61  ;;  %v5662_v62 = vmax.f32 %v5638_v3, 0.0  ;;  %v5536_v30 = vmul.f32 %v6945_v51, %v10644_v52  ;;  %v6951_v0 = vadd.f32 %v10636_v17, %v5475_v15 }
 0x68a   : > { %5688 = vst [vmem:[%s10669_s20 + $0x98] sm:$0xff] %v5664_v10  ;;  %v5567_v13 = vadd.f32 %v10650_v28, %v5538_v11  ;;  %v5539_v59 = vmul.f32 %v6948_v12, %v10644_v52 }
 0x68b   : > { %5686 = vst [vmem:[%s10669_s20 + $0x88] sm:$0xff] %v5662_v62  ;;  %v5565_v55 = vadd.f32 %v10650_v28, %v5536_v30  ;;  %v5537_v54 = vmul.f32 %v6951_v0, %v10644_v52 }
 0x68c   : > { %v5643_v1 = vadd.f32 %v6156_v56, %v5567_v13  ;;  %v5568_v42 = vadd.f32 %v10650_v28, %v5539_v59 }
 0x68d   : > { %v5641_v17 = vadd.f32 %v6152_v14, %v5565_v55  ;;  %v5566_v43 = vadd.f32 %v10650_v28, %v5537_v54 }
 0x68e   : > { %v5667_v49 = vmax.f32 %v5643_v1, 0.0  ;;  %v5644_v40 = vadd.f32 %v6157_v47, %v5568_v42 }
 0x68f   : > { %v5665_v36 = vmax.f32 %v5641_v17, 0.0  ;;  %v5642_v58 = vadd.f32 %v6153_v6, %v5566_v43 }
 0x690   : > { %5691 = vst [vmem:[%s10669_s20 + $0xb0] sm:$0xff] %v5667_v49  ;;  %v5668_v52 = vmax.f32 %v5644_v40, 0.0 }
 0x691   : > { %5689 = vst [vmem:[%s10669_s20 + $0xa0] sm:$0xff] %v5665_v36  ;;  %v5666_v27 = vmax.f32 %v5642_v58, 0.0 }
 0x692   : > { %5692 = vst [vmem:[%s10669_s20 + $0xb8] sm:$0xff] %v5668_v52 }
 0x693   : > { %5690 = vst [vmem:[%s10669_s20 + $0xa8] sm:$0xff] %v5666_v27 }
 0x694   : > { %7591 = shalt.err (!%p7588_p8)
}
 0x695   : > { %s7592_s21 = scalar_lea.hbm %s10767_s12, 3072  ;;  %s7596_s1 = scalar_lea.hbm %s11397_s13, 12288 }
 0x696   : > { %p7593_p4 = scmp.ne.s32.totalorder %s10767_s12, %s7592_s21  ;;  %p7597_p10 = scmp.lt.u32.totalorder %s10767_s12, %s11397_s13 }
 0x697   : > { %p7598_p11 = scmp.lt.u32.totalorder %s7596_s1, %s7592_s21  ;;  %p7600_p0 = scmp.lt.u32.totalorder %s7592_s21, %s10767_s12 }
 0x698   : > { %p7594_p12 = pnand %p7593_p4, %p11398_p7 }
 0x699   : > { %p7599_p13 = por %p7598_p11, %p7597_p10 }
 0x69a   : > { %p7595_p3 = pneg %p7594_p12 }
 0x69b   : > { %p7601_p6 = por %p7600_p0, %p7599_p13 }
 0x69d   : > { %p7602_p1 = pnand %p7601_p6, %p7595_p3 }
 0x69f   : > { %7605 = shalt.err (!%p7602_p1)
}
 0x6a0   : > { %s7750_s6 = smov 128   ;;  %s7751_s7 = smov 8  }
 0x6a1   : > { %7049 = dma.vmem_to_hbm [thread:$0]  (%p11398_p7), %s10761_s2, 3072, %s10767_s12, %s10773_s24, %s7750_s6, %s7750_s6, %s7751_s7  }
 0x6a2 PF: > { %s11399_s22 = sld [smem:[#allocation20_spill]]  ;;  %p7084_p2 = scmp.ge.s32.totalorder %s7736_s10, 2 }
 0x6a3   : > { %p11400_p5 = scmp.ne.s32.totalorder %s11029_s23, 0 }
 0x6a5   : > { %p7072_p9 = pnand %p7084_p2, %p11400_p5 }
 0x6a8   : > { %s5725_s18 = sand.u32 1, %s11399_s22  }
 0x6a9   : > { %s5726_s14 = scalar_lea.sflag [#allocation5], %s5725_s18 }
 0x6aa   : > { %7679 = dma.done.wait (!%p7072_p9), %s5726_s14, 3072  }
 0x6ab   : > { %7681 = vsyncadd (!%p7072_p9), %s5726_s14, 4294964224  ;;  %s27_s10 = sadd.s32 1, %s7736_s10   ;;  %s11402_s21 = sld [smem:[#allocation21_spill]] }
 0x6ac   : > { %p10802_p8 = scmp.ge.s32.totalorder %s27_s10, 6   ;;  %s11403_s22 = sld [smem:[#allocation22_spill]] }
 0x6ad   : > { %s11405_s23 = smov %s11423_s16  ;;  %s11406_s24 = smov %s7700_s25 }
 0x6ae   : > { %s11407_s25 = smov %s7704_s26  ;;  %s11408_s26 = smov %s8079_s27 }
 0x6af   : > { %s11409_s27 = smov %s7712_s28  ;;  %s11410_s28 = smov %s7716_s29 }
 0x6b0   : > { %s11411_s29 = smov %s8094_s0  ;;  %s11412_s30 = smov %s7728_s8 }
 0x6b1   : > { %s11413_s7 = smov %s7732_s9  ;;  %s11414_s8 = smov %s11417_s15 }
 0x6b2   : > { %s11415_s9 = smov %s11421_s5  ;;  %26 = sbr.rel (!%p10802_p8) target bundleno = 22 (0x16), region = 120 }
 0x6b9   :  { %5731 = vsyncpa [#allocation4], 1 }
 0x6ba   :  { %5733 = vsyncpa [#allocation4 + $0x1], 1 }
 0x6bb   :  { %5734 = vsyncpa [#allocation7], 1 }
 0x6bc   :  { %5735 = vsyncpa [#allocation10], 1 }
 0x6bd   :  { %5736 = vsyncpa [#allocation13], 1 }
 0x6be   :  { %5738 = vsyncpa [#allocation13 + $0x1], 1 }
 0x6bf   :  { %5739 = vsyncpa [#allocation5], 1 }
 0x6c0   :  { %5741 = vsyncpa [#allocation5 + $0x1], 1 }

</bundles_post_ra>
